<compile_context>
chip_gen: v5e
topology: v5e:2x2
jax: 0.10.0
libtpu: 0.0.40
codegen_flags: <defaults>
</compile_context>

<pallas_src>
import jax
import jax.numpy as jnp
from jax.experimental import pallas as pl
from jax.experimental.pallas import tpu as pltpu


_LANES = (1024, 512, 256, 128)       # candidate lane-dense last dims (x128)
_TILE_ELEMS = 1024 * 1024            # elements per block (~4 MiB for f32)
_SMALL_FALLBACK_ELEMS = 256 * 1024   # below this, plain XLA add is faster
_SUBLANE = {4: 8, 2: 16, 1: 32}      # packed-sublane multiple per itemsize


def _add_kernel(x_ref, y_ref, o_ref):
    # Elementwise hot path: whole VMEM tile on the VPU.
    o_ref[...] = x_ref[...] + y_ref[...]


def _round_up(n, m):
    return ((n + m - 1) // m) * m


def _choose_block_rows(rows, lane, itemsize):
    """Row tiling for a (rows, lane) slab: big tiles, >=2 grid steps if possible."""
    sub = _SUBLANE.get(itemsize, 32)
    max_block_rows = max(_TILE_ELEMS // lane, sub)   # keeps ~4 MiB f32 tiles
    if rows > max_block_rows:
        return max_block_rows                        # multiple of 8/16/32
    # Fits in one block: still split into two sublane-aligned blocks so v7x's
    # two TensorCores each take a grid step (free on v5e/v6e: grid is a loop).
    half = _round_up(pl.cdiv(rows, 2), sub)
    if half >= rows:
        return rows                                  # block == full array
    return half


def _pallas_add_2d(x2, y2):
    rows, lane = x2.shape
    itemsize = jnp.dtype(x2.dtype).itemsize
    block_rows = _choose_block_rows(rows, lane, itemsize)
    grid = (pl.cdiv(rows, block_rows),)
    spec = pl.BlockSpec((block_rows, lane), lambda i: (i, 0))
    return pl.pallas_call(
        _add_kernel,
        out_shape=jax.ShapeDtypeStruct((rows, lane), x2.dtype),
        grid_spec=pl.GridSpec(
            grid=grid,
            in_specs=[spec, spec],
            out_specs=spec,
        ),
        compiler_params=pltpu.CompilerParams(
            # Independent iterations: v7x shards the grid across both TCs.
            dimension_semantics=("parallel",),
            # 2 inputs + 1 output, double-buffered, up to 4 MiB tiles = 24 MiB.
            vmem_limit_bytes=32 << 20,
        ),
        cost_estimate=pl.CostEstimate(
            flops=rows * lane,
            transcendentals=0,
            bytes_accessed=3 * rows * lane * itemsize,
        ),
    )(x2, y2)


def pallas_add(x, y):
    """Elementwise add of two same-shaped, same-dtype arrays (FloatFunctional.add)."""
    assert x.shape == y.shape, "FloatFunctional.add here assumes matching shapes"
    assert x.dtype == y.dtype

    orig_shape = x.shape
    total = x.size

    # Tiny tensors: XLA's fused add is already at roofline; avoid launch cost.
    if total == 0 or total < _SMALL_FALLBACK_ELEMS:
        return x + y

    # Pick the widest lane-dense last dim that divides the element count.
    lane = None
    for cand in _LANES:
        if total % cand == 0:
            lane = cand
            break

    xf = x.reshape(-1)
    yf = y.reshape(-1)

    if lane is not None:
        rows = total // lane
        out2 = _pallas_add_2d(xf.reshape(rows, lane), yf.reshape(rows, lane))
        return out2.reshape(orig_shape)

    # Awkward element count: Pallas kernel on the 128-aligned bulk, XLA on the
    # (<128-element) tail.  Avoids full-array jnp.pad copies of both inputs.
    lane = _LANES[-1]
    bulk = (total // lane) * lane
    rows = bulk // lane
    out_bulk = _pallas_add_2d(
        xf[:bulk].reshape(rows, lane), yf[:bulk].reshape(rows, lane)
    ).reshape(-1)
    out_tail = xf[bulk:] + yf[bulk:]
    return jnp.concatenate([out_bulk, out_tail]).reshape(orig_shape)


if __name__ == "__main__":
    key = jax.random.PRNGKey(0)
    k = jax.random.split(key, 8)

    # 1) Small NCHW shape consistent with the module (hits the XLA fallback).
    x = jax.random.normal(k[0], (2, 4, 16, 16), dtype=jnp.float32)
    y = jax.random.normal(k[1], (2, 4, 16, 16), dtype=jnp.float32)
    out = jax.block_until_ready(pallas_add(x, y))
    assert jnp.allclose(out, x + y, atol=1e-6), "mismatch (small / fallback path)"

    # 2) 1M elements, lane=1024, rows=1024 -> two 512-row blocks (Pallas path).
    a = jax.random.normal(k[2], (8, 64, 32, 64), dtype=jnp.float32)
    b = jax.random.normal(k[3], (8, 64, 32, 64), dtype=jnp.float32)
    out2 = jax.block_until_ready(pallas_add(a, b))
    assert jnp.allclose(out2, a + b, atol=1e-6), "mismatch (aligned Pallas path)"

    # 3) rows=1500 > block_rows=1024 -> ragged final block (no padding).
    c = jax.random.normal(k[4], (15, 100, 32, 32), dtype=jnp.float32)
    d = jax.random.normal(k[5], (15, 100, 32, 32), dtype=jnp.float32)
    out3 = jax.block_until_ready(pallas_add(c, d))
    assert jnp.allclose(out3, c + d, atol=1e-6), "mismatch (ragged-block path)"

    # 4) Element count not divisible by 128 -> bulk kernel + XLA tail add.
    e = jax.random.normal(k[6], (5, 7, 89, 97), dtype=jnp.float32)
    f = jax.random.normal(k[7], (5, 7, 89, 97), dtype=jnp.float32)
    out4 = jax.block_until_ready(pallas_add(e, f))
    assert jnp.allclose(out4, e + f, atol=1e-6), "mismatch (bulk+tail path)"

    print("KERNEL_OK")
</pallas_src>

<mosaic_0001>
module attributes {stable_mosaic.version = 11 : i64} {
  func.func @_add_kernel(%arg0: i32, %arg1: memref<512x1024xf32, #tpu.memory_space<vmem>>, %arg2: memref<512x1024xf32, #tpu.memory_space<vmem>>, %arg3: memref<512x1024xf32, #tpu.memory_space<vmem>>) attributes {dimension_semantics = [#tpu.dimension_semantics<parallel>], iteration_bounds = array<i64: 2>, scalar_prefetch = 0 : i64, scratch_operands = 0 : i64, tpu.core_type = #tpu.core_type<tc>, window_params = [{transform_indices = @transform_0, window_bounds = array<i64: 512, 1024>}, {transform_indices = @transform_1, window_bounds = array<i64: 512, 1024>}, {transform_indices = @transform_2, window_bounds = array<i64: 512, 1024>}]} {
    %c0 = arith.constant 0 : index
    %c0_0 = arith.constant 0 : index
    %0 = vector.load %arg1[%c0, %c0_0] : memref<512x1024xf32, #tpu.memory_space<vmem>>, vector<512x1024xf32>
    %c0_1 = arith.constant 0 : index
    %c0_2 = arith.constant 0 : index
    %1 = vector.load %arg2[%c0_1, %c0_2] : memref<512x1024xf32, #tpu.memory_space<vmem>>, vector<512x1024xf32>
    %2 = arith.addf %0, %1 : vector<512x1024xf32>
    %c0_3 = arith.constant 0 : index
    %c0_4 = arith.constant 0 : index
    %3 = vector.load %arg3[%c0_3, %c0_4] : memref<512x1024xf32, #tpu.memory_space<vmem>>, vector<512x1024xf32>
    tpu.vector_store %arg3[%c0_3, %c0_4], %2 {strides = array<i32>} : memref<512x1024xf32, #tpu.memory_space<vmem>>, vector<512x1024xf32>,
    return
  }
  func.func @transform_0(%arg0: i32) -> (i32, i32) {
    %c0_i32 = arith.constant 0 : i32
    %c0_i32_0 = arith.constant 0 : i32
    return %arg0, %c0_i32 : i32, i32
  }
  func.func @transform_1(%arg0: i32) -> (i32, i32) {
    %c0_i32 = arith.constant 0 : i32
    %c0_i32_0 = arith.constant 0 : i32
    return %arg0, %c0_i32 : i32, i32
  }
  func.func @transform_2(%arg0: i32) -> (i32, i32) {
    %c0_i32 = arith.constant 0 : i32
    %c0_i32_0 = arith.constant 0 : i32
    return %arg0, %c0_i32 : i32, i32
  }
}

</mosaic_0001>

<bundles_post_ra>
// kernel: tpu_custom_call.1
= control target key start
LH: loop header
LB: loop body
LE: loop exit
PB: predicated region body
PF: predicated region fallthrough
CT: control target
= control target key end

     0   :  { %7 = vsyncpa [#allocation3], 0  ;;  %s4316_s0 = inlined_call_operand.hbm [shape: f32[1024,1024], index: 0, kind: input, shape index: {}]   ;;  %s4317_s1 = inlined_call_operand.hbm [shape: f32[1024,1024], index: 1, kind: input, shape index: {}]   ;;  %s4318_s2 = inlined_call_operand.hbm [shape: f32[1024,1024], index: 2, kind: output, shape index: {}]  }
   0x1   :  { %9 = vsyncpa [#allocation3 + $0x1], 0 }
   0x2   :  { %10 = vsyncpa [#allocation6], 0 }
   0x3   :  { %12 = vsyncpa [#allocation6 + $0x1], 0 }
   0x4   :  { %13 = vsyncpa [#allocation4], 0 }
   0x5   :  { %15 = vsyncpa [#allocation4 + $0x1], 0  ;;  %s2605_s9 = smov 0   ;;  %s2607_s10 = smov 0  }
   0x6   :  { %s2609_s11 = smov 0   ;;  %s2611_s12 = smov 0  }
   0x7 LB: > { %s2626_s13 = sadd.s32 4294967295, %s2584_s12   ;;  %s2372_s14 = sadd.s32 4294967294, %s2584_s12   ;;  %s2584_s12 = sphi %s2611_s12, %s4329_s12   ;;  %s2580_s11 = sphi %s2609_s11, %s4328_s11   ;;  %s2576_s10 = sphi %s2607_s10, %s4327_s10   ;;  %s2572_s9 = sphi %s2605_s9, %s4326_s9  }
   0x8   : > { %s2630_s15 = sadd.s32 1, %s2584_s12   ;;  %s28_s16 = sadd.s32 1, %s2580_s11 }
   0x9   : > { %s25_s17 = ssub.s32 %s2584_s12, %s2630_s15  ;;  %p35_p0 = scmp.ne.s32.totalorder %s2580_s11, %s2576_s10 }
   0xa   : > { %p26_p1 = scmp.eq.s32.totalorder %s25_s17, 0  ;;  %p36_p2 = scmp.eq.s32.totalorder %s2584_s12, 0 }
   0xb   : > { %p41_p3 = scmp.ne.s32.totalorder %s2576_s10, %s2572_s9  ;;  %p42_p4 = scmp.eq.s32.totalorder %s2626_s13, 0 }
   0xc   : > { %s2642_s18 = scalar_select %p26_p1, %s2580_s11, %s28_s16  }
   0xd   : > { %p2644_p5 = por %p36_p2, %p35_p0  ;;  %p2648_p6 = por %p42_p4, %p41_p3 }
   0xe   : > { %p91_p7 = scmp.eq.s32.totalorder %s2626_s13, 1  ;;  %p97_p8 = scmp.eq.s32.totalorder %s2372_s14, 1 }
   0xf   : > { %p2416_p10 = scmp.lt.s32.totalorder %s2584_s12, 2  ;;  %s2664_s23 = sand.u32 1, %s2580_s11  }
  0x10   : > { %p2655_p11 = por %p91_p7, %p35_p0  ;;  %p2659_p12 = por %p97_p8, %p41_p3 }
  0x11   : > { %s2394_s24 = sshll.u32 %s2584_s12, 12  ;;  %s2375_s25 = sshll.u32 %s2664_s23, 12 }
  0x12   : > { %s127_s28 = scalar_lea.hbm %s4316_s0, %s2394_s24  ;;  %s121_s30 = scalar_lea.vmem [#allocation2], %s2375_s25 }
  0x13   : > { %s128_s29 = sshll.u32 %s127_s28, 4  ;;  %s130_s3 = sshll.u32 %s121_s30, 4  ;;  %s129_s29 = int_to_ptr.hbm [resolvable:$true] %s128_s29  ;;  %s131_s3 = int_to_ptr.vmem [resolvable:$true] %s130_s3 }
  0x14   : > { %p2677_p13 = pnand %p2416_p10, %p2644_p5  ;;  %p2383_p0 = scmp.ge.s32.totalorder %s2584_s12, 1 }
  0x15   : > { %p161_p1 = scmp.lt.s32.totalorder %s2584_s12, 3  ;;  %s118_s5 = scalar_lea.sflag [#allocation3], %s2664_s23 }
  0x16   : > { %s2454_s6 = sshra.s32 %s129_s29, 4  ;;  %p2458_p3 = pneg %p2677_p13  ;;  %s2455_s6 = int_to_ptr.hbm [resolvable:$true] %s2454_s6 }
  0x17   : > { %s2456_s7 = scalar_lea.hbm %s2455_s6, 4096  ;;  %s2461_s16 = scalar_lea.hbm %s4316_s0, 8192 }
  0x18   : > { %p2457_p2 = scmp.ne.s32.totalorder %s2455_s6, %s2456_s7  ;;  %p2462_p5 = scmp.lt.s32.totalorder %s2455_s6, %s4316_s0 }
  0x19   : > { %p2463_p8 = scmp.lt.s32.totalorder %s2461_s16, %s2456_s7 }
  0x1a   : > { %p2459_p4 = pnand %p2458_p3, %p2457_p2 }
  0x1b   : > { %p2464_p10 = por %p2463_p8, %p2462_p5 }
  0x1c   : > { %p2460_p7 = pneg %p2459_p4 }
  0x1e   : > { %p2465_p9 = pnand %p2464_p10, %p2460_p7 }
  0x20   : > { %2468 = shalt.err (!%p2465_p9)
}
  0x21   : > { %s2586_s26 = smov 1024   ;;  %s2587_s27 = smov 64  }
  0x22   : > { %2408 = dma.hbm_to_vmem [thread:$0]  (!%p2677_p13), %s129_s29, 65536, %s131_s3, %s118_s5, %s2586_s26, %s2586_s26, %s2587_s27  }
  0x23   : > { %p2701_p2 = pnand %p2383_p0, %p161_p1  ;;  %s150_s7 = scalar_lea.hbm %s4317_s1, %s2394_s24 }
  0x24   : > { %s151_s8 = sshll.u32 %s150_s7, 4  ;;  %s144_s14 = scalar_lea.vmem [#allocation5], %s2375_s25  ;;  %s152_s8 = int_to_ptr.hbm [resolvable:$true] %s151_s8 }
  0x25   : > { %s153_s16 = sshll.u32 %s144_s14, 4  ;;  %s141_s17 = scalar_lea.sflag [#allocation6], %s2664_s23  ;;  %s154_s16 = int_to_ptr.vmem [resolvable:$true] %s153_s16 }
  0x26   : > { %s2484_s19 = sshra.s32 %s152_s8, 4  ;;  %s2491_s30 = scalar_lea.hbm %s4317_s1, 8192  ;;  %s2485_s19 = int_to_ptr.hbm [resolvable:$true] %s2484_s19 }
  0x27   : > { %s2486_s29 = scalar_lea.hbm %s2485_s19, 4096  ;;  %p2492_p4 = scmp.lt.s32.totalorder %s2485_s19, %s4317_s1 }
  0x28   : > { %p2487_p9 = scmp.ne.s32.totalorder %s2485_s19, %s2486_s29  ;;  %p2493_p7 = scmp.lt.s32.totalorder %s2491_s30, %s2486_s29 }
  0x2a   : > { %p2489_p0 = pnand %p2487_p9, %p2458_p3  ;;  %p2494_p5 = por %p2493_p7, %p2492_p4 }
  0x2c   : > { %p2490_p1 = pneg %p2489_p0 }
  0x2e   : > { %p2495_p8 = pnand %p2494_p5, %p2490_p1 }
  0x30   : > { %2498 = shalt.err (!%p2495_p8)
}
  0x31   : > { %2411 = dma.hbm_to_vmem [thread:$0]  (!%p2677_p13), %s152_s8, 65536, %s154_s16, %s141_s17, %s2586_s26, %s2586_s26, %s2587_s27  }
  0x32   : > { %165 = sbr.rel (%p2701_p2) target bundleno = 577 (0x241), region = 28  ;;  %s2727_s23 = sand.u32 (!%p2701_p2), 1, %s2576_s10  }
  0x33   : > { %s2384_s25 = sshll.u32 (!%p2701_p2), %s2727_s23, 12  ;;  %s168_s7 = scalar_lea.sflag (!%p2701_p2), [#allocation3], %s2727_s23 }
  0x34   : > { %s2731_s14 = scalar_lea.vmem (!%p2701_p2), [#allocation2], %s2384_s25 }
  0x37   : > { %2559 = dma.done.wait (%p2648_p6), %s168_s7, 65536  }
  0x38   : > { %2561 = vsyncadd (%p2648_p6), %s168_s7, 4294901760  ;;  %s178_s4 = scalar_lea.sflag [#allocation6], %s2727_s23  ;;  %s2738_s26 = scalar_lea.vmem [#allocation5], %s2384_s25 }
  0x39   : > { %2563 = dma.done.wait (%p2648_p6), %s178_s4, 65536  }
  0x3a   : > { %2565 = vsyncadd (%p2648_p6), %s178_s4, 4294901760  ;;  %v211_v0 = vld [vmem:[%s2731_s14] sm:$0xff]  ;;  %v212_v2 = vld [vmem:[%s2731_s14 + $0x8] sm:$0xff]  ;;  %s2753_s20 = scalar_lea.vmem [#allocation7], %s2384_s25  ;;  %s2398_s27 = sshll.u32 %s2626_s13, 12 }
  0x3b   : > { %v723_v1 = vld [vmem:[%s2738_s26] sm:$0xff]  ;;  %v724_v4 = vld [vmem:[%s2738_s26 + $0x8] sm:$0xff]  ;;  %v213_v5 = vld [vmem:[%s2731_s14 + $0x10] sm:$0xff]  ;;  %s2272_s8 = scalar_lea.hbm %s4318_s2, %s2398_s27  ;;  %s2273_s16 = sshll.u32 %s2753_s20, 4  ;;  %s2274_s16 = int_to_ptr.vmem [resolvable:$true] %s2273_s16 }
  0x3c   : > { %v1235_v3 = vadd.f32 %v723_v1, %v211_v0  ;;  %v725_v6 = vld [vmem:[%s2738_s26 + $0x10] sm:$0xff]  ;;  %v1236_v7 = vadd.f32 %v724_v4, %v212_v2  ;;  %v214_v9 = vld [vmem:[%s2731_s14 + $0x18] sm:$0xff]  ;;  %v215_v11 = vld [vmem:[%s2731_s14 + $0x20] sm:$0xff]  ;;  %s2275_s17 = sshll.u32 %s2272_s8, 4  ;;  %s2260_s19 = scalar_lea.sflag [#allocation4], %s2727_s23  ;;  %s2276_s17 = int_to_ptr.hbm [resolvable:$true] %s2275_s17 }
  0x3d   : > { %v1237_v8 = vadd.f32 %v725_v6, %v213_v5  ;;  %v726_v10 = vld [vmem:[%s2738_s26 + $0x18] sm:$0xff]  ;;  %v727_v13 = vld [vmem:[%s2738_s26 + $0x20] sm:$0xff]  ;;  %v216_v14 = vld [vmem:[%s2731_s14 + $0x28] sm:$0xff]  ;;  %s2528_s29 = sshra.s32 %s2276_s17, 4  ;;  %s2534_s24 = scalar_lea.hbm %s4318_s2, 8192  ;;  %s2529_s29 = int_to_ptr.hbm [resolvable:$true] %s2528_s29 }
  0x3e   : > { %1747 = vst [vmem:[%s2753_s20] sm:$0xff] %v1235_v3  ;;  %v1238_v12 = vadd.f32 %v726_v10, %v214_v9  ;;  %v728_v15 = vld [vmem:[%s2738_s26 + $0x28] sm:$0xff]  ;;  %v1239_v16 = vadd.f32 %v727_v13, %v215_v11  ;;  %v217_v18 = vld [vmem:[%s2731_s14 + $0x30] sm:$0xff]  ;;  %v218_v20 = vld [vmem:[%s2731_s14 + $0x38] sm:$0xff]  ;;  %s2530_s3 = scalar_lea.hbm %s2529_s29, 4096  ;;  %p2535_p10 = scmp.lt.s32.totalorder %s2529_s29, %s4318_s2 }
  0x3f   : > { %1748 = vst [vmem:[%s2753_s20 + $0x8] sm:$0xff] %v1236_v7  ;;  %v1240_v17 = vadd.f32 %v728_v15, %v216_v14  ;;  %v729_v19 = vld [vmem:[%s2738_s26 + $0x30] sm:$0xff]  ;;  %v730_v22 = vld [vmem:[%s2738_s26 + $0x38] sm:$0xff]  ;;  %v219_v23 = vld [vmem:[%s2731_s14 + $0x40] sm:$0xff]  ;;  %p2531_p6 = scmp.ne.s32.totalorder %s2529_s29, %s2530_s3  ;;  %p2536_p2 = scmp.lt.s32.totalorder %s2534_s24, %s2530_s3 }
  0x40   : > { %1749 = vst [vmem:[%s2753_s20 + $0x10] sm:$0xff] %v1237_v8  ;;  %v1241_v21 = vadd.f32 %v729_v19, %v217_v18  ;;  %v731_v24 = vld [vmem:[%s2738_s26 + $0x40] sm:$0xff]  ;;  %v1242_v25 = vadd.f32 %v730_v22, %v218_v20  ;;  %v220_v26 = vld [vmem:[%s2731_s14 + $0x48] sm:$0xff]  ;;  %v221_v28 = vld [vmem:[%s2731_s14 + $0x50] sm:$0xff] }
  0x41   : > { %1750 = vst [vmem:[%s2753_s20 + $0x18] sm:$0xff] %v1238_v12  ;;  %v732_v27 = vld [vmem:[%s2738_s26 + $0x48] sm:$0xff]  ;;  %v1243_v29 = vadd.f32 %v731_v24, %v219_v23  ;;  %v733_v30 = vld [vmem:[%s2738_s26 + $0x50] sm:$0xff]  ;;  %v222_v31 = vld [vmem:[%s2731_s14 + $0x58] sm:$0xff]  ;;  %p2532_p13 = pnand %p2531_p6, %p2655_p11  ;;  %p2537_p9 = por %p2536_p2, %p2535_p10 }
  0x42   : > { %1751 = vst [vmem:[%s2753_s20 + $0x20] sm:$0xff] %v1239_v16  ;;  %v734_v32 = vld [vmem:[%s2738_s26 + $0x58] sm:$0xff]  ;;  %v1244_v33 = vadd.f32 %v732_v27, %v220_v26  ;;  %v223_v34 = vld [vmem:[%s2731_s14 + $0x60] sm:$0xff]  ;;  %v1245_v36 = vadd.f32 %v733_v30, %v221_v28  ;;  %v224_v37 = vld [vmem:[%s2731_s14 + $0x68] sm:$0xff] }
  0x43   : > { %1752 = vst [vmem:[%s2753_s20 + $0x28] sm:$0xff] %v1240_v17  ;;  %v735_v35 = vld [vmem:[%s2738_s26 + $0x60] sm:$0xff]  ;;  %v736_v38 = vld [vmem:[%s2738_s26 + $0x68] sm:$0xff]  ;;  %v1246_v39 = vadd.f32 %v734_v32, %v222_v31  ;;  %v225_v40 = vld [vmem:[%s2731_s14 + $0x70] sm:$0xff]  ;;  %p2533_p3 = pneg %p2532_p13 }
  0x44   : > { %1753 = vst [vmem:[%s2753_s20 + $0x30] sm:$0xff] %v1241_v21  ;;  %v737_v41 = vld [vmem:[%s2738_s26 + $0x70] sm:$0xff]  ;;  %v1247_v42 = vadd.f32 %v735_v35, %v223_v34  ;;  %v226_v43 = vld [vmem:[%s2731_s14 + $0x78] sm:$0xff]  ;;  %v1248_v45 = vadd.f32 %v736_v38, %v224_v37  ;;  %v227_v46 = vld [vmem:[%s2731_s14 + $0x80] sm:$0xff] }
  0x45   : > { %1754 = vst [vmem:[%s2753_s20 + $0x38] sm:$0xff] %v1242_v25  ;;  %v738_v44 = vld [vmem:[%s2738_s26 + $0x78] sm:$0xff]  ;;  %v739_v47 = vld [vmem:[%s2738_s26 + $0x80] sm:$0xff]  ;;  %v1249_v48 = vadd.f32 %v737_v41, %v225_v40  ;;  %v228_v49 = vld [vmem:[%s2731_s14 + $0x88] sm:$0xff]  ;;  %p2538_p0 = pnand %p2537_p9, %p2533_p3 }
  0x46   : > { %1755 = vst [vmem:[%s2753_s20 + $0x40] sm:$0xff] %v1243_v29  ;;  %v740_v50 = vld [vmem:[%s2738_s26 + $0x88] sm:$0xff]  ;;  %v1250_v51 = vadd.f32 %v738_v44, %v226_v43  ;;  %v229_v52 = vld [vmem:[%s2731_s14 + $0x90] sm:$0xff]  ;;  %v1251_v54 = vadd.f32 %v739_v47, %v227_v46  ;;  %v230_v55 = vld [vmem:[%s2731_s14 + $0x98] sm:$0xff] }
  0x47   : > { %1756 = vst [vmem:[%s2753_s20 + $0x48] sm:$0xff] %v1244_v33  ;;  %v741_v53 = vld [vmem:[%s2738_s26 + $0x90] sm:$0xff]  ;;  %v742_v56 = vld [vmem:[%s2738_s26 + $0x98] sm:$0xff]  ;;  %v1252_v57 = vadd.f32 %v740_v50, %v228_v49  ;;  %v231_v58 = vld [vmem:[%s2731_s14 + $0xa0] sm:$0xff] }
  0x48   : > { %1757 = vst [vmem:[%s2753_s20 + $0x50] sm:$0xff] %v1245_v36  ;;  %v743_v59 = vld [vmem:[%s2738_s26 + $0xa0] sm:$0xff]  ;;  %v1253_v60 = vadd.f32 %v741_v53, %v229_v52  ;;  %v232_v61 = vld [vmem:[%s2731_s14 + $0xa8] sm:$0xff]  ;;  %v1254_v63 = vadd.f32 %v742_v56, %v230_v55  ;;  %v233_v0 = vld [vmem:[%s2731_s14 + $0xb0] sm:$0xff] }
  0x49   : > { %1758 = vst [vmem:[%s2753_s20 + $0x58] sm:$0xff] %v1246_v39  ;;  %v744_v62 = vld [vmem:[%s2738_s26 + $0xa8] sm:$0xff]  ;;  %v745_v1 = vld [vmem:[%s2738_s26 + $0xb0] sm:$0xff]  ;;  %v1255_v2 = vadd.f32 %v743_v59, %v231_v58  ;;  %v234_v3 = vld [vmem:[%s2731_s14 + $0xb8] sm:$0xff] }
  0x4a   : > { %1759 = vst [vmem:[%s2753_s20 + $0x60] sm:$0xff] %v1247_v42  ;;  %v746_v4 = vld [vmem:[%s2738_s26 + $0xb8] sm:$0xff]  ;;  %v1256_v5 = vadd.f32 %v744_v62, %v232_v61  ;;  %v235_v6 = vld [vmem:[%s2731_s14 + $0xc0] sm:$0xff]  ;;  %v1257_v8 = vadd.f32 %v745_v1, %v233_v0  ;;  %v236_v9 = vld [vmem:[%s2731_s14 + $0xc8] sm:$0xff] }
  0x4b   : > { %1760 = vst [vmem:[%s2753_s20 + $0x68] sm:$0xff] %v1248_v45  ;;  %v747_v7 = vld [vmem:[%s2738_s26 + $0xc0] sm:$0xff]  ;;  %v748_v10 = vld [vmem:[%s2738_s26 + $0xc8] sm:$0xff]  ;;  %v1258_v11 = vadd.f32 %v746_v4, %v234_v3  ;;  %v237_v12 = vld [vmem:[%s2731_s14 + $0xd0] sm:$0xff] }
  0x4c   : > { %1761 = vst [vmem:[%s2753_s20 + $0x70] sm:$0xff] %v1249_v48  ;;  %v749_v13 = vld [vmem:[%s2738_s26 + $0xd0] sm:$0xff]  ;;  %v1259_v14 = vadd.f32 %v747_v7, %v235_v6  ;;  %v238_v15 = vld [vmem:[%s2731_s14 + $0xd8] sm:$0xff]  ;;  %v1260_v17 = vadd.f32 %v748_v10, %v236_v9  ;;  %v239_v18 = vld [vmem:[%s2731_s14 + $0xe0] sm:$0xff] }
  0x4d   : > { %1762 = vst [vmem:[%s2753_s20 + $0x78] sm:$0xff] %v1250_v51  ;;  %v750_v16 = vld [vmem:[%s2738_s26 + $0xd8] sm:$0xff]  ;;  %v751_v19 = vld [vmem:[%s2738_s26 + $0xe0] sm:$0xff]  ;;  %v1261_v20 = vadd.f32 %v749_v13, %v237_v12  ;;  %v240_v21 = vld [vmem:[%s2731_s14 + $0xe8] sm:$0xff] }
  0x4e   : > { %1763 = vst [vmem:[%s2753_s20 + $0x80] sm:$0xff] %v1251_v54  ;;  %v752_v22 = vld [vmem:[%s2738_s26 + $0xe8] sm:$0xff]  ;;  %v1262_v23 = vadd.f32 %v750_v16, %v238_v15  ;;  %v241_v24 = vld [vmem:[%s2731_s14 + $0xf0] sm:$0xff]  ;;  %v1263_v26 = vadd.f32 %v751_v19, %v239_v18  ;;  %v242_v27 = vld [vmem:[%s2731_s14 + $0xf8] sm:$0xff] }
  0x4f   : > { %1764 = vst [vmem:[%s2753_s20 + $0x88] sm:$0xff] %v1252_v57  ;;  %v753_v25 = vld [vmem:[%s2738_s26 + $0xf0] sm:$0xff]  ;;  %v754_v28 = vld [vmem:[%s2738_s26 + $0xf8] sm:$0xff]  ;;  %v1264_v29 = vadd.f32 %v752_v22, %v240_v21  ;;  %v243_v30 = vld [vmem:[%s2731_s14 + $0x100] sm:$0xff] }
  0x50   : > { %1765 = vst [vmem:[%s2753_s20 + $0x90] sm:$0xff] %v1253_v60  ;;  %v755_v31 = vld [vmem:[%s2738_s26 + $0x100] sm:$0xff]  ;;  %v1265_v32 = vadd.f32 %v753_v25, %v241_v24  ;;  %v244_v33 = vld [vmem:[%s2731_s14 + $0x108] sm:$0xff]  ;;  %v1266_v35 = vadd.f32 %v754_v28, %v242_v27  ;;  %v245_v36 = vld [vmem:[%s2731_s14 + $0x110] sm:$0xff] }
  0x51   : > { %1766 = vst [vmem:[%s2753_s20 + $0x98] sm:$0xff] %v1254_v63  ;;  %v756_v34 = vld [vmem:[%s2738_s26 + $0x108] sm:$0xff]  ;;  %v757_v37 = vld [vmem:[%s2738_s26 + $0x110] sm:$0xff]  ;;  %v1267_v38 = vadd.f32 %v755_v31, %v243_v30  ;;  %v246_v39 = vld [vmem:[%s2731_s14 + $0x118] sm:$0xff] }
  0x52   : > { %1767 = vst [vmem:[%s2753_s20 + $0xa0] sm:$0xff] %v1255_v2  ;;  %v758_v40 = vld [vmem:[%s2738_s26 + $0x118] sm:$0xff]  ;;  %v1268_v41 = vadd.f32 %v756_v34, %v244_v33  ;;  %v247_v42 = vld [vmem:[%s2731_s14 + $0x120] sm:$0xff]  ;;  %v1269_v44 = vadd.f32 %v757_v37, %v245_v36  ;;  %v248_v45 = vld [vmem:[%s2731_s14 + $0x128] sm:$0xff] }
  0x53   : > { %1768 = vst [vmem:[%s2753_s20 + $0xa8] sm:$0xff] %v1256_v5  ;;  %v759_v43 = vld [vmem:[%s2738_s26 + $0x120] sm:$0xff]  ;;  %v760_v46 = vld [vmem:[%s2738_s26 + $0x128] sm:$0xff]  ;;  %v1270_v47 = vadd.f32 %v758_v40, %v246_v39  ;;  %v249_v48 = vld [vmem:[%s2731_s14 + $0x130] sm:$0xff] }
  0x54   : > { %1769 = vst [vmem:[%s2753_s20 + $0xb0] sm:$0xff] %v1257_v8  ;;  %v761_v49 = vld [vmem:[%s2738_s26 + $0x130] sm:$0xff]  ;;  %v1271_v50 = vadd.f32 %v759_v43, %v247_v42  ;;  %v250_v51 = vld [vmem:[%s2731_s14 + $0x138] sm:$0xff]  ;;  %v1272_v53 = vadd.f32 %v760_v46, %v248_v45  ;;  %v251_v54 = vld [vmem:[%s2731_s14 + $0x140] sm:$0xff] }
  0x55   : > { %1770 = vst [vmem:[%s2753_s20 + $0xb8] sm:$0xff] %v1258_v11  ;;  %v762_v52 = vld [vmem:[%s2738_s26 + $0x138] sm:$0xff]  ;;  %v763_v55 = vld [vmem:[%s2738_s26 + $0x140] sm:$0xff]  ;;  %v1273_v56 = vadd.f32 %v761_v49, %v249_v48  ;;  %v252_v57 = vld [vmem:[%s2731_s14 + $0x148] sm:$0xff] }
  0x56   : > { %1771 = vst [vmem:[%s2753_s20 + $0xc0] sm:$0xff] %v1259_v14  ;;  %v764_v58 = vld [vmem:[%s2738_s26 + $0x148] sm:$0xff]  ;;  %v1274_v59 = vadd.f32 %v762_v52, %v250_v51  ;;  %v253_v60 = vld [vmem:[%s2731_s14 + $0x150] sm:$0xff]  ;;  %v1275_v62 = vadd.f32 %v763_v55, %v251_v54  ;;  %v254_v63 = vld [vmem:[%s2731_s14 + $0x158] sm:$0xff] }
  0x57   : > { %1772 = vst [vmem:[%s2753_s20 + $0xc8] sm:$0xff] %v1260_v17  ;;  %v765_v61 = vld [vmem:[%s2738_s26 + $0x150] sm:$0xff]  ;;  %v766_v0 = vld [vmem:[%s2738_s26 + $0x158] sm:$0xff]  ;;  %v1276_v1 = vadd.f32 %v764_v58, %v252_v57  ;;  %v255_v2 = vld [vmem:[%s2731_s14 + $0x160] sm:$0xff] }
  0x58   : > { %1773 = vst [vmem:[%s2753_s20 + $0xd0] sm:$0xff] %v1261_v20  ;;  %v767_v3 = vld [vmem:[%s2738_s26 + $0x160] sm:$0xff]  ;;  %v1277_v4 = vadd.f32 %v765_v61, %v253_v60  ;;  %v256_v5 = vld [vmem:[%s2731_s14 + $0x168] sm:$0xff]  ;;  %v1278_v7 = vadd.f32 %v766_v0, %v254_v63  ;;  %v257_v8 = vld [vmem:[%s2731_s14 + $0x170] sm:$0xff] }
  0x59   : > { %1774 = vst [vmem:[%s2753_s20 + $0xd8] sm:$0xff] %v1262_v23  ;;  %v768_v6 = vld [vmem:[%s2738_s26 + $0x168] sm:$0xff]  ;;  %v769_v9 = vld [vmem:[%s2738_s26 + $0x170] sm:$0xff]  ;;  %v1279_v10 = vadd.f32 %v767_v3, %v255_v2  ;;  %v258_v11 = vld [vmem:[%s2731_s14 + $0x178] sm:$0xff] }
  0x5a   : > { %1775 = vst [vmem:[%s2753_s20 + $0xe0] sm:$0xff] %v1263_v26  ;;  %v770_v12 = vld [vmem:[%s2738_s26 + $0x178] sm:$0xff]  ;;  %v1280_v13 = vadd.f32 %v768_v6, %v256_v5  ;;  %v259_v14 = vld [vmem:[%s2731_s14 + $0x180] sm:$0xff]  ;;  %v1281_v16 = vadd.f32 %v769_v9, %v257_v8  ;;  %v260_v17 = vld [vmem:[%s2731_s14 + $0x188] sm:$0xff] }
  0x5b   : > { %1776 = vst [vmem:[%s2753_s20 + $0xe8] sm:$0xff] %v1264_v29  ;;  %v771_v15 = vld [vmem:[%s2738_s26 + $0x180] sm:$0xff]  ;;  %v772_v18 = vld [vmem:[%s2738_s26 + $0x188] sm:$0xff]  ;;  %v1282_v19 = vadd.f32 %v770_v12, %v258_v11  ;;  %v261_v20 = vld [vmem:[%s2731_s14 + $0x190] sm:$0xff] }
  0x5c   : > { %1777 = vst [vmem:[%s2753_s20 + $0xf0] sm:$0xff] %v1265_v32  ;;  %v773_v21 = vld [vmem:[%s2738_s26 + $0x190] sm:$0xff]  ;;  %v1283_v22 = vadd.f32 %v771_v15, %v259_v14  ;;  %v262_v23 = vld [vmem:[%s2731_s14 + $0x198] sm:$0xff]  ;;  %v1284_v25 = vadd.f32 %v772_v18, %v260_v17  ;;  %v263_v26 = vld [vmem:[%s2731_s14 + $0x1a0] sm:$0xff] }
  0x5d   : > { %1778 = vst [vmem:[%s2753_s20 + $0xf8] sm:$0xff] %v1266_v35  ;;  %v774_v24 = vld [vmem:[%s2738_s26 + $0x198] sm:$0xff]  ;;  %v775_v27 = vld [vmem:[%s2738_s26 + $0x1a0] sm:$0xff]  ;;  %v1285_v28 = vadd.f32 %v773_v21, %v261_v20  ;;  %v264_v29 = vld [vmem:[%s2731_s14 + $0x1a8] sm:$0xff] }
  0x5e   : > { %1779 = vst [vmem:[%s2753_s20 + $0x100] sm:$0xff] %v1267_v38  ;;  %v776_v30 = vld [vmem:[%s2738_s26 + $0x1a8] sm:$0xff]  ;;  %v1286_v31 = vadd.f32 %v774_v24, %v262_v23  ;;  %v265_v32 = vld [vmem:[%s2731_s14 + $0x1b0] sm:$0xff]  ;;  %v1287_v34 = vadd.f32 %v775_v27, %v263_v26  ;;  %v266_v35 = vld [vmem:[%s2731_s14 + $0x1b8] sm:$0xff] }
  0x5f   : > { %1780 = vst [vmem:[%s2753_s20 + $0x108] sm:$0xff] %v1268_v41  ;;  %v777_v33 = vld [vmem:[%s2738_s26 + $0x1b0] sm:$0xff]  ;;  %v778_v36 = vld [vmem:[%s2738_s26 + $0x1b8] sm:$0xff]  ;;  %v1288_v37 = vadd.f32 %v776_v30, %v264_v29  ;;  %v267_v38 = vld [vmem:[%s2731_s14 + $0x1c0] sm:$0xff] }
  0x60   : > { %1781 = vst [vmem:[%s2753_s20 + $0x110] sm:$0xff] %v1269_v44  ;;  %v779_v39 = vld [vmem:[%s2738_s26 + $0x1c0] sm:$0xff]  ;;  %v1289_v40 = vadd.f32 %v777_v33, %v265_v32  ;;  %v268_v41 = vld [vmem:[%s2731_s14 + $0x1c8] sm:$0xff]  ;;  %v1290_v43 = vadd.f32 %v778_v36, %v266_v35  ;;  %v269_v44 = vld [vmem:[%s2731_s14 + $0x1d0] sm:$0xff] }
  0x61   : > { %1782 = vst [vmem:[%s2753_s20 + $0x118] sm:$0xff] %v1270_v47  ;;  %v780_v42 = vld [vmem:[%s2738_s26 + $0x1c8] sm:$0xff]  ;;  %v781_v45 = vld [vmem:[%s2738_s26 + $0x1d0] sm:$0xff]  ;;  %v1291_v46 = vadd.f32 %v779_v39, %v267_v38  ;;  %v270_v47 = vld [vmem:[%s2731_s14 + $0x1d8] sm:$0xff] }
  0x62   : > { %1783 = vst [vmem:[%s2753_s20 + $0x120] sm:$0xff] %v1271_v50  ;;  %v782_v48 = vld [vmem:[%s2738_s26 + $0x1d8] sm:$0xff]  ;;  %v1292_v49 = vadd.f32 %v780_v42, %v268_v41  ;;  %v271_v50 = vld [vmem:[%s2731_s14 + $0x1e0] sm:$0xff]  ;;  %v1293_v52 = vadd.f32 %v781_v45, %v269_v44  ;;  %v784_v54 = vld [vmem:[%s2738_s26 + $0x1e8] sm:$0xff] }
  0x63   : > { %1784 = vst [vmem:[%s2753_s20 + $0x128] sm:$0xff] %v1272_v53  ;;  %v783_v51 = vld [vmem:[%s2738_s26 + $0x1e0] sm:$0xff]  ;;  %v272_v53 = vld [vmem:[%s2731_s14 + $0x1e8] sm:$0xff]  ;;  %v1294_v55 = vadd.f32 %v782_v48, %v270_v47  ;;  %v785_v57 = vld [vmem:[%s2738_s26 + $0x1f0] sm:$0xff] }
  0x64   : > { %1785 = vst [vmem:[%s2753_s20 + $0x130] sm:$0xff] %v1273_v56  ;;  %v273_v56 = vld [vmem:[%s2731_s14 + $0x1f0] sm:$0xff]  ;;  %v1295_v58 = vadd.f32 %v783_v51, %v271_v50  ;;  %v786_v60 = vld [vmem:[%s2738_s26 + $0x1f8] sm:$0xff]  ;;  %v1296_v61 = vadd.f32 %v784_v54, %v272_v53  ;;  %v787_v63 = vld [vmem:[%s2738_s26 + $0x200] sm:$0xff] }
  0x65   : > { %1786 = vst [vmem:[%s2753_s20 + $0x138] sm:$0xff] %v1274_v59  ;;  %v274_v59 = vld [vmem:[%s2731_s14 + $0x1f8] sm:$0xff]  ;;  %v1297_v0 = vadd.f32 %v785_v57, %v273_v56  ;;  %v788_v2 = vld [vmem:[%s2738_s26 + $0x208] sm:$0xff]  ;;  %v789_v5 = vld [vmem:[%s2738_s26 + $0x210] sm:$0xff] }
  0x66   : > { %1787 = vst [vmem:[%s2753_s20 + $0x140] sm:$0xff] %v1275_v62  ;;  %v275_v62 = vld [vmem:[%s2731_s14 + $0x200] sm:$0xff]  ;;  %v1298_v3 = vadd.f32 %v786_v60, %v274_v59  ;;  %v790_v8 = vld [vmem:[%s2738_s26 + $0x218] sm:$0xff]  ;;  %v792_v14 = vld [vmem:[%s2738_s26 + $0x228] sm:$0xff] }
  0x67   : > { %1788 = vst [vmem:[%s2753_s20 + $0x148] sm:$0xff] %v1276_v1  ;;  %v276_v1 = vld [vmem:[%s2731_s14 + $0x208] sm:$0xff]  ;;  %v1299_v6 = vadd.f32 %v787_v63, %v275_v62  ;;  %v791_v11 = vld [vmem:[%s2738_s26 + $0x220] sm:$0xff]  ;;  %v793_v17 = vld [vmem:[%s2738_s26 + $0x230] sm:$0xff] }
  0x68   : > { %1789 = vst [vmem:[%s2753_s20 + $0x150] sm:$0xff] %v1277_v4  ;;  %v277_v4 = vld [vmem:[%s2731_s14 + $0x210] sm:$0xff]  ;;  %v1300_v9 = vadd.f32 %v788_v2, %v276_v1  ;;  %v794_v20 = vld [vmem:[%s2738_s26 + $0x238] sm:$0xff]  ;;  %v795_v23 = vld [vmem:[%s2738_s26 + $0x240] sm:$0xff] }
  0x69   : > { %1790 = vst [vmem:[%s2753_s20 + $0x158] sm:$0xff] %v1278_v7  ;;  %v278_v7 = vld [vmem:[%s2731_s14 + $0x218] sm:$0xff]  ;;  %v1301_v12 = vadd.f32 %v789_v5, %v277_v4  ;;  %v796_v26 = vld [vmem:[%s2738_s26 + $0x248] sm:$0xff]  ;;  %v797_v29 = vld [vmem:[%s2738_s26 + $0x250] sm:$0xff] }
  0x6a   : > { %1791 = vst [vmem:[%s2753_s20 + $0x160] sm:$0xff] %v1279_v10  ;;  %v279_v10 = vld [vmem:[%s2731_s14 + $0x220] sm:$0xff]  ;;  %v1302_v15 = vadd.f32 %v790_v8, %v278_v7  ;;  %v798_v32 = vld [vmem:[%s2738_s26 + $0x258] sm:$0xff]  ;;  %v800_v38 = vld [vmem:[%s2738_s26 + $0x268] sm:$0xff] }
  0x6b   : > { %1792 = vst [vmem:[%s2753_s20 + $0x168] sm:$0xff] %v1280_v13  ;;  %v280_v13 = vld [vmem:[%s2731_s14 + $0x228] sm:$0xff]  ;;  %v1303_v18 = vadd.f32 %v791_v11, %v279_v10  ;;  %v799_v35 = vld [vmem:[%s2738_s26 + $0x260] sm:$0xff]  ;;  %v801_v41 = vld [vmem:[%s2738_s26 + $0x270] sm:$0xff] }
  0x6c   : > { %1793 = vst [vmem:[%s2753_s20 + $0x170] sm:$0xff] %v1281_v16  ;;  %v281_v16 = vld [vmem:[%s2731_s14 + $0x230] sm:$0xff]  ;;  %v1304_v21 = vadd.f32 %v792_v14, %v280_v13  ;;  %v802_v44 = vld [vmem:[%s2738_s26 + $0x278] sm:$0xff]  ;;  %v803_v47 = vld [vmem:[%s2738_s26 + $0x280] sm:$0xff] }
  0x6d   : > { %1794 = vst [vmem:[%s2753_s20 + $0x178] sm:$0xff] %v1282_v19  ;;  %v282_v19 = vld [vmem:[%s2731_s14 + $0x238] sm:$0xff]  ;;  %v1305_v24 = vadd.f32 %v793_v17, %v281_v16  ;;  %v804_v50 = vld [vmem:[%s2738_s26 + $0x288] sm:$0xff]  ;;  %v805_v53 = vld [vmem:[%s2738_s26 + $0x290] sm:$0xff] }
  0x6e   : > { %1795 = vst [vmem:[%s2753_s20 + $0x180] sm:$0xff] %v1283_v22  ;;  %v283_v22 = vld [vmem:[%s2731_s14 + $0x240] sm:$0xff]  ;;  %v1306_v27 = vadd.f32 %v794_v20, %v282_v19  ;;  %v806_v56 = vld [vmem:[%s2738_s26 + $0x298] sm:$0xff]  ;;  %v808_v62 = vld [vmem:[%s2738_s26 + $0x2a8] sm:$0xff] }
  0x6f   : > { %1796 = vst [vmem:[%s2753_s20 + $0x188] sm:$0xff] %v1284_v25  ;;  %v284_v25 = vld [vmem:[%s2731_s14 + $0x248] sm:$0xff]  ;;  %v1307_v30 = vadd.f32 %v795_v23, %v283_v22  ;;  %v807_v59 = vld [vmem:[%s2738_s26 + $0x2a0] sm:$0xff]  ;;  %v809_v1 = vld [vmem:[%s2738_s26 + $0x2b0] sm:$0xff] }
  0x70   : > { %1797 = vst [vmem:[%s2753_s20 + $0x190] sm:$0xff] %v1285_v28  ;;  %v285_v28 = vld [vmem:[%s2731_s14 + $0x250] sm:$0xff]  ;;  %v1308_v33 = vadd.f32 %v796_v26, %v284_v25  ;;  %v810_v4 = vld [vmem:[%s2738_s26 + $0x2b8] sm:$0xff]  ;;  %v811_v7 = vld [vmem:[%s2738_s26 + $0x2c0] sm:$0xff] }
  0x71   : > { %1798 = vst [vmem:[%s2753_s20 + $0x198] sm:$0xff] %v1286_v31  ;;  %v286_v31 = vld [vmem:[%s2731_s14 + $0x258] sm:$0xff]  ;;  %v1309_v36 = vadd.f32 %v797_v29, %v285_v28  ;;  %v812_v10 = vld [vmem:[%s2738_s26 + $0x2c8] sm:$0xff]  ;;  %v813_v13 = vld [vmem:[%s2738_s26 + $0x2d0] sm:$0xff] }
  0x72   : > { %1799 = vst [vmem:[%s2753_s20 + $0x1a0] sm:$0xff] %v1287_v34  ;;  %v287_v34 = vld [vmem:[%s2731_s14 + $0x260] sm:$0xff]  ;;  %v1310_v39 = vadd.f32 %v798_v32, %v286_v31  ;;  %v814_v16 = vld [vmem:[%s2738_s26 + $0x2d8] sm:$0xff]  ;;  %v816_v22 = vld [vmem:[%s2738_s26 + $0x2e8] sm:$0xff] }
  0x73   : > { %1800 = vst [vmem:[%s2753_s20 + $0x1a8] sm:$0xff] %v1288_v37  ;;  %v288_v37 = vld [vmem:[%s2731_s14 + $0x268] sm:$0xff]  ;;  %v1311_v42 = vadd.f32 %v799_v35, %v287_v34  ;;  %v815_v19 = vld [vmem:[%s2738_s26 + $0x2e0] sm:$0xff]  ;;  %v817_v25 = vld [vmem:[%s2738_s26 + $0x2f0] sm:$0xff] }
  0x74   : > { %1801 = vst [vmem:[%s2753_s20 + $0x1b0] sm:$0xff] %v1289_v40  ;;  %v289_v40 = vld [vmem:[%s2731_s14 + $0x270] sm:$0xff]  ;;  %v1312_v45 = vadd.f32 %v800_v38, %v288_v37  ;;  %v818_v28 = vld [vmem:[%s2738_s26 + $0x2f8] sm:$0xff]  ;;  %v819_v31 = vld [vmem:[%s2738_s26 + $0x300] sm:$0xff] }
  0x75   : > { %1802 = vst [vmem:[%s2753_s20 + $0x1b8] sm:$0xff] %v1290_v43  ;;  %v290_v43 = vld [vmem:[%s2731_s14 + $0x278] sm:$0xff]  ;;  %v1313_v48 = vadd.f32 %v801_v41, %v289_v40  ;;  %v820_v34 = vld [vmem:[%s2738_s26 + $0x308] sm:$0xff]  ;;  %v821_v37 = vld [vmem:[%s2738_s26 + $0x310] sm:$0xff] }
  0x76   : > { %1803 = vst [vmem:[%s2753_s20 + $0x1c0] sm:$0xff] %v1291_v46  ;;  %v291_v46 = vld [vmem:[%s2731_s14 + $0x280] sm:$0xff]  ;;  %v1314_v51 = vadd.f32 %v802_v44, %v290_v43  ;;  %v822_v40 = vld [vmem:[%s2738_s26 + $0x318] sm:$0xff] }
  0x77   : > { %1804 = vst [vmem:[%s2753_s20 + $0x1c8] sm:$0xff] %v1292_v49  ;;  %v292_v49 = vld [vmem:[%s2731_s14 + $0x288] sm:$0xff]  ;;  %v1315_v54 = vadd.f32 %v803_v47, %v291_v46  ;;  %v823_v43 = vld [vmem:[%s2738_s26 + $0x320] sm:$0xff] }
  0x78   : > { %1805 = vst [vmem:[%s2753_s20 + $0x1d0] sm:$0xff] %v1293_v52  ;;  %v293_v52 = vld [vmem:[%s2731_s14 + $0x290] sm:$0xff]  ;;  %v1316_v57 = vadd.f32 %v804_v50, %v292_v49  ;;  %v824_v46 = vld [vmem:[%s2738_s26 + $0x328] sm:$0xff] }
  0x79   : > { %1806 = vst [vmem:[%s2753_s20 + $0x1d8] sm:$0xff] %v1294_v55  ;;  %v294_v55 = vld [vmem:[%s2731_s14 + $0x298] sm:$0xff]  ;;  %v1317_v60 = vadd.f32 %v805_v53, %v293_v52  ;;  %v825_v49 = vld [vmem:[%s2738_s26 + $0x330] sm:$0xff] }
  0x7a   : > { %1807 = vst [vmem:[%s2753_s20 + $0x1e0] sm:$0xff] %v1295_v58  ;;  %v295_v58 = vld [vmem:[%s2731_s14 + $0x2a0] sm:$0xff]  ;;  %v1318_v63 = vadd.f32 %v806_v56, %v294_v55  ;;  %v826_v52 = vld [vmem:[%s2738_s26 + $0x338] sm:$0xff] }
  0x7b   : > { %1808 = vst [vmem:[%s2753_s20 + $0x1e8] sm:$0xff] %v1296_v61  ;;  %v296_v61 = vld [vmem:[%s2731_s14 + $0x2a8] sm:$0xff]  ;;  %v1319_v2 = vadd.f32 %v807_v59, %v295_v58  ;;  %v827_v55 = vld [vmem:[%s2738_s26 + $0x340] sm:$0xff] }
  0x7c   : > { %1809 = vst [vmem:[%s2753_s20 + $0x1f0] sm:$0xff] %v1297_v0  ;;  %v297_v0 = vld [vmem:[%s2731_s14 + $0x2b0] sm:$0xff]  ;;  %v1320_v5 = vadd.f32 %v808_v62, %v296_v61  ;;  %v828_v58 = vld [vmem:[%s2738_s26 + $0x348] sm:$0xff] }
  0x7d   : > { %1810 = vst [vmem:[%s2753_s20 + $0x1f8] sm:$0xff] %v1298_v3  ;;  %v298_v3 = vld [vmem:[%s2731_s14 + $0x2b8] sm:$0xff]  ;;  %v1321_v8 = vadd.f32 %v809_v1, %v297_v0  ;;  %v829_v61 = vld [vmem:[%s2738_s26 + $0x350] sm:$0xff] }
  0x7e   : > { %1811 = vst [vmem:[%s2753_s20 + $0x200] sm:$0xff] %v1299_v6  ;;  %v299_v6 = vld [vmem:[%s2731_s14 + $0x2c0] sm:$0xff]  ;;  %v1322_v11 = vadd.f32 %v810_v4, %v298_v3  ;;  %v830_v0 = vld [vmem:[%s2738_s26 + $0x358] sm:$0xff] }
  0x7f   : > { %1812 = vst [vmem:[%s2753_s20 + $0x208] sm:$0xff] %v1300_v9  ;;  %v300_v9 = vld [vmem:[%s2731_s14 + $0x2c8] sm:$0xff]  ;;  %v1323_v14 = vadd.f32 %v811_v7, %v299_v6  ;;  %v831_v3 = vld [vmem:[%s2738_s26 + $0x360] sm:$0xff] }
  0x80   : > { %1813 = vst [vmem:[%s2753_s20 + $0x210] sm:$0xff] %v1301_v12  ;;  %v301_v12 = vld [vmem:[%s2731_s14 + $0x2d0] sm:$0xff]  ;;  %v1324_v17 = vadd.f32 %v812_v10, %v300_v9  ;;  %v832_v6 = vld [vmem:[%s2738_s26 + $0x368] sm:$0xff] }
  0x81   : > { %1814 = vst [vmem:[%s2753_s20 + $0x218] sm:$0xff] %v1302_v15  ;;  %v302_v15 = vld [vmem:[%s2731_s14 + $0x2d8] sm:$0xff]  ;;  %v1325_v20 = vadd.f32 %v813_v13, %v301_v12  ;;  %v833_v9 = vld [vmem:[%s2738_s26 + $0x370] sm:$0xff] }
  0x82   : > { %1815 = vst [vmem:[%s2753_s20 + $0x220] sm:$0xff] %v1303_v18  ;;  %v303_v18 = vld [vmem:[%s2731_s14 + $0x2e0] sm:$0xff]  ;;  %v1326_v23 = vadd.f32 %v814_v16, %v302_v15  ;;  %v834_v12 = vld [vmem:[%s2738_s26 + $0x378] sm:$0xff] }
  0x83   : > { %1816 = vst [vmem:[%s2753_s20 + $0x228] sm:$0xff] %v1304_v21  ;;  %v304_v21 = vld [vmem:[%s2731_s14 + $0x2e8] sm:$0xff]  ;;  %v1327_v26 = vadd.f32 %v815_v19, %v303_v18  ;;  %v835_v15 = vld [vmem:[%s2738_s26 + $0x380] sm:$0xff] }
  0x84   : > { %1817 = vst [vmem:[%s2753_s20 + $0x230] sm:$0xff] %v1305_v24  ;;  %v305_v24 = vld [vmem:[%s2731_s14 + $0x2f0] sm:$0xff]  ;;  %v1328_v29 = vadd.f32 %v816_v22, %v304_v21  ;;  %v836_v18 = vld [vmem:[%s2738_s26 + $0x388] sm:$0xff] }
  0x85   : > { %1818 = vst [vmem:[%s2753_s20 + $0x238] sm:$0xff] %v1306_v27  ;;  %v306_v27 = vld [vmem:[%s2731_s14 + $0x2f8] sm:$0xff]  ;;  %v1329_v32 = vadd.f32 %v817_v25, %v305_v24  ;;  %v837_v21 = vld [vmem:[%s2738_s26 + $0x390] sm:$0xff] }
  0x86   : > { %1819 = vst [vmem:[%s2753_s20 + $0x240] sm:$0xff] %v1307_v30  ;;  %v307_v30 = vld [vmem:[%s2731_s14 + $0x300] sm:$0xff]  ;;  %v1330_v35 = vadd.f32 %v818_v28, %v306_v27  ;;  %v838_v24 = vld [vmem:[%s2738_s26 + $0x398] sm:$0xff] }
  0x87   : > { %1820 = vst [vmem:[%s2753_s20 + $0x248] sm:$0xff] %v1308_v33  ;;  %v308_v33 = vld [vmem:[%s2731_s14 + $0x308] sm:$0xff]  ;;  %v1331_v38 = vadd.f32 %v819_v31, %v307_v30  ;;  %v839_v27 = vld [vmem:[%s2738_s26 + $0x3a0] sm:$0xff] }
  0x88   : > { %1821 = vst [vmem:[%s2753_s20 + $0x250] sm:$0xff] %v1309_v36  ;;  %v309_v36 = vld [vmem:[%s2731_s14 + $0x310] sm:$0xff]  ;;  %v1332_v41 = vadd.f32 %v820_v34, %v308_v33  ;;  %v840_v30 = vld [vmem:[%s2738_s26 + $0x3a8] sm:$0xff] }
  0x89   : > { %1822 = vst [vmem:[%s2753_s20 + $0x258] sm:$0xff] %v1310_v39  ;;  %v310_v39 = vld [vmem:[%s2731_s14 + $0x318] sm:$0xff]  ;;  %v1333_v44 = vadd.f32 %v821_v37, %v309_v36  ;;  %v841_v33 = vld [vmem:[%s2738_s26 + $0x3b0] sm:$0xff] }
  0x8a   : > { %1823 = vst [vmem:[%s2753_s20 + $0x260] sm:$0xff] %v1311_v42  ;;  %v311_v42 = vld [vmem:[%s2731_s14 + $0x320] sm:$0xff]  ;;  %v1334_v47 = vadd.f32 %v822_v40, %v310_v39  ;;  %v842_v36 = vld [vmem:[%s2738_s26 + $0x3b8] sm:$0xff] }
  0x8b   : > { %1824 = vst [vmem:[%s2753_s20 + $0x268] sm:$0xff] %v1312_v45  ;;  %v312_v45 = vld [vmem:[%s2731_s14 + $0x328] sm:$0xff]  ;;  %v1335_v50 = vadd.f32 %v823_v43, %v311_v42  ;;  %v843_v39 = vld [vmem:[%s2738_s26 + $0x3c0] sm:$0xff] }
  0x8c   : > { %1825 = vst [vmem:[%s2753_s20 + $0x270] sm:$0xff] %v1313_v48  ;;  %v313_v48 = vld [vmem:[%s2731_s14 + $0x330] sm:$0xff]  ;;  %v1336_v53 = vadd.f32 %v824_v46, %v312_v45  ;;  %v844_v42 = vld [vmem:[%s2738_s26 + $0x3c8] sm:$0xff] }
  0x8d   : > { %1826 = vst [vmem:[%s2753_s20 + $0x278] sm:$0xff] %v1314_v51  ;;  %v314_v51 = vld [vmem:[%s2731_s14 + $0x338] sm:$0xff]  ;;  %v1337_v56 = vadd.f32 %v825_v49, %v313_v48  ;;  %v845_v45 = vld [vmem:[%s2738_s26 + $0x3d0] sm:$0xff] }
  0x8e   : > { %1827 = vst [vmem:[%s2753_s20 + $0x280] sm:$0xff] %v1315_v54  ;;  %v315_v54 = vld [vmem:[%s2731_s14 + $0x340] sm:$0xff]  ;;  %v1338_v59 = vadd.f32 %v826_v52, %v314_v51  ;;  %v846_v48 = vld [vmem:[%s2738_s26 + $0x3d8] sm:$0xff] }
  0x8f   : > { %1828 = vst [vmem:[%s2753_s20 + $0x288] sm:$0xff] %v1316_v57  ;;  %v316_v57 = vld [vmem:[%s2731_s14 + $0x348] sm:$0xff]  ;;  %v1339_v62 = vadd.f32 %v827_v55, %v315_v54  ;;  %v847_v51 = vld [vmem:[%s2738_s26 + $0x3e0] sm:$0xff] }
  0x90   : > { %1829 = vst [vmem:[%s2753_s20 + $0x290] sm:$0xff] %v1317_v60  ;;  %v317_v60 = vld [vmem:[%s2731_s14 + $0x350] sm:$0xff]  ;;  %v1340_v1 = vadd.f32 %v828_v58, %v316_v57  ;;  %v848_v54 = vld [vmem:[%s2738_s26 + $0x3e8] sm:$0xff] }
  0x91   : > { %1830 = vst [vmem:[%s2753_s20 + $0x298] sm:$0xff] %v1318_v63  ;;  %v318_v63 = vld [vmem:[%s2731_s14 + $0x358] sm:$0xff]  ;;  %v1341_v4 = vadd.f32 %v829_v61, %v317_v60  ;;  %v849_v57 = vld [vmem:[%s2738_s26 + $0x3f0] sm:$0xff] }
  0x92   : > { %1831 = vst [vmem:[%s2753_s20 + $0x2a0] sm:$0xff] %v1319_v2  ;;  %v319_v2 = vld [vmem:[%s2731_s14 + $0x360] sm:$0xff]  ;;  %v1342_v7 = vadd.f32 %v830_v0, %v318_v63  ;;  %v850_v60 = vld [vmem:[%s2738_s26 + $0x3f8] sm:$0xff] }
  0x93   : > { %1832 = vst [vmem:[%s2753_s20 + $0x2a8] sm:$0xff] %v1320_v5  ;;  %v320_v5 = vld [vmem:[%s2731_s14 + $0x368] sm:$0xff]  ;;  %v1343_v10 = vadd.f32 %v831_v3, %v319_v2  ;;  %v851_v63 = vld [vmem:[%s2738_s26 + $0x400] sm:$0xff] }
  0x94   : > { %1833 = vst [vmem:[%s2753_s20 + $0x2b0] sm:$0xff] %v1321_v8  ;;  %v321_v8 = vld [vmem:[%s2731_s14 + $0x370] sm:$0xff]  ;;  %v1344_v13 = vadd.f32 %v832_v6, %v320_v5  ;;  %v852_v2 = vld [vmem:[%s2738_s26 + $0x408] sm:$0xff] }
  0x95   : > { %1834 = vst [vmem:[%s2753_s20 + $0x2b8] sm:$0xff] %v1322_v11  ;;  %v322_v11 = vld [vmem:[%s2731_s14 + $0x378] sm:$0xff]  ;;  %v1345_v16 = vadd.f32 %v833_v9, %v321_v8  ;;  %v853_v5 = vld [vmem:[%s2738_s26 + $0x410] sm:$0xff] }
  0x96   : > { %1835 = vst [vmem:[%s2753_s20 + $0x2c0] sm:$0xff] %v1323_v14  ;;  %v323_v14 = vld [vmem:[%s2731_s14 + $0x380] sm:$0xff]  ;;  %v1346_v19 = vadd.f32 %v834_v12, %v322_v11  ;;  %v854_v8 = vld [vmem:[%s2738_s26 + $0x418] sm:$0xff] }
  0x97   : > { %1836 = vst [vmem:[%s2753_s20 + $0x2c8] sm:$0xff] %v1324_v17  ;;  %v324_v17 = vld [vmem:[%s2731_s14 + $0x388] sm:$0xff]  ;;  %v1347_v22 = vadd.f32 %v835_v15, %v323_v14  ;;  %v855_v11 = vld [vmem:[%s2738_s26 + $0x420] sm:$0xff] }
  0x98   : > { %1837 = vst [vmem:[%s2753_s20 + $0x2d0] sm:$0xff] %v1325_v20  ;;  %v325_v20 = vld [vmem:[%s2731_s14 + $0x390] sm:$0xff]  ;;  %v1348_v25 = vadd.f32 %v836_v18, %v324_v17  ;;  %v856_v14 = vld [vmem:[%s2738_s26 + $0x428] sm:$0xff] }
  0x99   : > { %1838 = vst [vmem:[%s2753_s20 + $0x2d8] sm:$0xff] %v1326_v23  ;;  %v326_v23 = vld [vmem:[%s2731_s14 + $0x398] sm:$0xff]  ;;  %v1349_v28 = vadd.f32 %v837_v21, %v325_v20  ;;  %v857_v17 = vld [vmem:[%s2738_s26 + $0x430] sm:$0xff] }
  0x9a   : > { %1839 = vst [vmem:[%s2753_s20 + $0x2e0] sm:$0xff] %v1327_v26  ;;  %v327_v26 = vld [vmem:[%s2731_s14 + $0x3a0] sm:$0xff]  ;;  %v1350_v31 = vadd.f32 %v838_v24, %v326_v23  ;;  %v858_v20 = vld [vmem:[%s2738_s26 + $0x438] sm:$0xff] }
  0x9b   : > { %1840 = vst [vmem:[%s2753_s20 + $0x2e8] sm:$0xff] %v1328_v29  ;;  %v328_v29 = vld [vmem:[%s2731_s14 + $0x3a8] sm:$0xff]  ;;  %v1351_v34 = vadd.f32 %v839_v27, %v327_v26  ;;  %v859_v23 = vld [vmem:[%s2738_s26 + $0x440] sm:$0xff] }
  0x9c   : > { %1841 = vst [vmem:[%s2753_s20 + $0x2f0] sm:$0xff] %v1329_v32  ;;  %v329_v32 = vld [vmem:[%s2731_s14 + $0x3b0] sm:$0xff]  ;;  %v1352_v37 = vadd.f32 %v840_v30, %v328_v29  ;;  %v860_v26 = vld [vmem:[%s2738_s26 + $0x448] sm:$0xff] }
  0x9d   : > { %1842 = vst [vmem:[%s2753_s20 + $0x2f8] sm:$0xff] %v1330_v35  ;;  %v330_v35 = vld [vmem:[%s2731_s14 + $0x3b8] sm:$0xff]  ;;  %v1353_v40 = vadd.f32 %v841_v33, %v329_v32  ;;  %v861_v29 = vld [vmem:[%s2738_s26 + $0x450] sm:$0xff] }
  0x9e   : > { %1843 = vst [vmem:[%s2753_s20 + $0x300] sm:$0xff] %v1331_v38  ;;  %v331_v38 = vld [vmem:[%s2731_s14 + $0x3c0] sm:$0xff]  ;;  %v1354_v43 = vadd.f32 %v842_v36, %v330_v35  ;;  %v862_v32 = vld [vmem:[%s2738_s26 + $0x458] sm:$0xff] }
  0x9f   : > { %1844 = vst [vmem:[%s2753_s20 + $0x308] sm:$0xff] %v1332_v41  ;;  %v332_v41 = vld [vmem:[%s2731_s14 + $0x3c8] sm:$0xff]  ;;  %v1355_v46 = vadd.f32 %v843_v39, %v331_v38  ;;  %v863_v35 = vld [vmem:[%s2738_s26 + $0x460] sm:$0xff] }
  0xa0   : > { %1845 = vst [vmem:[%s2753_s20 + $0x310] sm:$0xff] %v1333_v44  ;;  %v333_v44 = vld [vmem:[%s2731_s14 + $0x3d0] sm:$0xff]  ;;  %v1356_v49 = vadd.f32 %v844_v42, %v332_v41  ;;  %v864_v38 = vld [vmem:[%s2738_s26 + $0x468] sm:$0xff] }
  0xa1   : > { %1846 = vst [vmem:[%s2753_s20 + $0x318] sm:$0xff] %v1334_v47  ;;  %v334_v47 = vld [vmem:[%s2731_s14 + $0x3d8] sm:$0xff]  ;;  %v1357_v52 = vadd.f32 %v845_v45, %v333_v44  ;;  %v865_v41 = vld [vmem:[%s2738_s26 + $0x470] sm:$0xff] }
  0xa2   : > { %1847 = vst [vmem:[%s2753_s20 + $0x320] sm:$0xff] %v1335_v50  ;;  %v335_v50 = vld [vmem:[%s2731_s14 + $0x3e0] sm:$0xff]  ;;  %v1358_v55 = vadd.f32 %v846_v48, %v334_v47  ;;  %v866_v44 = vld [vmem:[%s2738_s26 + $0x478] sm:$0xff] }
  0xa3   : > { %1848 = vst [vmem:[%s2753_s20 + $0x328] sm:$0xff] %v1336_v53  ;;  %v336_v53 = vld [vmem:[%s2731_s14 + $0x3e8] sm:$0xff]  ;;  %v1359_v58 = vadd.f32 %v847_v51, %v335_v50  ;;  %v867_v47 = vld [vmem:[%s2738_s26 + $0x480] sm:$0xff] }
  0xa4   : > { %1849 = vst [vmem:[%s2753_s20 + $0x330] sm:$0xff] %v1337_v56  ;;  %v337_v56 = vld [vmem:[%s2731_s14 + $0x3f0] sm:$0xff]  ;;  %v1360_v61 = vadd.f32 %v848_v54, %v336_v53  ;;  %v868_v50 = vld [vmem:[%s2738_s26 + $0x488] sm:$0xff] }
  0xa5   : > { %1850 = vst [vmem:[%s2753_s20 + $0x338] sm:$0xff] %v1338_v59  ;;  %v338_v59 = vld [vmem:[%s2731_s14 + $0x3f8] sm:$0xff]  ;;  %v1361_v0 = vadd.f32 %v849_v57, %v337_v56  ;;  %v869_v53 = vld [vmem:[%s2738_s26 + $0x490] sm:$0xff] }
  0xa6   : > { %1851 = vst [vmem:[%s2753_s20 + $0x340] sm:$0xff] %v1339_v62  ;;  %v339_v62 = vld [vmem:[%s2731_s14 + $0x400] sm:$0xff]  ;;  %v1362_v3 = vadd.f32 %v850_v60, %v338_v59  ;;  %v870_v56 = vld [vmem:[%s2738_s26 + $0x498] sm:$0xff] }
  0xa7   : > { %1852 = vst [vmem:[%s2753_s20 + $0x348] sm:$0xff] %v1340_v1  ;;  %v340_v1 = vld [vmem:[%s2731_s14 + $0x408] sm:$0xff]  ;;  %v1363_v6 = vadd.f32 %v851_v63, %v339_v62  ;;  %v871_v59 = vld [vmem:[%s2738_s26 + $0x4a0] sm:$0xff] }
  0xa8   : > { %1853 = vst [vmem:[%s2753_s20 + $0x350] sm:$0xff] %v1341_v4  ;;  %v341_v4 = vld [vmem:[%s2731_s14 + $0x410] sm:$0xff]  ;;  %v1364_v9 = vadd.f32 %v852_v2, %v340_v1  ;;  %v872_v62 = vld [vmem:[%s2738_s26 + $0x4a8] sm:$0xff] }
  0xa9   : > { %1854 = vst [vmem:[%s2753_s20 + $0x358] sm:$0xff] %v1342_v7  ;;  %v342_v7 = vld [vmem:[%s2731_s14 + $0x418] sm:$0xff]  ;;  %v1365_v12 = vadd.f32 %v853_v5, %v341_v4  ;;  %v873_v1 = vld [vmem:[%s2738_s26 + $0x4b0] sm:$0xff] }
  0xaa   : > { %1855 = vst [vmem:[%s2753_s20 + $0x360] sm:$0xff] %v1343_v10  ;;  %v343_v10 = vld [vmem:[%s2731_s14 + $0x420] sm:$0xff]  ;;  %v1366_v15 = vadd.f32 %v854_v8, %v342_v7  ;;  %v874_v4 = vld [vmem:[%s2738_s26 + $0x4b8] sm:$0xff] }
  0xab   : > { %1856 = vst [vmem:[%s2753_s20 + $0x368] sm:$0xff] %v1344_v13  ;;  %v344_v13 = vld [vmem:[%s2731_s14 + $0x428] sm:$0xff]  ;;  %v1367_v18 = vadd.f32 %v855_v11, %v343_v10  ;;  %v875_v7 = vld [vmem:[%s2738_s26 + $0x4c0] sm:$0xff] }
  0xac   : > { %1857 = vst [vmem:[%s2753_s20 + $0x370] sm:$0xff] %v1345_v16  ;;  %v345_v16 = vld [vmem:[%s2731_s14 + $0x430] sm:$0xff]  ;;  %v1368_v21 = vadd.f32 %v856_v14, %v344_v13  ;;  %v876_v10 = vld [vmem:[%s2738_s26 + $0x4c8] sm:$0xff] }
  0xad   : > { %1858 = vst [vmem:[%s2753_s20 + $0x378] sm:$0xff] %v1346_v19  ;;  %v346_v19 = vld [vmem:[%s2731_s14 + $0x438] sm:$0xff]  ;;  %v1369_v24 = vadd.f32 %v857_v17, %v345_v16  ;;  %v877_v13 = vld [vmem:[%s2738_s26 + $0x4d0] sm:$0xff] }
  0xae   : > { %1859 = vst [vmem:[%s2753_s20 + $0x380] sm:$0xff] %v1347_v22  ;;  %v347_v22 = vld [vmem:[%s2731_s14 + $0x440] sm:$0xff]  ;;  %v1370_v27 = vadd.f32 %v858_v20, %v346_v19  ;;  %v878_v16 = vld [vmem:[%s2738_s26 + $0x4d8] sm:$0xff] }
  0xaf   : > { %1860 = vst [vmem:[%s2753_s20 + $0x388] sm:$0xff] %v1348_v25  ;;  %v348_v25 = vld [vmem:[%s2731_s14 + $0x448] sm:$0xff]  ;;  %v1371_v30 = vadd.f32 %v859_v23, %v347_v22  ;;  %v879_v19 = vld [vmem:[%s2738_s26 + $0x4e0] sm:$0xff] }
  0xb0   : > { %1861 = vst [vmem:[%s2753_s20 + $0x390] sm:$0xff] %v1349_v28  ;;  %v349_v28 = vld [vmem:[%s2731_s14 + $0x450] sm:$0xff]  ;;  %v1372_v33 = vadd.f32 %v860_v26, %v348_v25  ;;  %v880_v22 = vld [vmem:[%s2738_s26 + $0x4e8] sm:$0xff] }
  0xb1   : > { %1862 = vst [vmem:[%s2753_s20 + $0x398] sm:$0xff] %v1350_v31  ;;  %v350_v31 = vld [vmem:[%s2731_s14 + $0x458] sm:$0xff]  ;;  %v1373_v36 = vadd.f32 %v861_v29, %v349_v28  ;;  %v881_v25 = vld [vmem:[%s2738_s26 + $0x4f0] sm:$0xff] }
  0xb2   : > { %1863 = vst [vmem:[%s2753_s20 + $0x3a0] sm:$0xff] %v1351_v34  ;;  %v351_v34 = vld [vmem:[%s2731_s14 + $0x460] sm:$0xff]  ;;  %v1374_v39 = vadd.f32 %v862_v32, %v350_v31  ;;  %v882_v28 = vld [vmem:[%s2738_s26 + $0x4f8] sm:$0xff] }
  0xb3   : > { %1864 = vst [vmem:[%s2753_s20 + $0x3a8] sm:$0xff] %v1352_v37  ;;  %v352_v37 = vld [vmem:[%s2731_s14 + $0x468] sm:$0xff]  ;;  %v1375_v42 = vadd.f32 %v863_v35, %v351_v34  ;;  %v883_v31 = vld [vmem:[%s2738_s26 + $0x500] sm:$0xff] }
  0xb4   : > { %1865 = vst [vmem:[%s2753_s20 + $0x3b0] sm:$0xff] %v1353_v40  ;;  %v353_v40 = vld [vmem:[%s2731_s14 + $0x470] sm:$0xff]  ;;  %v1376_v45 = vadd.f32 %v864_v38, %v352_v37  ;;  %v884_v34 = vld [vmem:[%s2738_s26 + $0x508] sm:$0xff] }
  0xb5   : > { %1866 = vst [vmem:[%s2753_s20 + $0x3b8] sm:$0xff] %v1354_v43  ;;  %v354_v43 = vld [vmem:[%s2731_s14 + $0x478] sm:$0xff]  ;;  %v1377_v48 = vadd.f32 %v865_v41, %v353_v40  ;;  %v885_v37 = vld [vmem:[%s2738_s26 + $0x510] sm:$0xff] }
  0xb6   : > { %1867 = vst [vmem:[%s2753_s20 + $0x3c0] sm:$0xff] %v1355_v46  ;;  %v355_v46 = vld [vmem:[%s2731_s14 + $0x480] sm:$0xff]  ;;  %v1378_v51 = vadd.f32 %v866_v44, %v354_v43  ;;  %v886_v40 = vld [vmem:[%s2738_s26 + $0x518] sm:$0xff] }
  0xb7   : > { %1868 = vst [vmem:[%s2753_s20 + $0x3c8] sm:$0xff] %v1356_v49  ;;  %v356_v49 = vld [vmem:[%s2731_s14 + $0x488] sm:$0xff]  ;;  %v1379_v54 = vadd.f32 %v867_v47, %v355_v46  ;;  %v887_v43 = vld [vmem:[%s2738_s26 + $0x520] sm:$0xff] }
  0xb8   : > { %1869 = vst [vmem:[%s2753_s20 + $0x3d0] sm:$0xff] %v1357_v52  ;;  %v357_v52 = vld [vmem:[%s2731_s14 + $0x490] sm:$0xff]  ;;  %v1380_v57 = vadd.f32 %v868_v50, %v356_v49  ;;  %v888_v46 = vld [vmem:[%s2738_s26 + $0x528] sm:$0xff] }
  0xb9   : > { %1870 = vst [vmem:[%s2753_s20 + $0x3d8] sm:$0xff] %v1358_v55  ;;  %v358_v55 = vld [vmem:[%s2731_s14 + $0x498] sm:$0xff]  ;;  %v1381_v60 = vadd.f32 %v869_v53, %v357_v52  ;;  %v889_v49 = vld [vmem:[%s2738_s26 + $0x530] sm:$0xff] }
  0xba   : > { %1871 = vst [vmem:[%s2753_s20 + $0x3e0] sm:$0xff] %v1359_v58  ;;  %v359_v58 = vld [vmem:[%s2731_s14 + $0x4a0] sm:$0xff]  ;;  %v1382_v63 = vadd.f32 %v870_v56, %v358_v55  ;;  %v890_v52 = vld [vmem:[%s2738_s26 + $0x538] sm:$0xff] }
  0xbb   : > { %1872 = vst [vmem:[%s2753_s20 + $0x3e8] sm:$0xff] %v1360_v61  ;;  %v360_v61 = vld [vmem:[%s2731_s14 + $0x4a8] sm:$0xff]  ;;  %v1383_v2 = vadd.f32 %v871_v59, %v359_v58  ;;  %v891_v55 = vld [vmem:[%s2738_s26 + $0x540] sm:$0xff] }
  0xbc   : > { %1873 = vst [vmem:[%s2753_s20 + $0x3f0] sm:$0xff] %v1361_v0  ;;  %v361_v0 = vld [vmem:[%s2731_s14 + $0x4b0] sm:$0xff]  ;;  %v1384_v5 = vadd.f32 %v872_v62, %v360_v61  ;;  %v892_v58 = vld [vmem:[%s2738_s26 + $0x548] sm:$0xff] }
  0xbd   : > { %1874 = vst [vmem:[%s2753_s20 + $0x3f8] sm:$0xff] %v1362_v3  ;;  %v362_v3 = vld [vmem:[%s2731_s14 + $0x4b8] sm:$0xff]  ;;  %v1385_v8 = vadd.f32 %v873_v1, %v361_v0  ;;  %v893_v61 = vld [vmem:[%s2738_s26 + $0x550] sm:$0xff] }
  0xbe   : > { %1875 = vst [vmem:[%s2753_s20 + $0x400] sm:$0xff] %v1363_v6  ;;  %v363_v6 = vld [vmem:[%s2731_s14 + $0x4c0] sm:$0xff]  ;;  %v1386_v11 = vadd.f32 %v874_v4, %v362_v3  ;;  %v894_v0 = vld [vmem:[%s2738_s26 + $0x558] sm:$0xff] }
  0xbf   : > { %1876 = vst [vmem:[%s2753_s20 + $0x408] sm:$0xff] %v1364_v9  ;;  %v364_v9 = vld [vmem:[%s2731_s14 + $0x4c8] sm:$0xff]  ;;  %v1387_v14 = vadd.f32 %v875_v7, %v363_v6  ;;  %v895_v3 = vld [vmem:[%s2738_s26 + $0x560] sm:$0xff] }
  0xc0   : > { %1877 = vst [vmem:[%s2753_s20 + $0x410] sm:$0xff] %v1365_v12  ;;  %v365_v12 = vld [vmem:[%s2731_s14 + $0x4d0] sm:$0xff]  ;;  %v1388_v17 = vadd.f32 %v876_v10, %v364_v9  ;;  %v896_v6 = vld [vmem:[%s2738_s26 + $0x568] sm:$0xff] }
  0xc1   : > { %1878 = vst [vmem:[%s2753_s20 + $0x418] sm:$0xff] %v1366_v15  ;;  %v366_v15 = vld [vmem:[%s2731_s14 + $0x4d8] sm:$0xff]  ;;  %v1389_v20 = vadd.f32 %v877_v13, %v365_v12  ;;  %v897_v9 = vld [vmem:[%s2738_s26 + $0x570] sm:$0xff] }
  0xc2   : > { %1879 = vst [vmem:[%s2753_s20 + $0x420] sm:$0xff] %v1367_v18  ;;  %v367_v18 = vld [vmem:[%s2731_s14 + $0x4e0] sm:$0xff]  ;;  %v1390_v23 = vadd.f32 %v878_v16, %v366_v15  ;;  %v898_v12 = vld [vmem:[%s2738_s26 + $0x578] sm:$0xff] }
  0xc3   : > { %1880 = vst [vmem:[%s2753_s20 + $0x428] sm:$0xff] %v1368_v21  ;;  %v368_v21 = vld [vmem:[%s2731_s14 + $0x4e8] sm:$0xff]  ;;  %v1391_v26 = vadd.f32 %v879_v19, %v367_v18  ;;  %v899_v15 = vld [vmem:[%s2738_s26 + $0x580] sm:$0xff] }
  0xc4   : > { %1881 = vst [vmem:[%s2753_s20 + $0x430] sm:$0xff] %v1369_v24  ;;  %v369_v24 = vld [vmem:[%s2731_s14 + $0x4f0] sm:$0xff]  ;;  %v1392_v29 = vadd.f32 %v880_v22, %v368_v21  ;;  %v900_v18 = vld [vmem:[%s2738_s26 + $0x588] sm:$0xff] }
  0xc5   : > { %1882 = vst [vmem:[%s2753_s20 + $0x438] sm:$0xff] %v1370_v27  ;;  %v370_v27 = vld [vmem:[%s2731_s14 + $0x4f8] sm:$0xff]  ;;  %v1393_v32 = vadd.f32 %v881_v25, %v369_v24  ;;  %v901_v21 = vld [vmem:[%s2738_s26 + $0x590] sm:$0xff] }
  0xc6   : > { %1883 = vst [vmem:[%s2753_s20 + $0x440] sm:$0xff] %v1371_v30  ;;  %v371_v30 = vld [vmem:[%s2731_s14 + $0x500] sm:$0xff]  ;;  %v1394_v35 = vadd.f32 %v882_v28, %v370_v27  ;;  %v902_v24 = vld [vmem:[%s2738_s26 + $0x598] sm:$0xff] }
  0xc7   : > { %1884 = vst [vmem:[%s2753_s20 + $0x448] sm:$0xff] %v1372_v33  ;;  %v372_v33 = vld [vmem:[%s2731_s14 + $0x508] sm:$0xff]  ;;  %v1395_v38 = vadd.f32 %v883_v31, %v371_v30  ;;  %v903_v27 = vld [vmem:[%s2738_s26 + $0x5a0] sm:$0xff] }
  0xc8   : > { %1885 = vst [vmem:[%s2753_s20 + $0x450] sm:$0xff] %v1373_v36  ;;  %v373_v36 = vld [vmem:[%s2731_s14 + $0x510] sm:$0xff]  ;;  %v1396_v41 = vadd.f32 %v884_v34, %v372_v33  ;;  %v904_v30 = vld [vmem:[%s2738_s26 + $0x5a8] sm:$0xff] }
  0xc9   : > { %1886 = vst [vmem:[%s2753_s20 + $0x458] sm:$0xff] %v1374_v39  ;;  %v374_v39 = vld [vmem:[%s2731_s14 + $0x518] sm:$0xff]  ;;  %v1397_v44 = vadd.f32 %v885_v37, %v373_v36  ;;  %v905_v33 = vld [vmem:[%s2738_s26 + $0x5b0] sm:$0xff] }
  0xca   : > { %1887 = vst [vmem:[%s2753_s20 + $0x460] sm:$0xff] %v1375_v42  ;;  %v375_v42 = vld [vmem:[%s2731_s14 + $0x520] sm:$0xff]  ;;  %v1398_v47 = vadd.f32 %v886_v40, %v374_v39  ;;  %v906_v36 = vld [vmem:[%s2738_s26 + $0x5b8] sm:$0xff] }
  0xcb   : > { %1888 = vst [vmem:[%s2753_s20 + $0x468] sm:$0xff] %v1376_v45  ;;  %v376_v45 = vld [vmem:[%s2731_s14 + $0x528] sm:$0xff]  ;;  %v1399_v50 = vadd.f32 %v887_v43, %v375_v42  ;;  %v907_v39 = vld [vmem:[%s2738_s26 + $0x5c0] sm:$0xff] }
  0xcc   : > { %1889 = vst [vmem:[%s2753_s20 + $0x470] sm:$0xff] %v1377_v48  ;;  %v377_v48 = vld [vmem:[%s2731_s14 + $0x530] sm:$0xff]  ;;  %v1400_v53 = vadd.f32 %v888_v46, %v376_v45  ;;  %v908_v42 = vld [vmem:[%s2738_s26 + $0x5c8] sm:$0xff] }
  0xcd   : > { %1890 = vst [vmem:[%s2753_s20 + $0x478] sm:$0xff] %v1378_v51  ;;  %v378_v51 = vld [vmem:[%s2731_s14 + $0x538] sm:$0xff]  ;;  %v1401_v56 = vadd.f32 %v889_v49, %v377_v48  ;;  %v909_v45 = vld [vmem:[%s2738_s26 + $0x5d0] sm:$0xff] }
  0xce   : > { %1891 = vst [vmem:[%s2753_s20 + $0x480] sm:$0xff] %v1379_v54  ;;  %v379_v54 = vld [vmem:[%s2731_s14 + $0x540] sm:$0xff]  ;;  %v1402_v59 = vadd.f32 %v890_v52, %v378_v51  ;;  %v910_v48 = vld [vmem:[%s2738_s26 + $0x5d8] sm:$0xff] }
  0xcf   : > { %1892 = vst [vmem:[%s2753_s20 + $0x488] sm:$0xff] %v1380_v57  ;;  %v380_v57 = vld [vmem:[%s2731_s14 + $0x548] sm:$0xff]  ;;  %v1403_v62 = vadd.f32 %v891_v55, %v379_v54  ;;  %v911_v51 = vld [vmem:[%s2738_s26 + $0x5e0] sm:$0xff] }
  0xd0   : > { %1893 = vst [vmem:[%s2753_s20 + $0x490] sm:$0xff] %v1381_v60  ;;  %v381_v60 = vld [vmem:[%s2731_s14 + $0x550] sm:$0xff]  ;;  %v1404_v1 = vadd.f32 %v892_v58, %v380_v57  ;;  %v912_v54 = vld [vmem:[%s2738_s26 + $0x5e8] sm:$0xff] }
  0xd1   : > { %1894 = vst [vmem:[%s2753_s20 + $0x498] sm:$0xff] %v1382_v63  ;;  %v382_v63 = vld [vmem:[%s2731_s14 + $0x558] sm:$0xff]  ;;  %v1405_v4 = vadd.f32 %v893_v61, %v381_v60  ;;  %v913_v57 = vld [vmem:[%s2738_s26 + $0x5f0] sm:$0xff] }
  0xd2   : > { %1895 = vst [vmem:[%s2753_s20 + $0x4a0] sm:$0xff] %v1383_v2  ;;  %v383_v2 = vld [vmem:[%s2731_s14 + $0x560] sm:$0xff]  ;;  %v1406_v7 = vadd.f32 %v894_v0, %v382_v63  ;;  %v914_v60 = vld [vmem:[%s2738_s26 + $0x5f8] sm:$0xff] }
  0xd3   : > { %1896 = vst [vmem:[%s2753_s20 + $0x4a8] sm:$0xff] %v1384_v5  ;;  %v384_v5 = vld [vmem:[%s2731_s14 + $0x568] sm:$0xff]  ;;  %v1407_v10 = vadd.f32 %v895_v3, %v383_v2  ;;  %v915_v63 = vld [vmem:[%s2738_s26 + $0x600] sm:$0xff] }
  0xd4   : > { %1897 = vst [vmem:[%s2753_s20 + $0x4b0] sm:$0xff] %v1385_v8  ;;  %v385_v8 = vld [vmem:[%s2731_s14 + $0x570] sm:$0xff]  ;;  %v1408_v13 = vadd.f32 %v896_v6, %v384_v5  ;;  %v916_v2 = vld [vmem:[%s2738_s26 + $0x608] sm:$0xff] }
  0xd5   : > { %1898 = vst [vmem:[%s2753_s20 + $0x4b8] sm:$0xff] %v1386_v11  ;;  %v386_v11 = vld [vmem:[%s2731_s14 + $0x578] sm:$0xff]  ;;  %v1409_v16 = vadd.f32 %v897_v9, %v385_v8  ;;  %v917_v5 = vld [vmem:[%s2738_s26 + $0x610] sm:$0xff] }
  0xd6   : > { %1899 = vst [vmem:[%s2753_s20 + $0x4c0] sm:$0xff] %v1387_v14  ;;  %v387_v14 = vld [vmem:[%s2731_s14 + $0x580] sm:$0xff]  ;;  %v1410_v19 = vadd.f32 %v898_v12, %v386_v11  ;;  %v918_v8 = vld [vmem:[%s2738_s26 + $0x618] sm:$0xff] }
  0xd7   : > { %1900 = vst [vmem:[%s2753_s20 + $0x4c8] sm:$0xff] %v1388_v17  ;;  %v388_v17 = vld [vmem:[%s2731_s14 + $0x588] sm:$0xff]  ;;  %v1411_v22 = vadd.f32 %v899_v15, %v387_v14  ;;  %v919_v11 = vld [vmem:[%s2738_s26 + $0x620] sm:$0xff] }
  0xd8   : > { %1901 = vst [vmem:[%s2753_s20 + $0x4d0] sm:$0xff] %v1389_v20  ;;  %v389_v20 = vld [vmem:[%s2731_s14 + $0x590] sm:$0xff]  ;;  %v1412_v25 = vadd.f32 %v900_v18, %v388_v17  ;;  %v920_v14 = vld [vmem:[%s2738_s26 + $0x628] sm:$0xff] }
  0xd9   : > { %1902 = vst [vmem:[%s2753_s20 + $0x4d8] sm:$0xff] %v1390_v23  ;;  %v390_v23 = vld [vmem:[%s2731_s14 + $0x598] sm:$0xff]  ;;  %v1413_v28 = vadd.f32 %v901_v21, %v389_v20  ;;  %v921_v17 = vld [vmem:[%s2738_s26 + $0x630] sm:$0xff] }
  0xda   : > { %1903 = vst [vmem:[%s2753_s20 + $0x4e0] sm:$0xff] %v1391_v26  ;;  %v391_v26 = vld [vmem:[%s2731_s14 + $0x5a0] sm:$0xff]  ;;  %v1414_v31 = vadd.f32 %v902_v24, %v390_v23  ;;  %v922_v20 = vld [vmem:[%s2738_s26 + $0x638] sm:$0xff] }
  0xdb   : > { %1904 = vst [vmem:[%s2753_s20 + $0x4e8] sm:$0xff] %v1392_v29  ;;  %v392_v29 = vld [vmem:[%s2731_s14 + $0x5a8] sm:$0xff]  ;;  %v1415_v34 = vadd.f32 %v903_v27, %v391_v26  ;;  %v923_v23 = vld [vmem:[%s2738_s26 + $0x640] sm:$0xff] }
  0xdc   : > { %1905 = vst [vmem:[%s2753_s20 + $0x4f0] sm:$0xff] %v1393_v32  ;;  %v393_v32 = vld [vmem:[%s2731_s14 + $0x5b0] sm:$0xff]  ;;  %v1416_v37 = vadd.f32 %v904_v30, %v392_v29  ;;  %v924_v26 = vld [vmem:[%s2738_s26 + $0x648] sm:$0xff] }
  0xdd   : > { %1906 = vst [vmem:[%s2753_s20 + $0x4f8] sm:$0xff] %v1394_v35  ;;  %v394_v35 = vld [vmem:[%s2731_s14 + $0x5b8] sm:$0xff]  ;;  %v1417_v40 = vadd.f32 %v905_v33, %v393_v32  ;;  %v925_v29 = vld [vmem:[%s2738_s26 + $0x650] sm:$0xff] }
  0xde   : > { %1907 = vst [vmem:[%s2753_s20 + $0x500] sm:$0xff] %v1395_v38  ;;  %v395_v38 = vld [vmem:[%s2731_s14 + $0x5c0] sm:$0xff]  ;;  %v1418_v43 = vadd.f32 %v906_v36, %v394_v35  ;;  %v926_v32 = vld [vmem:[%s2738_s26 + $0x658] sm:$0xff] }
  0xdf   : > { %1908 = vst [vmem:[%s2753_s20 + $0x508] sm:$0xff] %v1396_v41  ;;  %v396_v41 = vld [vmem:[%s2731_s14 + $0x5c8] sm:$0xff]  ;;  %v1419_v46 = vadd.f32 %v907_v39, %v395_v38  ;;  %v927_v35 = vld [vmem:[%s2738_s26 + $0x660] sm:$0xff] }
  0xe0   : > { %1909 = vst [vmem:[%s2753_s20 + $0x510] sm:$0xff] %v1397_v44  ;;  %v397_v44 = vld [vmem:[%s2731_s14 + $0x5d0] sm:$0xff]  ;;  %v1420_v49 = vadd.f32 %v908_v42, %v396_v41  ;;  %v928_v38 = vld [vmem:[%s2738_s26 + $0x668] sm:$0xff] }
  0xe1   : > { %1910 = vst [vmem:[%s2753_s20 + $0x518] sm:$0xff] %v1398_v47  ;;  %v398_v47 = vld [vmem:[%s2731_s14 + $0x5d8] sm:$0xff]  ;;  %v1421_v52 = vadd.f32 %v909_v45, %v397_v44  ;;  %v929_v41 = vld [vmem:[%s2738_s26 + $0x670] sm:$0xff] }
  0xe2   : > { %1911 = vst [vmem:[%s2753_s20 + $0x520] sm:$0xff] %v1399_v50  ;;  %v399_v50 = vld [vmem:[%s2731_s14 + $0x5e0] sm:$0xff]  ;;  %v1422_v55 = vadd.f32 %v910_v48, %v398_v47  ;;  %v930_v44 = vld [vmem:[%s2738_s26 + $0x678] sm:$0xff] }
  0xe3   : > { %1912 = vst [vmem:[%s2753_s20 + $0x528] sm:$0xff] %v1400_v53  ;;  %v400_v53 = vld [vmem:[%s2731_s14 + $0x5e8] sm:$0xff]  ;;  %v1423_v58 = vadd.f32 %v911_v51, %v399_v50  ;;  %v931_v47 = vld [vmem:[%s2738_s26 + $0x680] sm:$0xff] }
  0xe4   : > { %1913 = vst [vmem:[%s2753_s20 + $0x530] sm:$0xff] %v1401_v56  ;;  %v401_v56 = vld [vmem:[%s2731_s14 + $0x5f0] sm:$0xff]  ;;  %v1424_v61 = vadd.f32 %v912_v54, %v400_v53  ;;  %v932_v50 = vld [vmem:[%s2738_s26 + $0x688] sm:$0xff] }
  0xe5   : > { %1914 = vst [vmem:[%s2753_s20 + $0x538] sm:$0xff] %v1402_v59  ;;  %v402_v59 = vld [vmem:[%s2731_s14 + $0x5f8] sm:$0xff]  ;;  %v1425_v0 = vadd.f32 %v913_v57, %v401_v56  ;;  %v933_v53 = vld [vmem:[%s2738_s26 + $0x690] sm:$0xff] }
  0xe6   : > { %1915 = vst [vmem:[%s2753_s20 + $0x540] sm:$0xff] %v1403_v62  ;;  %v403_v62 = vld [vmem:[%s2731_s14 + $0x600] sm:$0xff]  ;;  %v1426_v3 = vadd.f32 %v914_v60, %v402_v59  ;;  %v934_v56 = vld [vmem:[%s2738_s26 + $0x698] sm:$0xff] }
  0xe7   : > { %1916 = vst [vmem:[%s2753_s20 + $0x548] sm:$0xff] %v1404_v1  ;;  %v404_v1 = vld [vmem:[%s2731_s14 + $0x608] sm:$0xff]  ;;  %v1427_v6 = vadd.f32 %v915_v63, %v403_v62  ;;  %v935_v59 = vld [vmem:[%s2738_s26 + $0x6a0] sm:$0xff] }
  0xe8   : > { %1917 = vst [vmem:[%s2753_s20 + $0x550] sm:$0xff] %v1405_v4  ;;  %v405_v4 = vld [vmem:[%s2731_s14 + $0x610] sm:$0xff]  ;;  %v1428_v9 = vadd.f32 %v916_v2, %v404_v1  ;;  %v936_v62 = vld [vmem:[%s2738_s26 + $0x6a8] sm:$0xff] }
  0xe9   : > { %1918 = vst [vmem:[%s2753_s20 + $0x558] sm:$0xff] %v1406_v7  ;;  %v406_v7 = vld [vmem:[%s2731_s14 + $0x618] sm:$0xff]  ;;  %v1429_v12 = vadd.f32 %v917_v5, %v405_v4  ;;  %v937_v1 = vld [vmem:[%s2738_s26 + $0x6b0] sm:$0xff] }
  0xea   : > { %1919 = vst [vmem:[%s2753_s20 + $0x560] sm:$0xff] %v1407_v10  ;;  %v407_v10 = vld [vmem:[%s2731_s14 + $0x620] sm:$0xff]  ;;  %v1430_v15 = vadd.f32 %v918_v8, %v406_v7  ;;  %v938_v4 = vld [vmem:[%s2738_s26 + $0x6b8] sm:$0xff] }
  0xeb   : > { %1920 = vst [vmem:[%s2753_s20 + $0x568] sm:$0xff] %v1408_v13  ;;  %v408_v13 = vld [vmem:[%s2731_s14 + $0x628] sm:$0xff]  ;;  %v1431_v18 = vadd.f32 %v919_v11, %v407_v10  ;;  %v939_v7 = vld [vmem:[%s2738_s26 + $0x6c0] sm:$0xff] }
  0xec   : > { %1921 = vst [vmem:[%s2753_s20 + $0x570] sm:$0xff] %v1409_v16  ;;  %v409_v16 = vld [vmem:[%s2731_s14 + $0x630] sm:$0xff]  ;;  %v1432_v21 = vadd.f32 %v920_v14, %v408_v13  ;;  %v940_v10 = vld [vmem:[%s2738_s26 + $0x6c8] sm:$0xff] }
  0xed   : > { %1922 = vst [vmem:[%s2753_s20 + $0x578] sm:$0xff] %v1410_v19  ;;  %v410_v19 = vld [vmem:[%s2731_s14 + $0x638] sm:$0xff]  ;;  %v1433_v24 = vadd.f32 %v921_v17, %v409_v16  ;;  %v941_v13 = vld [vmem:[%s2738_s26 + $0x6d0] sm:$0xff] }
  0xee   : > { %1923 = vst [vmem:[%s2753_s20 + $0x580] sm:$0xff] %v1411_v22  ;;  %v411_v22 = vld [vmem:[%s2731_s14 + $0x640] sm:$0xff]  ;;  %v1434_v27 = vadd.f32 %v922_v20, %v410_v19  ;;  %v942_v16 = vld [vmem:[%s2738_s26 + $0x6d8] sm:$0xff] }
  0xef   : > { %1924 = vst [vmem:[%s2753_s20 + $0x588] sm:$0xff] %v1412_v25  ;;  %v412_v25 = vld [vmem:[%s2731_s14 + $0x648] sm:$0xff]  ;;  %v1435_v30 = vadd.f32 %v923_v23, %v411_v22  ;;  %v943_v19 = vld [vmem:[%s2738_s26 + $0x6e0] sm:$0xff] }
  0xf0   : > { %1925 = vst [vmem:[%s2753_s20 + $0x590] sm:$0xff] %v1413_v28  ;;  %v413_v28 = vld [vmem:[%s2731_s14 + $0x650] sm:$0xff]  ;;  %v1436_v33 = vadd.f32 %v924_v26, %v412_v25  ;;  %v944_v22 = vld [vmem:[%s2738_s26 + $0x6e8] sm:$0xff] }
  0xf1   : > { %1926 = vst [vmem:[%s2753_s20 + $0x598] sm:$0xff] %v1414_v31  ;;  %v414_v31 = vld [vmem:[%s2731_s14 + $0x658] sm:$0xff]  ;;  %v1437_v36 = vadd.f32 %v925_v29, %v413_v28  ;;  %v945_v25 = vld [vmem:[%s2738_s26 + $0x6f0] sm:$0xff] }
  0xf2   : > { %1927 = vst [vmem:[%s2753_s20 + $0x5a0] sm:$0xff] %v1415_v34  ;;  %v415_v34 = vld [vmem:[%s2731_s14 + $0x660] sm:$0xff]  ;;  %v1438_v39 = vadd.f32 %v926_v32, %v414_v31  ;;  %v946_v28 = vld [vmem:[%s2738_s26 + $0x6f8] sm:$0xff] }
  0xf3   : > { %1928 = vst [vmem:[%s2753_s20 + $0x5a8] sm:$0xff] %v1416_v37  ;;  %v416_v37 = vld [vmem:[%s2731_s14 + $0x668] sm:$0xff]  ;;  %v1439_v42 = vadd.f32 %v927_v35, %v415_v34  ;;  %v947_v31 = vld [vmem:[%s2738_s26 + $0x700] sm:$0xff] }
  0xf4   : > { %1929 = vst [vmem:[%s2753_s20 + $0x5b0] sm:$0xff] %v1417_v40  ;;  %v417_v40 = vld [vmem:[%s2731_s14 + $0x670] sm:$0xff]  ;;  %v1440_v45 = vadd.f32 %v928_v38, %v416_v37  ;;  %v948_v34 = vld [vmem:[%s2738_s26 + $0x708] sm:$0xff] }
  0xf5   : > { %1930 = vst [vmem:[%s2753_s20 + $0x5b8] sm:$0xff] %v1418_v43  ;;  %v418_v43 = vld [vmem:[%s2731_s14 + $0x678] sm:$0xff]  ;;  %v1441_v48 = vadd.f32 %v929_v41, %v417_v40  ;;  %v949_v37 = vld [vmem:[%s2738_s26 + $0x710] sm:$0xff] }
  0xf6   : > { %1931 = vst [vmem:[%s2753_s20 + $0x5c0] sm:$0xff] %v1419_v46  ;;  %v419_v46 = vld [vmem:[%s2731_s14 + $0x680] sm:$0xff]  ;;  %v1442_v51 = vadd.f32 %v930_v44, %v418_v43  ;;  %v950_v40 = vld [vmem:[%s2738_s26 + $0x718] sm:$0xff] }
  0xf7   : > { %1932 = vst [vmem:[%s2753_s20 + $0x5c8] sm:$0xff] %v1420_v49  ;;  %v420_v49 = vld [vmem:[%s2731_s14 + $0x688] sm:$0xff]  ;;  %v1443_v54 = vadd.f32 %v931_v47, %v419_v46  ;;  %v951_v43 = vld [vmem:[%s2738_s26 + $0x720] sm:$0xff] }
  0xf8   : > { %1933 = vst [vmem:[%s2753_s20 + $0x5d0] sm:$0xff] %v1421_v52  ;;  %v421_v52 = vld [vmem:[%s2731_s14 + $0x690] sm:$0xff]  ;;  %v1444_v57 = vadd.f32 %v932_v50, %v420_v49  ;;  %v952_v46 = vld [vmem:[%s2738_s26 + $0x728] sm:$0xff] }
  0xf9   : > { %1934 = vst [vmem:[%s2753_s20 + $0x5d8] sm:$0xff] %v1422_v55  ;;  %v422_v55 = vld [vmem:[%s2731_s14 + $0x698] sm:$0xff]  ;;  %v1445_v60 = vadd.f32 %v933_v53, %v421_v52  ;;  %v953_v49 = vld [vmem:[%s2738_s26 + $0x730] sm:$0xff] }
  0xfa   : > { %1935 = vst [vmem:[%s2753_s20 + $0x5e0] sm:$0xff] %v1423_v58  ;;  %v423_v58 = vld [vmem:[%s2731_s14 + $0x6a0] sm:$0xff]  ;;  %v1446_v63 = vadd.f32 %v934_v56, %v422_v55  ;;  %v954_v52 = vld [vmem:[%s2738_s26 + $0x738] sm:$0xff] }
  0xfb   : > { %1936 = vst [vmem:[%s2753_s20 + $0x5e8] sm:$0xff] %v1424_v61  ;;  %v424_v61 = vld [vmem:[%s2731_s14 + $0x6a8] sm:$0xff]  ;;  %v1447_v2 = vadd.f32 %v935_v59, %v423_v58  ;;  %v955_v55 = vld [vmem:[%s2738_s26 + $0x740] sm:$0xff] }
  0xfc   : > { %1937 = vst [vmem:[%s2753_s20 + $0x5f0] sm:$0xff] %v1425_v0  ;;  %v425_v0 = vld [vmem:[%s2731_s14 + $0x6b0] sm:$0xff]  ;;  %v1448_v5 = vadd.f32 %v936_v62, %v424_v61  ;;  %v956_v58 = vld [vmem:[%s2738_s26 + $0x748] sm:$0xff] }
  0xfd   : > { %1938 = vst [vmem:[%s2753_s20 + $0x5f8] sm:$0xff] %v1426_v3  ;;  %v426_v3 = vld [vmem:[%s2731_s14 + $0x6b8] sm:$0xff]  ;;  %v1449_v8 = vadd.f32 %v937_v1, %v425_v0  ;;  %v957_v61 = vld [vmem:[%s2738_s26 + $0x750] sm:$0xff] }
  0xfe   : > { %1939 = vst [vmem:[%s2753_s20 + $0x600] sm:$0xff] %v1427_v6  ;;  %v427_v6 = vld [vmem:[%s2731_s14 + $0x6c0] sm:$0xff]  ;;  %v1450_v11 = vadd.f32 %v938_v4, %v426_v3  ;;  %v958_v0 = vld [vmem:[%s2738_s26 + $0x758] sm:$0xff] }
  0xff   : > { %1940 = vst [vmem:[%s2753_s20 + $0x608] sm:$0xff] %v1428_v9  ;;  %v428_v9 = vld [vmem:[%s2731_s14 + $0x6c8] sm:$0xff]  ;;  %v1451_v14 = vadd.f32 %v939_v7, %v427_v6  ;;  %v959_v3 = vld [vmem:[%s2738_s26 + $0x760] sm:$0xff] }
 0x100   : > { %1941 = vst [vmem:[%s2753_s20 + $0x610] sm:$0xff] %v1429_v12  ;;  %v429_v12 = vld [vmem:[%s2731_s14 + $0x6d0] sm:$0xff]  ;;  %v1452_v17 = vadd.f32 %v940_v10, %v428_v9  ;;  %v960_v6 = vld [vmem:[%s2738_s26 + $0x768] sm:$0xff] }
 0x101   : > { %1942 = vst [vmem:[%s2753_s20 + $0x618] sm:$0xff] %v1430_v15  ;;  %v430_v15 = vld [vmem:[%s2731_s14 + $0x6d8] sm:$0xff]  ;;  %v1453_v20 = vadd.f32 %v941_v13, %v429_v12  ;;  %v961_v9 = vld [vmem:[%s2738_s26 + $0x770] sm:$0xff] }
 0x102   : > { %1943 = vst [vmem:[%s2753_s20 + $0x620] sm:$0xff] %v1431_v18  ;;  %v431_v18 = vld [vmem:[%s2731_s14 + $0x6e0] sm:$0xff]  ;;  %v1454_v23 = vadd.f32 %v942_v16, %v430_v15  ;;  %v962_v12 = vld [vmem:[%s2738_s26 + $0x778] sm:$0xff] }
 0x103   : > { %1944 = vst [vmem:[%s2753_s20 + $0x628] sm:$0xff] %v1432_v21  ;;  %v432_v21 = vld [vmem:[%s2731_s14 + $0x6e8] sm:$0xff]  ;;  %v1455_v26 = vadd.f32 %v943_v19, %v431_v18  ;;  %v963_v15 = vld [vmem:[%s2738_s26 + $0x780] sm:$0xff] }
 0x104   : > { %1945 = vst [vmem:[%s2753_s20 + $0x630] sm:$0xff] %v1433_v24  ;;  %v433_v24 = vld [vmem:[%s2731_s14 + $0x6f0] sm:$0xff]  ;;  %v1456_v29 = vadd.f32 %v944_v22, %v432_v21  ;;  %v964_v18 = vld [vmem:[%s2738_s26 + $0x788] sm:$0xff] }
 0x105   : > { %1946 = vst [vmem:[%s2753_s20 + $0x638] sm:$0xff] %v1434_v27  ;;  %v434_v27 = vld [vmem:[%s2731_s14 + $0x6f8] sm:$0xff]  ;;  %v1457_v32 = vadd.f32 %v945_v25, %v433_v24  ;;  %v965_v21 = vld [vmem:[%s2738_s26 + $0x790] sm:$0xff] }
 0x106   : > { %1947 = vst [vmem:[%s2753_s20 + $0x640] sm:$0xff] %v1435_v30  ;;  %v435_v30 = vld [vmem:[%s2731_s14 + $0x700] sm:$0xff]  ;;  %v1458_v35 = vadd.f32 %v946_v28, %v434_v27  ;;  %v966_v24 = vld [vmem:[%s2738_s26 + $0x798] sm:$0xff] }
 0x107   : > { %1948 = vst [vmem:[%s2753_s20 + $0x648] sm:$0xff] %v1436_v33  ;;  %v436_v33 = vld [vmem:[%s2731_s14 + $0x708] sm:$0xff]  ;;  %v1459_v38 = vadd.f32 %v947_v31, %v435_v30  ;;  %v967_v27 = vld [vmem:[%s2738_s26 + $0x7a0] sm:$0xff] }
 0x108   : > { %1949 = vst [vmem:[%s2753_s20 + $0x650] sm:$0xff] %v1437_v36  ;;  %v437_v36 = vld [vmem:[%s2731_s14 + $0x710] sm:$0xff]  ;;  %v1460_v41 = vadd.f32 %v948_v34, %v436_v33  ;;  %v968_v30 = vld [vmem:[%s2738_s26 + $0x7a8] sm:$0xff] }
 0x109   : > { %1950 = vst [vmem:[%s2753_s20 + $0x658] sm:$0xff] %v1438_v39  ;;  %v438_v39 = vld [vmem:[%s2731_s14 + $0x718] sm:$0xff]  ;;  %v1461_v44 = vadd.f32 %v949_v37, %v437_v36  ;;  %v969_v33 = vld [vmem:[%s2738_s26 + $0x7b0] sm:$0xff] }
 0x10a   : > { %1951 = vst [vmem:[%s2753_s20 + $0x660] sm:$0xff] %v1439_v42  ;;  %v439_v42 = vld [vmem:[%s2731_s14 + $0x720] sm:$0xff]  ;;  %v1462_v47 = vadd.f32 %v950_v40, %v438_v39  ;;  %v970_v36 = vld [vmem:[%s2738_s26 + $0x7b8] sm:$0xff] }
 0x10b   : > { %1952 = vst [vmem:[%s2753_s20 + $0x668] sm:$0xff] %v1440_v45  ;;  %v440_v45 = vld [vmem:[%s2731_s14 + $0x728] sm:$0xff]  ;;  %v1463_v50 = vadd.f32 %v951_v43, %v439_v42  ;;  %v971_v39 = vld [vmem:[%s2738_s26 + $0x7c0] sm:$0xff] }
 0x10c   : > { %1953 = vst [vmem:[%s2753_s20 + $0x670] sm:$0xff] %v1441_v48  ;;  %v441_v48 = vld [vmem:[%s2731_s14 + $0x730] sm:$0xff]  ;;  %v1464_v53 = vadd.f32 %v952_v46, %v440_v45  ;;  %v972_v42 = vld [vmem:[%s2738_s26 + $0x7c8] sm:$0xff] }
 0x10d   : > { %1954 = vst [vmem:[%s2753_s20 + $0x678] sm:$0xff] %v1442_v51  ;;  %v442_v51 = vld [vmem:[%s2731_s14 + $0x738] sm:$0xff]  ;;  %v1465_v56 = vadd.f32 %v953_v49, %v441_v48  ;;  %v973_v45 = vld [vmem:[%s2738_s26 + $0x7d0] sm:$0xff] }
 0x10e   : > { %1955 = vst [vmem:[%s2753_s20 + $0x680] sm:$0xff] %v1443_v54  ;;  %v443_v54 = vld [vmem:[%s2731_s14 + $0x740] sm:$0xff]  ;;  %v1466_v59 = vadd.f32 %v954_v52, %v442_v51  ;;  %v974_v48 = vld [vmem:[%s2738_s26 + $0x7d8] sm:$0xff] }
 0x10f   : > { %1956 = vst [vmem:[%s2753_s20 + $0x688] sm:$0xff] %v1444_v57  ;;  %v444_v57 = vld [vmem:[%s2731_s14 + $0x748] sm:$0xff]  ;;  %v1467_v62 = vadd.f32 %v955_v55, %v443_v54  ;;  %v975_v51 = vld [vmem:[%s2738_s26 + $0x7e0] sm:$0xff] }
 0x110   : > { %1957 = vst [vmem:[%s2753_s20 + $0x690] sm:$0xff] %v1445_v60  ;;  %v445_v60 = vld [vmem:[%s2731_s14 + $0x750] sm:$0xff]  ;;  %v1468_v1 = vadd.f32 %v956_v58, %v444_v57  ;;  %v976_v54 = vld [vmem:[%s2738_s26 + $0x7e8] sm:$0xff] }
 0x111   : > { %1958 = vst [vmem:[%s2753_s20 + $0x698] sm:$0xff] %v1446_v63  ;;  %v446_v63 = vld [vmem:[%s2731_s14 + $0x758] sm:$0xff]  ;;  %v1469_v4 = vadd.f32 %v957_v61, %v445_v60  ;;  %v977_v57 = vld [vmem:[%s2738_s26 + $0x7f0] sm:$0xff] }
 0x112   : > { %1959 = vst [vmem:[%s2753_s20 + $0x6a0] sm:$0xff] %v1447_v2  ;;  %v447_v2 = vld [vmem:[%s2731_s14 + $0x760] sm:$0xff]  ;;  %v1470_v7 = vadd.f32 %v958_v0, %v446_v63  ;;  %v978_v60 = vld [vmem:[%s2738_s26 + $0x7f8] sm:$0xff] }
 0x113   : > { %1960 = vst [vmem:[%s2753_s20 + $0x6a8] sm:$0xff] %v1448_v5  ;;  %v448_v5 = vld [vmem:[%s2731_s14 + $0x768] sm:$0xff]  ;;  %v1471_v10 = vadd.f32 %v959_v3, %v447_v2  ;;  %v979_v63 = vld [vmem:[%s2738_s26 + $0x800] sm:$0xff] }
 0x114   : > { %1961 = vst [vmem:[%s2753_s20 + $0x6b0] sm:$0xff] %v1449_v8  ;;  %v449_v8 = vld [vmem:[%s2731_s14 + $0x770] sm:$0xff]  ;;  %v1472_v13 = vadd.f32 %v960_v6, %v448_v5  ;;  %v980_v2 = vld [vmem:[%s2738_s26 + $0x808] sm:$0xff] }
 0x115   : > { %1962 = vst [vmem:[%s2753_s20 + $0x6b8] sm:$0xff] %v1450_v11  ;;  %v450_v11 = vld [vmem:[%s2731_s14 + $0x778] sm:$0xff]  ;;  %v1473_v16 = vadd.f32 %v961_v9, %v449_v8  ;;  %v981_v5 = vld [vmem:[%s2738_s26 + $0x810] sm:$0xff] }
 0x116   : > { %1963 = vst [vmem:[%s2753_s20 + $0x6c0] sm:$0xff] %v1451_v14  ;;  %v451_v14 = vld [vmem:[%s2731_s14 + $0x780] sm:$0xff]  ;;  %v1474_v19 = vadd.f32 %v962_v12, %v450_v11  ;;  %v982_v8 = vld [vmem:[%s2738_s26 + $0x818] sm:$0xff] }
 0x117   : > { %1964 = vst [vmem:[%s2753_s20 + $0x6c8] sm:$0xff] %v1452_v17  ;;  %v452_v17 = vld [vmem:[%s2731_s14 + $0x788] sm:$0xff]  ;;  %v1475_v22 = vadd.f32 %v963_v15, %v451_v14  ;;  %v983_v11 = vld [vmem:[%s2738_s26 + $0x820] sm:$0xff] }
 0x118   : > { %1965 = vst [vmem:[%s2753_s20 + $0x6d0] sm:$0xff] %v1453_v20  ;;  %v453_v20 = vld [vmem:[%s2731_s14 + $0x790] sm:$0xff]  ;;  %v1476_v25 = vadd.f32 %v964_v18, %v452_v17  ;;  %v984_v14 = vld [vmem:[%s2738_s26 + $0x828] sm:$0xff] }
 0x119   : > { %1966 = vst [vmem:[%s2753_s20 + $0x6d8] sm:$0xff] %v1454_v23  ;;  %v454_v23 = vld [vmem:[%s2731_s14 + $0x798] sm:$0xff]  ;;  %v1477_v28 = vadd.f32 %v965_v21, %v453_v20  ;;  %v985_v17 = vld [vmem:[%s2738_s26 + $0x830] sm:$0xff] }
 0x11a   : > { %1967 = vst [vmem:[%s2753_s20 + $0x6e0] sm:$0xff] %v1455_v26  ;;  %v455_v26 = vld [vmem:[%s2731_s14 + $0x7a0] sm:$0xff]  ;;  %v1478_v31 = vadd.f32 %v966_v24, %v454_v23  ;;  %v986_v20 = vld [vmem:[%s2738_s26 + $0x838] sm:$0xff] }
 0x11b   : > { %1968 = vst [vmem:[%s2753_s20 + $0x6e8] sm:$0xff] %v1456_v29  ;;  %v456_v29 = vld [vmem:[%s2731_s14 + $0x7a8] sm:$0xff]  ;;  %v1479_v34 = vadd.f32 %v967_v27, %v455_v26  ;;  %v987_v23 = vld [vmem:[%s2738_s26 + $0x840] sm:$0xff] }
 0x11c   : > { %1969 = vst [vmem:[%s2753_s20 + $0x6f0] sm:$0xff] %v1457_v32  ;;  %v457_v32 = vld [vmem:[%s2731_s14 + $0x7b0] sm:$0xff]  ;;  %v1480_v37 = vadd.f32 %v968_v30, %v456_v29  ;;  %v988_v26 = vld [vmem:[%s2738_s26 + $0x848] sm:$0xff] }
 0x11d   : > { %1970 = vst [vmem:[%s2753_s20 + $0x6f8] sm:$0xff] %v1458_v35  ;;  %v458_v35 = vld [vmem:[%s2731_s14 + $0x7b8] sm:$0xff]  ;;  %v1481_v40 = vadd.f32 %v969_v33, %v457_v32  ;;  %v989_v29 = vld [vmem:[%s2738_s26 + $0x850] sm:$0xff] }
 0x11e   : > { %1971 = vst [vmem:[%s2753_s20 + $0x700] sm:$0xff] %v1459_v38  ;;  %v459_v38 = vld [vmem:[%s2731_s14 + $0x7c0] sm:$0xff]  ;;  %v1482_v43 = vadd.f32 %v970_v36, %v458_v35  ;;  %v990_v32 = vld [vmem:[%s2738_s26 + $0x858] sm:$0xff] }
 0x11f   : > { %1972 = vst [vmem:[%s2753_s20 + $0x708] sm:$0xff] %v1460_v41  ;;  %v460_v41 = vld [vmem:[%s2731_s14 + $0x7c8] sm:$0xff]  ;;  %v1483_v46 = vadd.f32 %v971_v39, %v459_v38  ;;  %v991_v35 = vld [vmem:[%s2738_s26 + $0x860] sm:$0xff] }
 0x120   : > { %1973 = vst [vmem:[%s2753_s20 + $0x710] sm:$0xff] %v1461_v44  ;;  %v461_v44 = vld [vmem:[%s2731_s14 + $0x7d0] sm:$0xff]  ;;  %v1484_v49 = vadd.f32 %v972_v42, %v460_v41  ;;  %v992_v38 = vld [vmem:[%s2738_s26 + $0x868] sm:$0xff] }
 0x121   : > { %1974 = vst [vmem:[%s2753_s20 + $0x718] sm:$0xff] %v1462_v47  ;;  %v462_v47 = vld [vmem:[%s2731_s14 + $0x7d8] sm:$0xff]  ;;  %v1485_v52 = vadd.f32 %v973_v45, %v461_v44  ;;  %v993_v41 = vld [vmem:[%s2738_s26 + $0x870] sm:$0xff] }
 0x122   : > { %1975 = vst [vmem:[%s2753_s20 + $0x720] sm:$0xff] %v1463_v50  ;;  %v463_v50 = vld [vmem:[%s2731_s14 + $0x7e0] sm:$0xff]  ;;  %v1486_v55 = vadd.f32 %v974_v48, %v462_v47  ;;  %v994_v44 = vld [vmem:[%s2738_s26 + $0x878] sm:$0xff] }
 0x123   : > { %1976 = vst [vmem:[%s2753_s20 + $0x728] sm:$0xff] %v1464_v53  ;;  %v464_v53 = vld [vmem:[%s2731_s14 + $0x7e8] sm:$0xff]  ;;  %v1487_v58 = vadd.f32 %v975_v51, %v463_v50  ;;  %v995_v47 = vld [vmem:[%s2738_s26 + $0x880] sm:$0xff] }
 0x124   : > { %1977 = vst [vmem:[%s2753_s20 + $0x730] sm:$0xff] %v1465_v56  ;;  %v465_v56 = vld [vmem:[%s2731_s14 + $0x7f0] sm:$0xff]  ;;  %v1488_v61 = vadd.f32 %v976_v54, %v464_v53  ;;  %v996_v50 = vld [vmem:[%s2738_s26 + $0x888] sm:$0xff] }
 0x125   : > { %1978 = vst [vmem:[%s2753_s20 + $0x738] sm:$0xff] %v1466_v59  ;;  %v466_v59 = vld [vmem:[%s2731_s14 + $0x7f8] sm:$0xff]  ;;  %v1489_v0 = vadd.f32 %v977_v57, %v465_v56  ;;  %v997_v53 = vld [vmem:[%s2738_s26 + $0x890] sm:$0xff] }
 0x126   : > { %1979 = vst [vmem:[%s2753_s20 + $0x740] sm:$0xff] %v1467_v62  ;;  %v467_v62 = vld [vmem:[%s2731_s14 + $0x800] sm:$0xff]  ;;  %v1490_v3 = vadd.f32 %v978_v60, %v466_v59  ;;  %v998_v56 = vld [vmem:[%s2738_s26 + $0x898] sm:$0xff] }
 0x127   : > { %1980 = vst [vmem:[%s2753_s20 + $0x748] sm:$0xff] %v1468_v1  ;;  %v468_v1 = vld [vmem:[%s2731_s14 + $0x808] sm:$0xff]  ;;  %v1491_v6 = vadd.f32 %v979_v63, %v467_v62  ;;  %v999_v59 = vld [vmem:[%s2738_s26 + $0x8a0] sm:$0xff] }
 0x128   : > { %1981 = vst [vmem:[%s2753_s20 + $0x750] sm:$0xff] %v1469_v4  ;;  %v469_v4 = vld [vmem:[%s2731_s14 + $0x810] sm:$0xff]  ;;  %v1492_v9 = vadd.f32 %v980_v2, %v468_v1  ;;  %v1000_v62 = vld [vmem:[%s2738_s26 + $0x8a8] sm:$0xff] }
 0x129   : > { %1982 = vst [vmem:[%s2753_s20 + $0x758] sm:$0xff] %v1470_v7  ;;  %v470_v7 = vld [vmem:[%s2731_s14 + $0x818] sm:$0xff]  ;;  %v1493_v12 = vadd.f32 %v981_v5, %v469_v4  ;;  %v1001_v1 = vld [vmem:[%s2738_s26 + $0x8b0] sm:$0xff] }
 0x12a   : > { %1983 = vst [vmem:[%s2753_s20 + $0x760] sm:$0xff] %v1471_v10  ;;  %v471_v10 = vld [vmem:[%s2731_s14 + $0x820] sm:$0xff]  ;;  %v1494_v15 = vadd.f32 %v982_v8, %v470_v7  ;;  %v1002_v4 = vld [vmem:[%s2738_s26 + $0x8b8] sm:$0xff] }
 0x12b   : > { %1984 = vst [vmem:[%s2753_s20 + $0x768] sm:$0xff] %v1472_v13  ;;  %v472_v13 = vld [vmem:[%s2731_s14 + $0x828] sm:$0xff]  ;;  %v1495_v18 = vadd.f32 %v983_v11, %v471_v10  ;;  %v1003_v7 = vld [vmem:[%s2738_s26 + $0x8c0] sm:$0xff] }
 0x12c   : > { %1985 = vst [vmem:[%s2753_s20 + $0x770] sm:$0xff] %v1473_v16  ;;  %v473_v16 = vld [vmem:[%s2731_s14 + $0x830] sm:$0xff]  ;;  %v1496_v21 = vadd.f32 %v984_v14, %v472_v13  ;;  %v1004_v10 = vld [vmem:[%s2738_s26 + $0x8c8] sm:$0xff] }
 0x12d   : > { %1986 = vst [vmem:[%s2753_s20 + $0x778] sm:$0xff] %v1474_v19  ;;  %v474_v19 = vld [vmem:[%s2731_s14 + $0x838] sm:$0xff]  ;;  %v1497_v24 = vadd.f32 %v985_v17, %v473_v16  ;;  %v1005_v13 = vld [vmem:[%s2738_s26 + $0x8d0] sm:$0xff] }
 0x12e   : > { %1987 = vst [vmem:[%s2753_s20 + $0x780] sm:$0xff] %v1475_v22  ;;  %v475_v22 = vld [vmem:[%s2731_s14 + $0x840] sm:$0xff]  ;;  %v1498_v27 = vadd.f32 %v986_v20, %v474_v19  ;;  %v1006_v16 = vld [vmem:[%s2738_s26 + $0x8d8] sm:$0xff] }
 0x12f   : > { %1988 = vst [vmem:[%s2753_s20 + $0x788] sm:$0xff] %v1476_v25  ;;  %v476_v25 = vld [vmem:[%s2731_s14 + $0x848] sm:$0xff]  ;;  %v1499_v30 = vadd.f32 %v987_v23, %v475_v22  ;;  %v1007_v19 = vld [vmem:[%s2738_s26 + $0x8e0] sm:$0xff] }
 0x130   : > { %1989 = vst [vmem:[%s2753_s20 + $0x790] sm:$0xff] %v1477_v28  ;;  %v477_v28 = vld [vmem:[%s2731_s14 + $0x850] sm:$0xff]  ;;  %v1500_v33 = vadd.f32 %v988_v26, %v476_v25  ;;  %v1008_v22 = vld [vmem:[%s2738_s26 + $0x8e8] sm:$0xff] }
 0x131   : > { %1990 = vst [vmem:[%s2753_s20 + $0x798] sm:$0xff] %v1478_v31  ;;  %v478_v31 = vld [vmem:[%s2731_s14 + $0x858] sm:$0xff]  ;;  %v1501_v36 = vadd.f32 %v989_v29, %v477_v28  ;;  %v1009_v25 = vld [vmem:[%s2738_s26 + $0x8f0] sm:$0xff] }
 0x132   : > { %1991 = vst [vmem:[%s2753_s20 + $0x7a0] sm:$0xff] %v1479_v34  ;;  %v479_v34 = vld [vmem:[%s2731_s14 + $0x860] sm:$0xff]  ;;  %v1502_v39 = vadd.f32 %v990_v32, %v478_v31  ;;  %v1010_v28 = vld [vmem:[%s2738_s26 + $0x8f8] sm:$0xff] }
 0x133   : > { %1992 = vst [vmem:[%s2753_s20 + $0x7a8] sm:$0xff] %v1480_v37  ;;  %v480_v37 = vld [vmem:[%s2731_s14 + $0x868] sm:$0xff]  ;;  %v1503_v42 = vadd.f32 %v991_v35, %v479_v34  ;;  %v1011_v31 = vld [vmem:[%s2738_s26 + $0x900] sm:$0xff] }
 0x134   : > { %1993 = vst [vmem:[%s2753_s20 + $0x7b0] sm:$0xff] %v1481_v40  ;;  %v481_v40 = vld [vmem:[%s2731_s14 + $0x870] sm:$0xff]  ;;  %v1504_v45 = vadd.f32 %v992_v38, %v480_v37  ;;  %v1012_v34 = vld [vmem:[%s2738_s26 + $0x908] sm:$0xff] }
 0x135   : > { %1994 = vst [vmem:[%s2753_s20 + $0x7b8] sm:$0xff] %v1482_v43  ;;  %v482_v43 = vld [vmem:[%s2731_s14 + $0x878] sm:$0xff]  ;;  %v1505_v48 = vadd.f32 %v993_v41, %v481_v40  ;;  %v1013_v37 = vld [vmem:[%s2738_s26 + $0x910] sm:$0xff] }
 0x136   : > { %1995 = vst [vmem:[%s2753_s20 + $0x7c0] sm:$0xff] %v1483_v46  ;;  %v483_v46 = vld [vmem:[%s2731_s14 + $0x880] sm:$0xff]  ;;  %v1506_v51 = vadd.f32 %v994_v44, %v482_v43  ;;  %v1014_v40 = vld [vmem:[%s2738_s26 + $0x918] sm:$0xff] }
 0x137   : > { %1996 = vst [vmem:[%s2753_s20 + $0x7c8] sm:$0xff] %v1484_v49  ;;  %v484_v49 = vld [vmem:[%s2731_s14 + $0x888] sm:$0xff]  ;;  %v1507_v54 = vadd.f32 %v995_v47, %v483_v46  ;;  %v1015_v43 = vld [vmem:[%s2738_s26 + $0x920] sm:$0xff] }
 0x138   : > { %1997 = vst [vmem:[%s2753_s20 + $0x7d0] sm:$0xff] %v1485_v52  ;;  %v485_v52 = vld [vmem:[%s2731_s14 + $0x890] sm:$0xff]  ;;  %v1508_v57 = vadd.f32 %v996_v50, %v484_v49  ;;  %v1016_v46 = vld [vmem:[%s2738_s26 + $0x928] sm:$0xff] }
 0x139   : > { %1998 = vst [vmem:[%s2753_s20 + $0x7d8] sm:$0xff] %v1486_v55  ;;  %v486_v55 = vld [vmem:[%s2731_s14 + $0x898] sm:$0xff]  ;;  %v1509_v60 = vadd.f32 %v997_v53, %v485_v52  ;;  %v1017_v49 = vld [vmem:[%s2738_s26 + $0x930] sm:$0xff] }
 0x13a   : > { %1999 = vst [vmem:[%s2753_s20 + $0x7e0] sm:$0xff] %v1487_v58  ;;  %v487_v58 = vld [vmem:[%s2731_s14 + $0x8a0] sm:$0xff]  ;;  %v1510_v63 = vadd.f32 %v998_v56, %v486_v55  ;;  %v1018_v52 = vld [vmem:[%s2738_s26 + $0x938] sm:$0xff] }
 0x13b   : > { %2000 = vst [vmem:[%s2753_s20 + $0x7e8] sm:$0xff] %v1488_v61  ;;  %v488_v61 = vld [vmem:[%s2731_s14 + $0x8a8] sm:$0xff]  ;;  %v1511_v2 = vadd.f32 %v999_v59, %v487_v58  ;;  %v1019_v55 = vld [vmem:[%s2738_s26 + $0x940] sm:$0xff] }
 0x13c   : > { %2001 = vst [vmem:[%s2753_s20 + $0x7f0] sm:$0xff] %v1489_v0  ;;  %v489_v0 = vld [vmem:[%s2731_s14 + $0x8b0] sm:$0xff]  ;;  %v1512_v5 = vadd.f32 %v1000_v62, %v488_v61  ;;  %v1020_v58 = vld [vmem:[%s2738_s26 + $0x948] sm:$0xff] }
 0x13d   : > { %2002 = vst [vmem:[%s2753_s20 + $0x7f8] sm:$0xff] %v1490_v3  ;;  %v490_v3 = vld [vmem:[%s2731_s14 + $0x8b8] sm:$0xff]  ;;  %v1513_v8 = vadd.f32 %v1001_v1, %v489_v0  ;;  %v1021_v61 = vld [vmem:[%s2738_s26 + $0x950] sm:$0xff] }
 0x13e   : > { %2003 = vst [vmem:[%s2753_s20 + $0x800] sm:$0xff] %v1491_v6  ;;  %v491_v6 = vld [vmem:[%s2731_s14 + $0x8c0] sm:$0xff]  ;;  %v1514_v11 = vadd.f32 %v1002_v4, %v490_v3  ;;  %v1022_v0 = vld [vmem:[%s2738_s26 + $0x958] sm:$0xff] }
 0x13f   : > { %2004 = vst [vmem:[%s2753_s20 + $0x808] sm:$0xff] %v1492_v9  ;;  %v492_v9 = vld [vmem:[%s2731_s14 + $0x8c8] sm:$0xff]  ;;  %v1515_v14 = vadd.f32 %v1003_v7, %v491_v6  ;;  %v1023_v3 = vld [vmem:[%s2738_s26 + $0x960] sm:$0xff] }
 0x140   : > { %2005 = vst [vmem:[%s2753_s20 + $0x810] sm:$0xff] %v1493_v12  ;;  %v493_v12 = vld [vmem:[%s2731_s14 + $0x8d0] sm:$0xff]  ;;  %v1516_v17 = vadd.f32 %v1004_v10, %v492_v9  ;;  %v1024_v6 = vld [vmem:[%s2738_s26 + $0x968] sm:$0xff] }
 0x141   : > { %2006 = vst [vmem:[%s2753_s20 + $0x818] sm:$0xff] %v1494_v15  ;;  %v494_v15 = vld [vmem:[%s2731_s14 + $0x8d8] sm:$0xff]  ;;  %v1517_v20 = vadd.f32 %v1005_v13, %v493_v12  ;;  %v1025_v9 = vld [vmem:[%s2738_s26 + $0x970] sm:$0xff] }
 0x142   : > { %2007 = vst [vmem:[%s2753_s20 + $0x820] sm:$0xff] %v1495_v18  ;;  %v495_v18 = vld [vmem:[%s2731_s14 + $0x8e0] sm:$0xff]  ;;  %v1518_v23 = vadd.f32 %v1006_v16, %v494_v15  ;;  %v1026_v12 = vld [vmem:[%s2738_s26 + $0x978] sm:$0xff] }
 0x143   : > { %2008 = vst [vmem:[%s2753_s20 + $0x828] sm:$0xff] %v1496_v21  ;;  %v496_v21 = vld [vmem:[%s2731_s14 + $0x8e8] sm:$0xff]  ;;  %v1519_v26 = vadd.f32 %v1007_v19, %v495_v18  ;;  %v1027_v15 = vld [vmem:[%s2738_s26 + $0x980] sm:$0xff] }
 0x144   : > { %2009 = vst [vmem:[%s2753_s20 + $0x830] sm:$0xff] %v1497_v24  ;;  %v497_v24 = vld [vmem:[%s2731_s14 + $0x8f0] sm:$0xff]  ;;  %v1520_v29 = vadd.f32 %v1008_v22, %v496_v21  ;;  %v1028_v18 = vld [vmem:[%s2738_s26 + $0x988] sm:$0xff] }
 0x145   : > { %2010 = vst [vmem:[%s2753_s20 + $0x838] sm:$0xff] %v1498_v27  ;;  %v498_v27 = vld [vmem:[%s2731_s14 + $0x8f8] sm:$0xff]  ;;  %v1521_v32 = vadd.f32 %v1009_v25, %v497_v24  ;;  %v1029_v21 = vld [vmem:[%s2738_s26 + $0x990] sm:$0xff] }
 0x146   : > { %2011 = vst [vmem:[%s2753_s20 + $0x840] sm:$0xff] %v1499_v30  ;;  %v499_v30 = vld [vmem:[%s2731_s14 + $0x900] sm:$0xff]  ;;  %v1522_v35 = vadd.f32 %v1010_v28, %v498_v27  ;;  %v1030_v24 = vld [vmem:[%s2738_s26 + $0x998] sm:$0xff] }
 0x147   : > { %2012 = vst [vmem:[%s2753_s20 + $0x848] sm:$0xff] %v1500_v33  ;;  %v500_v33 = vld [vmem:[%s2731_s14 + $0x908] sm:$0xff]  ;;  %v1523_v38 = vadd.f32 %v1011_v31, %v499_v30  ;;  %v1031_v27 = vld [vmem:[%s2738_s26 + $0x9a0] sm:$0xff] }
 0x148   : > { %2013 = vst [vmem:[%s2753_s20 + $0x850] sm:$0xff] %v1501_v36  ;;  %v501_v36 = vld [vmem:[%s2731_s14 + $0x910] sm:$0xff]  ;;  %v1524_v41 = vadd.f32 %v1012_v34, %v500_v33  ;;  %v1032_v30 = vld [vmem:[%s2738_s26 + $0x9a8] sm:$0xff] }
 0x149   : > { %2014 = vst [vmem:[%s2753_s20 + $0x858] sm:$0xff] %v1502_v39  ;;  %v502_v39 = vld [vmem:[%s2731_s14 + $0x918] sm:$0xff]  ;;  %v1525_v44 = vadd.f32 %v1013_v37, %v501_v36  ;;  %v1033_v33 = vld [vmem:[%s2738_s26 + $0x9b0] sm:$0xff] }
 0x14a   : > { %2015 = vst [vmem:[%s2753_s20 + $0x860] sm:$0xff] %v1503_v42  ;;  %v503_v42 = vld [vmem:[%s2731_s14 + $0x920] sm:$0xff]  ;;  %v1526_v47 = vadd.f32 %v1014_v40, %v502_v39  ;;  %v1034_v36 = vld [vmem:[%s2738_s26 + $0x9b8] sm:$0xff] }
 0x14b   : > { %2016 = vst [vmem:[%s2753_s20 + $0x868] sm:$0xff] %v1504_v45  ;;  %v504_v45 = vld [vmem:[%s2731_s14 + $0x928] sm:$0xff]  ;;  %v1527_v50 = vadd.f32 %v1015_v43, %v503_v42  ;;  %v1035_v39 = vld [vmem:[%s2738_s26 + $0x9c0] sm:$0xff] }
 0x14c   : > { %2017 = vst [vmem:[%s2753_s20 + $0x870] sm:$0xff] %v1505_v48  ;;  %v505_v48 = vld [vmem:[%s2731_s14 + $0x930] sm:$0xff]  ;;  %v1528_v53 = vadd.f32 %v1016_v46, %v504_v45  ;;  %v1036_v42 = vld [vmem:[%s2738_s26 + $0x9c8] sm:$0xff] }
 0x14d   : > { %2018 = vst [vmem:[%s2753_s20 + $0x878] sm:$0xff] %v1506_v51  ;;  %v506_v51 = vld [vmem:[%s2731_s14 + $0x938] sm:$0xff]  ;;  %v1529_v56 = vadd.f32 %v1017_v49, %v505_v48  ;;  %v1037_v45 = vld [vmem:[%s2738_s26 + $0x9d0] sm:$0xff] }
 0x14e   : > { %2019 = vst [vmem:[%s2753_s20 + $0x880] sm:$0xff] %v1507_v54  ;;  %v507_v54 = vld [vmem:[%s2731_s14 + $0x940] sm:$0xff]  ;;  %v1530_v59 = vadd.f32 %v1018_v52, %v506_v51  ;;  %v1038_v48 = vld [vmem:[%s2738_s26 + $0x9d8] sm:$0xff] }
 0x14f   : > { %2020 = vst [vmem:[%s2753_s20 + $0x888] sm:$0xff] %v1508_v57  ;;  %v508_v57 = vld [vmem:[%s2731_s14 + $0x948] sm:$0xff]  ;;  %v1531_v62 = vadd.f32 %v1019_v55, %v507_v54  ;;  %v1039_v51 = vld [vmem:[%s2738_s26 + $0x9e0] sm:$0xff] }
 0x150   : > { %2021 = vst [vmem:[%s2753_s20 + $0x890] sm:$0xff] %v1509_v60  ;;  %v509_v60 = vld [vmem:[%s2731_s14 + $0x950] sm:$0xff]  ;;  %v1532_v1 = vadd.f32 %v1020_v58, %v508_v57  ;;  %v1040_v54 = vld [vmem:[%s2738_s26 + $0x9e8] sm:$0xff] }
 0x151   : > { %2022 = vst [vmem:[%s2753_s20 + $0x898] sm:$0xff] %v1510_v63  ;;  %v510_v63 = vld [vmem:[%s2731_s14 + $0x958] sm:$0xff]  ;;  %v1533_v4 = vadd.f32 %v1021_v61, %v509_v60  ;;  %v1041_v57 = vld [vmem:[%s2738_s26 + $0x9f0] sm:$0xff] }
 0x152   : > { %2023 = vst [vmem:[%s2753_s20 + $0x8a0] sm:$0xff] %v1511_v2  ;;  %v511_v2 = vld [vmem:[%s2731_s14 + $0x960] sm:$0xff]  ;;  %v1534_v7 = vadd.f32 %v1022_v0, %v510_v63  ;;  %v1042_v60 = vld [vmem:[%s2738_s26 + $0x9f8] sm:$0xff] }
 0x153   : > { %2024 = vst [vmem:[%s2753_s20 + $0x8a8] sm:$0xff] %v1512_v5  ;;  %v512_v5 = vld [vmem:[%s2731_s14 + $0x968] sm:$0xff]  ;;  %v1535_v10 = vadd.f32 %v1023_v3, %v511_v2  ;;  %v1043_v63 = vld [vmem:[%s2738_s26 + $0xa00] sm:$0xff] }
 0x154   : > { %2025 = vst [vmem:[%s2753_s20 + $0x8b0] sm:$0xff] %v1513_v8  ;;  %v513_v8 = vld [vmem:[%s2731_s14 + $0x970] sm:$0xff]  ;;  %v1536_v13 = vadd.f32 %v1024_v6, %v512_v5  ;;  %v1044_v2 = vld [vmem:[%s2738_s26 + $0xa08] sm:$0xff] }
 0x155   : > { %2026 = vst [vmem:[%s2753_s20 + $0x8b8] sm:$0xff] %v1514_v11  ;;  %v514_v11 = vld [vmem:[%s2731_s14 + $0x978] sm:$0xff]  ;;  %v1537_v16 = vadd.f32 %v1025_v9, %v513_v8  ;;  %v1045_v5 = vld [vmem:[%s2738_s26 + $0xa10] sm:$0xff] }
 0x156   : > { %2027 = vst [vmem:[%s2753_s20 + $0x8c0] sm:$0xff] %v1515_v14  ;;  %v515_v14 = vld [vmem:[%s2731_s14 + $0x980] sm:$0xff]  ;;  %v1538_v19 = vadd.f32 %v1026_v12, %v514_v11  ;;  %v1046_v8 = vld [vmem:[%s2738_s26 + $0xa18] sm:$0xff] }
 0x157   : > { %2028 = vst [vmem:[%s2753_s20 + $0x8c8] sm:$0xff] %v1516_v17  ;;  %v516_v17 = vld [vmem:[%s2731_s14 + $0x988] sm:$0xff]  ;;  %v1539_v22 = vadd.f32 %v1027_v15, %v515_v14  ;;  %v1047_v11 = vld [vmem:[%s2738_s26 + $0xa20] sm:$0xff] }
 0x158   : > { %2029 = vst [vmem:[%s2753_s20 + $0x8d0] sm:$0xff] %v1517_v20  ;;  %v517_v20 = vld [vmem:[%s2731_s14 + $0x990] sm:$0xff]  ;;  %v1540_v25 = vadd.f32 %v1028_v18, %v516_v17  ;;  %v1048_v14 = vld [vmem:[%s2738_s26 + $0xa28] sm:$0xff] }
 0x159   : > { %2030 = vst [vmem:[%s2753_s20 + $0x8d8] sm:$0xff] %v1518_v23  ;;  %v518_v23 = vld [vmem:[%s2731_s14 + $0x998] sm:$0xff]  ;;  %v1541_v28 = vadd.f32 %v1029_v21, %v517_v20  ;;  %v1049_v17 = vld [vmem:[%s2738_s26 + $0xa30] sm:$0xff] }
 0x15a   : > { %2031 = vst [vmem:[%s2753_s20 + $0x8e0] sm:$0xff] %v1519_v26  ;;  %v519_v26 = vld [vmem:[%s2731_s14 + $0x9a0] sm:$0xff]  ;;  %v1542_v31 = vadd.f32 %v1030_v24, %v518_v23  ;;  %v1050_v20 = vld [vmem:[%s2738_s26 + $0xa38] sm:$0xff] }
 0x15b   : > { %2032 = vst [vmem:[%s2753_s20 + $0x8e8] sm:$0xff] %v1520_v29  ;;  %v520_v29 = vld [vmem:[%s2731_s14 + $0x9a8] sm:$0xff]  ;;  %v1543_v34 = vadd.f32 %v1031_v27, %v519_v26  ;;  %v1051_v23 = vld [vmem:[%s2738_s26 + $0xa40] sm:$0xff] }
 0x15c   : > { %2033 = vst [vmem:[%s2753_s20 + $0x8f0] sm:$0xff] %v1521_v32  ;;  %v521_v32 = vld [vmem:[%s2731_s14 + $0x9b0] sm:$0xff]  ;;  %v1544_v37 = vadd.f32 %v1032_v30, %v520_v29  ;;  %v1052_v26 = vld [vmem:[%s2738_s26 + $0xa48] sm:$0xff] }
 0x15d   : > { %2034 = vst [vmem:[%s2753_s20 + $0x8f8] sm:$0xff] %v1522_v35  ;;  %v522_v35 = vld [vmem:[%s2731_s14 + $0x9b8] sm:$0xff]  ;;  %v1545_v40 = vadd.f32 %v1033_v33, %v521_v32  ;;  %v1053_v29 = vld [vmem:[%s2738_s26 + $0xa50] sm:$0xff] }
 0x15e   : > { %2035 = vst [vmem:[%s2753_s20 + $0x900] sm:$0xff] %v1523_v38  ;;  %v523_v38 = vld [vmem:[%s2731_s14 + $0x9c0] sm:$0xff]  ;;  %v1546_v43 = vadd.f32 %v1034_v36, %v522_v35  ;;  %v1054_v32 = vld [vmem:[%s2738_s26 + $0xa58] sm:$0xff] }
 0x15f   : > { %2036 = vst [vmem:[%s2753_s20 + $0x908] sm:$0xff] %v1524_v41  ;;  %v524_v41 = vld [vmem:[%s2731_s14 + $0x9c8] sm:$0xff]  ;;  %v1547_v46 = vadd.f32 %v1035_v39, %v523_v38  ;;  %v1055_v35 = vld [vmem:[%s2738_s26 + $0xa60] sm:$0xff] }
 0x160   : > { %2037 = vst [vmem:[%s2753_s20 + $0x910] sm:$0xff] %v1525_v44  ;;  %v525_v44 = vld [vmem:[%s2731_s14 + $0x9d0] sm:$0xff]  ;;  %v1548_v49 = vadd.f32 %v1036_v42, %v524_v41  ;;  %v1056_v38 = vld [vmem:[%s2738_s26 + $0xa68] sm:$0xff] }
 0x161   : > { %2038 = vst [vmem:[%s2753_s20 + $0x918] sm:$0xff] %v1526_v47  ;;  %v526_v47 = vld [vmem:[%s2731_s14 + $0x9d8] sm:$0xff]  ;;  %v1549_v52 = vadd.f32 %v1037_v45, %v525_v44  ;;  %v1057_v41 = vld [vmem:[%s2738_s26 + $0xa70] sm:$0xff] }
 0x162   : > { %2039 = vst [vmem:[%s2753_s20 + $0x920] sm:$0xff] %v1527_v50  ;;  %v527_v50 = vld [vmem:[%s2731_s14 + $0x9e0] sm:$0xff]  ;;  %v1550_v55 = vadd.f32 %v1038_v48, %v526_v47  ;;  %v1058_v44 = vld [vmem:[%s2738_s26 + $0xa78] sm:$0xff] }
 0x163   : > { %2040 = vst [vmem:[%s2753_s20 + $0x928] sm:$0xff] %v1528_v53  ;;  %v528_v53 = vld [vmem:[%s2731_s14 + $0x9e8] sm:$0xff]  ;;  %v1551_v58 = vadd.f32 %v1039_v51, %v527_v50  ;;  %v1059_v47 = vld [vmem:[%s2738_s26 + $0xa80] sm:$0xff] }
 0x164   : > { %2041 = vst [vmem:[%s2753_s20 + $0x930] sm:$0xff] %v1529_v56  ;;  %v529_v56 = vld [vmem:[%s2731_s14 + $0x9f0] sm:$0xff]  ;;  %v1552_v61 = vadd.f32 %v1040_v54, %v528_v53  ;;  %v1060_v50 = vld [vmem:[%s2738_s26 + $0xa88] sm:$0xff] }
 0x165   : > { %2042 = vst [vmem:[%s2753_s20 + $0x938] sm:$0xff] %v1530_v59  ;;  %v530_v59 = vld [vmem:[%s2731_s14 + $0x9f8] sm:$0xff]  ;;  %v1553_v0 = vadd.f32 %v1041_v57, %v529_v56  ;;  %v1061_v53 = vld [vmem:[%s2738_s26 + $0xa90] sm:$0xff] }
 0x166   : > { %2043 = vst [vmem:[%s2753_s20 + $0x940] sm:$0xff] %v1531_v62  ;;  %v531_v62 = vld [vmem:[%s2731_s14 + $0xa00] sm:$0xff]  ;;  %v1554_v3 = vadd.f32 %v1042_v60, %v530_v59  ;;  %v1062_v56 = vld [vmem:[%s2738_s26 + $0xa98] sm:$0xff] }
 0x167   : > { %2044 = vst [vmem:[%s2753_s20 + $0x948] sm:$0xff] %v1532_v1  ;;  %v532_v1 = vld [vmem:[%s2731_s14 + $0xa08] sm:$0xff]  ;;  %v1555_v6 = vadd.f32 %v1043_v63, %v531_v62  ;;  %v1063_v59 = vld [vmem:[%s2738_s26 + $0xaa0] sm:$0xff] }
 0x168   : > { %2045 = vst [vmem:[%s2753_s20 + $0x950] sm:$0xff] %v1533_v4  ;;  %v533_v4 = vld [vmem:[%s2731_s14 + $0xa10] sm:$0xff]  ;;  %v1556_v9 = vadd.f32 %v1044_v2, %v532_v1  ;;  %v1064_v62 = vld [vmem:[%s2738_s26 + $0xaa8] sm:$0xff] }
 0x169   : > { %2046 = vst [vmem:[%s2753_s20 + $0x958] sm:$0xff] %v1534_v7  ;;  %v534_v7 = vld [vmem:[%s2731_s14 + $0xa18] sm:$0xff]  ;;  %v1557_v12 = vadd.f32 %v1045_v5, %v533_v4  ;;  %v1065_v1 = vld [vmem:[%s2738_s26 + $0xab0] sm:$0xff] }
 0x16a   : > { %2047 = vst [vmem:[%s2753_s20 + $0x960] sm:$0xff] %v1535_v10  ;;  %v535_v10 = vld [vmem:[%s2731_s14 + $0xa20] sm:$0xff]  ;;  %v1558_v15 = vadd.f32 %v1046_v8, %v534_v7  ;;  %v1066_v4 = vld [vmem:[%s2738_s26 + $0xab8] sm:$0xff] }
 0x16b   : > { %2048 = vst [vmem:[%s2753_s20 + $0x968] sm:$0xff] %v1536_v13  ;;  %v536_v13 = vld [vmem:[%s2731_s14 + $0xa28] sm:$0xff]  ;;  %v1559_v18 = vadd.f32 %v1047_v11, %v535_v10  ;;  %v1067_v7 = vld [vmem:[%s2738_s26 + $0xac0] sm:$0xff] }
 0x16c   : > { %2049 = vst [vmem:[%s2753_s20 + $0x970] sm:$0xff] %v1537_v16  ;;  %v537_v16 = vld [vmem:[%s2731_s14 + $0xa30] sm:$0xff]  ;;  %v1560_v21 = vadd.f32 %v1048_v14, %v536_v13  ;;  %v1068_v10 = vld [vmem:[%s2738_s26 + $0xac8] sm:$0xff] }
 0x16d   : > { %2050 = vst [vmem:[%s2753_s20 + $0x978] sm:$0xff] %v1538_v19  ;;  %v538_v19 = vld [vmem:[%s2731_s14 + $0xa38] sm:$0xff]  ;;  %v1561_v24 = vadd.f32 %v1049_v17, %v537_v16  ;;  %v1069_v13 = vld [vmem:[%s2738_s26 + $0xad0] sm:$0xff] }
 0x16e   : > { %2051 = vst [vmem:[%s2753_s20 + $0x980] sm:$0xff] %v1539_v22  ;;  %v539_v22 = vld [vmem:[%s2731_s14 + $0xa40] sm:$0xff]  ;;  %v1562_v27 = vadd.f32 %v1050_v20, %v538_v19  ;;  %v1070_v16 = vld [vmem:[%s2738_s26 + $0xad8] sm:$0xff] }
 0x16f   : > { %2052 = vst [vmem:[%s2753_s20 + $0x988] sm:$0xff] %v1540_v25  ;;  %v540_v25 = vld [vmem:[%s2731_s14 + $0xa48] sm:$0xff]  ;;  %v1563_v30 = vadd.f32 %v1051_v23, %v539_v22  ;;  %v1071_v19 = vld [vmem:[%s2738_s26 + $0xae0] sm:$0xff] }
 0x170   : > { %2053 = vst [vmem:[%s2753_s20 + $0x990] sm:$0xff] %v1541_v28  ;;  %v541_v28 = vld [vmem:[%s2731_s14 + $0xa50] sm:$0xff]  ;;  %v1564_v33 = vadd.f32 %v1052_v26, %v540_v25  ;;  %v1072_v22 = vld [vmem:[%s2738_s26 + $0xae8] sm:$0xff] }
 0x171   : > { %2054 = vst [vmem:[%s2753_s20 + $0x998] sm:$0xff] %v1542_v31  ;;  %v542_v31 = vld [vmem:[%s2731_s14 + $0xa58] sm:$0xff]  ;;  %v1565_v36 = vadd.f32 %v1053_v29, %v541_v28  ;;  %v1073_v25 = vld [vmem:[%s2738_s26 + $0xaf0] sm:$0xff] }
 0x172   : > { %2055 = vst [vmem:[%s2753_s20 + $0x9a0] sm:$0xff] %v1543_v34  ;;  %v543_v34 = vld [vmem:[%s2731_s14 + $0xa60] sm:$0xff]  ;;  %v1566_v39 = vadd.f32 %v1054_v32, %v542_v31  ;;  %v1074_v28 = vld [vmem:[%s2738_s26 + $0xaf8] sm:$0xff] }
 0x173   : > { %2056 = vst [vmem:[%s2753_s20 + $0x9a8] sm:$0xff] %v1544_v37  ;;  %v544_v37 = vld [vmem:[%s2731_s14 + $0xa68] sm:$0xff]  ;;  %v1567_v42 = vadd.f32 %v1055_v35, %v543_v34  ;;  %v1075_v31 = vld [vmem:[%s2738_s26 + $0xb00] sm:$0xff] }
 0x174   : > { %2057 = vst [vmem:[%s2753_s20 + $0x9b0] sm:$0xff] %v1545_v40  ;;  %v545_v40 = vld [vmem:[%s2731_s14 + $0xa70] sm:$0xff]  ;;  %v1568_v45 = vadd.f32 %v1056_v38, %v544_v37  ;;  %v1076_v34 = vld [vmem:[%s2738_s26 + $0xb08] sm:$0xff] }
 0x175   : > { %2058 = vst [vmem:[%s2753_s20 + $0x9b8] sm:$0xff] %v1546_v43  ;;  %v546_v43 = vld [vmem:[%s2731_s14 + $0xa78] sm:$0xff]  ;;  %v1569_v48 = vadd.f32 %v1057_v41, %v545_v40  ;;  %v1077_v37 = vld [vmem:[%s2738_s26 + $0xb10] sm:$0xff] }
 0x176   : > { %2059 = vst [vmem:[%s2753_s20 + $0x9c0] sm:$0xff] %v1547_v46  ;;  %v547_v46 = vld [vmem:[%s2731_s14 + $0xa80] sm:$0xff]  ;;  %v1570_v51 = vadd.f32 %v1058_v44, %v546_v43  ;;  %v1078_v40 = vld [vmem:[%s2738_s26 + $0xb18] sm:$0xff] }
 0x177   : > { %2060 = vst [vmem:[%s2753_s20 + $0x9c8] sm:$0xff] %v1548_v49  ;;  %v548_v49 = vld [vmem:[%s2731_s14 + $0xa88] sm:$0xff]  ;;  %v1571_v54 = vadd.f32 %v1059_v47, %v547_v46  ;;  %v1079_v43 = vld [vmem:[%s2738_s26 + $0xb20] sm:$0xff] }
 0x178   : > { %2061 = vst [vmem:[%s2753_s20 + $0x9d0] sm:$0xff] %v1549_v52  ;;  %v549_v52 = vld [vmem:[%s2731_s14 + $0xa90] sm:$0xff]  ;;  %v1572_v57 = vadd.f32 %v1060_v50, %v548_v49  ;;  %v1080_v46 = vld [vmem:[%s2738_s26 + $0xb28] sm:$0xff] }
 0x179   : > { %2062 = vst [vmem:[%s2753_s20 + $0x9d8] sm:$0xff] %v1550_v55  ;;  %v550_v55 = vld [vmem:[%s2731_s14 + $0xa98] sm:$0xff]  ;;  %v1573_v60 = vadd.f32 %v1061_v53, %v549_v52  ;;  %v1081_v49 = vld [vmem:[%s2738_s26 + $0xb30] sm:$0xff] }
 0x17a   : > { %2063 = vst [vmem:[%s2753_s20 + $0x9e0] sm:$0xff] %v1551_v58  ;;  %v551_v58 = vld [vmem:[%s2731_s14 + $0xaa0] sm:$0xff]  ;;  %v1574_v63 = vadd.f32 %v1062_v56, %v550_v55  ;;  %v1082_v52 = vld [vmem:[%s2738_s26 + $0xb38] sm:$0xff] }
 0x17b   : > { %2064 = vst [vmem:[%s2753_s20 + $0x9e8] sm:$0xff] %v1552_v61  ;;  %v552_v61 = vld [vmem:[%s2731_s14 + $0xaa8] sm:$0xff]  ;;  %v1575_v2 = vadd.f32 %v1063_v59, %v551_v58  ;;  %v1083_v55 = vld [vmem:[%s2738_s26 + $0xb40] sm:$0xff] }
 0x17c   : > { %2065 = vst [vmem:[%s2753_s20 + $0x9f0] sm:$0xff] %v1553_v0  ;;  %v553_v0 = vld [vmem:[%s2731_s14 + $0xab0] sm:$0xff]  ;;  %v1576_v5 = vadd.f32 %v1064_v62, %v552_v61  ;;  %v1084_v58 = vld [vmem:[%s2738_s26 + $0xb48] sm:$0xff] }
 0x17d   : > { %2066 = vst [vmem:[%s2753_s20 + $0x9f8] sm:$0xff] %v1554_v3  ;;  %v554_v3 = vld [vmem:[%s2731_s14 + $0xab8] sm:$0xff]  ;;  %v1577_v8 = vadd.f32 %v1065_v1, %v553_v0  ;;  %v1085_v61 = vld [vmem:[%s2738_s26 + $0xb50] sm:$0xff] }
 0x17e   : > { %2067 = vst [vmem:[%s2753_s20 + $0xa00] sm:$0xff] %v1555_v6  ;;  %v555_v6 = vld [vmem:[%s2731_s14 + $0xac0] sm:$0xff]  ;;  %v1578_v11 = vadd.f32 %v1066_v4, %v554_v3  ;;  %v1086_v0 = vld [vmem:[%s2738_s26 + $0xb58] sm:$0xff] }
 0x17f   : > { %2068 = vst [vmem:[%s2753_s20 + $0xa08] sm:$0xff] %v1556_v9  ;;  %v556_v9 = vld [vmem:[%s2731_s14 + $0xac8] sm:$0xff]  ;;  %v1579_v14 = vadd.f32 %v1067_v7, %v555_v6  ;;  %v1087_v3 = vld [vmem:[%s2738_s26 + $0xb60] sm:$0xff] }
 0x180   : > { %2069 = vst [vmem:[%s2753_s20 + $0xa10] sm:$0xff] %v1557_v12  ;;  %v557_v12 = vld [vmem:[%s2731_s14 + $0xad0] sm:$0xff]  ;;  %v1580_v17 = vadd.f32 %v1068_v10, %v556_v9  ;;  %v1088_v6 = vld [vmem:[%s2738_s26 + $0xb68] sm:$0xff] }
 0x181   : > { %2070 = vst [vmem:[%s2753_s20 + $0xa18] sm:$0xff] %v1558_v15  ;;  %v558_v15 = vld [vmem:[%s2731_s14 + $0xad8] sm:$0xff]  ;;  %v1581_v20 = vadd.f32 %v1069_v13, %v557_v12  ;;  %v1089_v9 = vld [vmem:[%s2738_s26 + $0xb70] sm:$0xff] }
 0x182   : > { %2071 = vst [vmem:[%s2753_s20 + $0xa20] sm:$0xff] %v1559_v18  ;;  %v559_v18 = vld [vmem:[%s2731_s14 + $0xae0] sm:$0xff]  ;;  %v1582_v23 = vadd.f32 %v1070_v16, %v558_v15  ;;  %v1090_v12 = vld [vmem:[%s2738_s26 + $0xb78] sm:$0xff] }
 0x183   : > { %2072 = vst [vmem:[%s2753_s20 + $0xa28] sm:$0xff] %v1560_v21  ;;  %v560_v21 = vld [vmem:[%s2731_s14 + $0xae8] sm:$0xff]  ;;  %v1583_v26 = vadd.f32 %v1071_v19, %v559_v18  ;;  %v1091_v15 = vld [vmem:[%s2738_s26 + $0xb80] sm:$0xff] }
 0x184   : > { %2073 = vst [vmem:[%s2753_s20 + $0xa30] sm:$0xff] %v1561_v24  ;;  %v561_v24 = vld [vmem:[%s2731_s14 + $0xaf0] sm:$0xff]  ;;  %v1584_v29 = vadd.f32 %v1072_v22, %v560_v21  ;;  %v1092_v18 = vld [vmem:[%s2738_s26 + $0xb88] sm:$0xff] }
 0x185   : > { %2074 = vst [vmem:[%s2753_s20 + $0xa38] sm:$0xff] %v1562_v27  ;;  %v562_v27 = vld [vmem:[%s2731_s14 + $0xaf8] sm:$0xff]  ;;  %v1585_v32 = vadd.f32 %v1073_v25, %v561_v24  ;;  %v1093_v21 = vld [vmem:[%s2738_s26 + $0xb90] sm:$0xff] }
 0x186   : > { %2075 = vst [vmem:[%s2753_s20 + $0xa40] sm:$0xff] %v1563_v30  ;;  %v563_v30 = vld [vmem:[%s2731_s14 + $0xb00] sm:$0xff]  ;;  %v1586_v35 = vadd.f32 %v1074_v28, %v562_v27  ;;  %v1094_v24 = vld [vmem:[%s2738_s26 + $0xb98] sm:$0xff] }
 0x187   : > { %2076 = vst [vmem:[%s2753_s20 + $0xa48] sm:$0xff] %v1564_v33  ;;  %v564_v33 = vld [vmem:[%s2731_s14 + $0xb08] sm:$0xff]  ;;  %v1587_v38 = vadd.f32 %v1075_v31, %v563_v30  ;;  %v1095_v27 = vld [vmem:[%s2738_s26 + $0xba0] sm:$0xff] }
 0x188   : > { %2077 = vst [vmem:[%s2753_s20 + $0xa50] sm:$0xff] %v1565_v36  ;;  %v565_v36 = vld [vmem:[%s2731_s14 + $0xb10] sm:$0xff]  ;;  %v1588_v41 = vadd.f32 %v1076_v34, %v564_v33  ;;  %v1096_v30 = vld [vmem:[%s2738_s26 + $0xba8] sm:$0xff] }
 0x189   : > { %2078 = vst [vmem:[%s2753_s20 + $0xa58] sm:$0xff] %v1566_v39  ;;  %v566_v39 = vld [vmem:[%s2731_s14 + $0xb18] sm:$0xff]  ;;  %v1589_v44 = vadd.f32 %v1077_v37, %v565_v36  ;;  %v1097_v33 = vld [vmem:[%s2738_s26 + $0xbb0] sm:$0xff] }
 0x18a   : > { %2079 = vst [vmem:[%s2753_s20 + $0xa60] sm:$0xff] %v1567_v42  ;;  %v567_v42 = vld [vmem:[%s2731_s14 + $0xb20] sm:$0xff]  ;;  %v1590_v47 = vadd.f32 %v1078_v40, %v566_v39  ;;  %v1098_v36 = vld [vmem:[%s2738_s26 + $0xbb8] sm:$0xff] }
 0x18b   : > { %2080 = vst [vmem:[%s2753_s20 + $0xa68] sm:$0xff] %v1568_v45  ;;  %v568_v45 = vld [vmem:[%s2731_s14 + $0xb28] sm:$0xff]  ;;  %v1591_v50 = vadd.f32 %v1079_v43, %v567_v42  ;;  %v1099_v39 = vld [vmem:[%s2738_s26 + $0xbc0] sm:$0xff] }
 0x18c   : > { %2081 = vst [vmem:[%s2753_s20 + $0xa70] sm:$0xff] %v1569_v48  ;;  %v569_v48 = vld [vmem:[%s2731_s14 + $0xb30] sm:$0xff]  ;;  %v1592_v53 = vadd.f32 %v1080_v46, %v568_v45  ;;  %v1100_v42 = vld [vmem:[%s2738_s26 + $0xbc8] sm:$0xff] }
 0x18d   : > { %2082 = vst [vmem:[%s2753_s20 + $0xa78] sm:$0xff] %v1570_v51  ;;  %v570_v51 = vld [vmem:[%s2731_s14 + $0xb38] sm:$0xff]  ;;  %v1593_v56 = vadd.f32 %v1081_v49, %v569_v48  ;;  %v1101_v45 = vld [vmem:[%s2738_s26 + $0xbd0] sm:$0xff] }
 0x18e   : > { %2083 = vst [vmem:[%s2753_s20 + $0xa80] sm:$0xff] %v1571_v54  ;;  %v571_v54 = vld [vmem:[%s2731_s14 + $0xb40] sm:$0xff]  ;;  %v1594_v59 = vadd.f32 %v1082_v52, %v570_v51  ;;  %v1102_v48 = vld [vmem:[%s2738_s26 + $0xbd8] sm:$0xff] }
 0x18f   : > { %2084 = vst [vmem:[%s2753_s20 + $0xa88] sm:$0xff] %v1572_v57  ;;  %v572_v57 = vld [vmem:[%s2731_s14 + $0xb48] sm:$0xff]  ;;  %v1595_v62 = vadd.f32 %v1083_v55, %v571_v54  ;;  %v1103_v51 = vld [vmem:[%s2738_s26 + $0xbe0] sm:$0xff] }
 0x190   : > { %2085 = vst [vmem:[%s2753_s20 + $0xa90] sm:$0xff] %v1573_v60  ;;  %v573_v60 = vld [vmem:[%s2731_s14 + $0xb50] sm:$0xff]  ;;  %v1596_v1 = vadd.f32 %v1084_v58, %v572_v57  ;;  %v1104_v54 = vld [vmem:[%s2738_s26 + $0xbe8] sm:$0xff] }
 0x191   : > { %2086 = vst [vmem:[%s2753_s20 + $0xa98] sm:$0xff] %v1574_v63  ;;  %v574_v63 = vld [vmem:[%s2731_s14 + $0xb58] sm:$0xff]  ;;  %v1597_v4 = vadd.f32 %v1085_v61, %v573_v60  ;;  %v1105_v57 = vld [vmem:[%s2738_s26 + $0xbf0] sm:$0xff] }
 0x192   : > { %2087 = vst [vmem:[%s2753_s20 + $0xaa0] sm:$0xff] %v1575_v2  ;;  %v575_v2 = vld [vmem:[%s2731_s14 + $0xb60] sm:$0xff]  ;;  %v1598_v7 = vadd.f32 %v1086_v0, %v574_v63  ;;  %v1106_v60 = vld [vmem:[%s2738_s26 + $0xbf8] sm:$0xff] }
 0x193   : > { %2088 = vst [vmem:[%s2753_s20 + $0xaa8] sm:$0xff] %v1576_v5  ;;  %v576_v5 = vld [vmem:[%s2731_s14 + $0xb68] sm:$0xff]  ;;  %v1599_v10 = vadd.f32 %v1087_v3, %v575_v2  ;;  %v1107_v63 = vld [vmem:[%s2738_s26 + $0xc00] sm:$0xff] }
 0x194   : > { %2089 = vst [vmem:[%s2753_s20 + $0xab0] sm:$0xff] %v1577_v8  ;;  %v577_v8 = vld [vmem:[%s2731_s14 + $0xb70] sm:$0xff]  ;;  %v1600_v13 = vadd.f32 %v1088_v6, %v576_v5  ;;  %v1108_v2 = vld [vmem:[%s2738_s26 + $0xc08] sm:$0xff] }
 0x195   : > { %2090 = vst [vmem:[%s2753_s20 + $0xab8] sm:$0xff] %v1578_v11  ;;  %v578_v11 = vld [vmem:[%s2731_s14 + $0xb78] sm:$0xff]  ;;  %v1601_v16 = vadd.f32 %v1089_v9, %v577_v8  ;;  %v1109_v5 = vld [vmem:[%s2738_s26 + $0xc10] sm:$0xff] }
 0x196   : > { %2091 = vst [vmem:[%s2753_s20 + $0xac0] sm:$0xff] %v1579_v14  ;;  %v579_v14 = vld [vmem:[%s2731_s14 + $0xb80] sm:$0xff]  ;;  %v1602_v19 = vadd.f32 %v1090_v12, %v578_v11  ;;  %v1110_v8 = vld [vmem:[%s2738_s26 + $0xc18] sm:$0xff] }
 0x197   : > { %2092 = vst [vmem:[%s2753_s20 + $0xac8] sm:$0xff] %v1580_v17  ;;  %v580_v17 = vld [vmem:[%s2731_s14 + $0xb88] sm:$0xff]  ;;  %v1603_v22 = vadd.f32 %v1091_v15, %v579_v14  ;;  %v1111_v11 = vld [vmem:[%s2738_s26 + $0xc20] sm:$0xff] }
 0x198   : > { %2093 = vst [vmem:[%s2753_s20 + $0xad0] sm:$0xff] %v1581_v20  ;;  %v581_v20 = vld [vmem:[%s2731_s14 + $0xb90] sm:$0xff]  ;;  %v1604_v25 = vadd.f32 %v1092_v18, %v580_v17  ;;  %v1112_v14 = vld [vmem:[%s2738_s26 + $0xc28] sm:$0xff] }
 0x199   : > { %2094 = vst [vmem:[%s2753_s20 + $0xad8] sm:$0xff] %v1582_v23  ;;  %v582_v23 = vld [vmem:[%s2731_s14 + $0xb98] sm:$0xff]  ;;  %v1605_v28 = vadd.f32 %v1093_v21, %v581_v20  ;;  %v1113_v17 = vld [vmem:[%s2738_s26 + $0xc30] sm:$0xff] }
 0x19a   : > { %2095 = vst [vmem:[%s2753_s20 + $0xae0] sm:$0xff] %v1583_v26  ;;  %v583_v26 = vld [vmem:[%s2731_s14 + $0xba0] sm:$0xff]  ;;  %v1606_v31 = vadd.f32 %v1094_v24, %v582_v23  ;;  %v1114_v20 = vld [vmem:[%s2738_s26 + $0xc38] sm:$0xff] }
 0x19b   : > { %2096 = vst [vmem:[%s2753_s20 + $0xae8] sm:$0xff] %v1584_v29  ;;  %v584_v29 = vld [vmem:[%s2731_s14 + $0xba8] sm:$0xff]  ;;  %v1607_v34 = vadd.f32 %v1095_v27, %v583_v26  ;;  %v1115_v23 = vld [vmem:[%s2738_s26 + $0xc40] sm:$0xff] }
 0x19c   : > { %2097 = vst [vmem:[%s2753_s20 + $0xaf0] sm:$0xff] %v1585_v32  ;;  %v585_v32 = vld [vmem:[%s2731_s14 + $0xbb0] sm:$0xff]  ;;  %v1608_v37 = vadd.f32 %v1096_v30, %v584_v29  ;;  %v1116_v26 = vld [vmem:[%s2738_s26 + $0xc48] sm:$0xff] }
 0x19d   : > { %2098 = vst [vmem:[%s2753_s20 + $0xaf8] sm:$0xff] %v1586_v35  ;;  %v586_v35 = vld [vmem:[%s2731_s14 + $0xbb8] sm:$0xff]  ;;  %v1609_v40 = vadd.f32 %v1097_v33, %v585_v32  ;;  %v1117_v29 = vld [vmem:[%s2738_s26 + $0xc50] sm:$0xff] }
 0x19e   : > { %2099 = vst [vmem:[%s2753_s20 + $0xb00] sm:$0xff] %v1587_v38  ;;  %v587_v38 = vld [vmem:[%s2731_s14 + $0xbc0] sm:$0xff]  ;;  %v1610_v43 = vadd.f32 %v1098_v36, %v586_v35  ;;  %v1118_v32 = vld [vmem:[%s2738_s26 + $0xc58] sm:$0xff] }
 0x19f   : > { %2100 = vst [vmem:[%s2753_s20 + $0xb08] sm:$0xff] %v1588_v41  ;;  %v588_v41 = vld [vmem:[%s2731_s14 + $0xbc8] sm:$0xff]  ;;  %v1611_v46 = vadd.f32 %v1099_v39, %v587_v38  ;;  %v1119_v35 = vld [vmem:[%s2738_s26 + $0xc60] sm:$0xff] }
 0x1a0   : > { %2101 = vst [vmem:[%s2753_s20 + $0xb10] sm:$0xff] %v1589_v44  ;;  %v589_v44 = vld [vmem:[%s2731_s14 + $0xbd0] sm:$0xff]  ;;  %v1612_v49 = vadd.f32 %v1100_v42, %v588_v41  ;;  %v1120_v38 = vld [vmem:[%s2738_s26 + $0xc68] sm:$0xff] }
 0x1a1   : > { %2102 = vst [vmem:[%s2753_s20 + $0xb18] sm:$0xff] %v1590_v47  ;;  %v590_v47 = vld [vmem:[%s2731_s14 + $0xbd8] sm:$0xff]  ;;  %v1613_v52 = vadd.f32 %v1101_v45, %v589_v44  ;;  %v1121_v41 = vld [vmem:[%s2738_s26 + $0xc70] sm:$0xff] }
 0x1a2   : > { %2103 = vst [vmem:[%s2753_s20 + $0xb20] sm:$0xff] %v1591_v50  ;;  %v591_v50 = vld [vmem:[%s2731_s14 + $0xbe0] sm:$0xff]  ;;  %v1614_v55 = vadd.f32 %v1102_v48, %v590_v47  ;;  %v1122_v44 = vld [vmem:[%s2738_s26 + $0xc78] sm:$0xff] }
 0x1a3   : > { %2104 = vst [vmem:[%s2753_s20 + $0xb28] sm:$0xff] %v1592_v53  ;;  %v592_v53 = vld [vmem:[%s2731_s14 + $0xbe8] sm:$0xff]  ;;  %v1615_v58 = vadd.f32 %v1103_v51, %v591_v50  ;;  %v1123_v47 = vld [vmem:[%s2738_s26 + $0xc80] sm:$0xff] }
 0x1a4   : > { %2105 = vst [vmem:[%s2753_s20 + $0xb30] sm:$0xff] %v1593_v56  ;;  %v593_v56 = vld [vmem:[%s2731_s14 + $0xbf0] sm:$0xff]  ;;  %v1616_v61 = vadd.f32 %v1104_v54, %v592_v53  ;;  %v1124_v50 = vld [vmem:[%s2738_s26 + $0xc88] sm:$0xff] }
 0x1a5   : > { %2106 = vst [vmem:[%s2753_s20 + $0xb38] sm:$0xff] %v1594_v59  ;;  %v594_v59 = vld [vmem:[%s2731_s14 + $0xbf8] sm:$0xff]  ;;  %v1617_v0 = vadd.f32 %v1105_v57, %v593_v56  ;;  %v1125_v53 = vld [vmem:[%s2738_s26 + $0xc90] sm:$0xff] }
 0x1a6   : > { %2107 = vst [vmem:[%s2753_s20 + $0xb40] sm:$0xff] %v1595_v62  ;;  %v595_v62 = vld [vmem:[%s2731_s14 + $0xc00] sm:$0xff]  ;;  %v1618_v3 = vadd.f32 %v1106_v60, %v594_v59  ;;  %v1126_v56 = vld [vmem:[%s2738_s26 + $0xc98] sm:$0xff] }
 0x1a7   : > { %2108 = vst [vmem:[%s2753_s20 + $0xb48] sm:$0xff] %v1596_v1  ;;  %v596_v1 = vld [vmem:[%s2731_s14 + $0xc08] sm:$0xff]  ;;  %v1619_v6 = vadd.f32 %v1107_v63, %v595_v62  ;;  %v1127_v59 = vld [vmem:[%s2738_s26 + $0xca0] sm:$0xff] }
 0x1a8   : > { %2109 = vst [vmem:[%s2753_s20 + $0xb50] sm:$0xff] %v1597_v4  ;;  %v597_v4 = vld [vmem:[%s2731_s14 + $0xc10] sm:$0xff]  ;;  %v1620_v9 = vadd.f32 %v1108_v2, %v596_v1  ;;  %v1128_v62 = vld [vmem:[%s2738_s26 + $0xca8] sm:$0xff] }
 0x1a9   : > { %2110 = vst [vmem:[%s2753_s20 + $0xb58] sm:$0xff] %v1598_v7  ;;  %v598_v7 = vld [vmem:[%s2731_s14 + $0xc18] sm:$0xff]  ;;  %v1621_v12 = vadd.f32 %v1109_v5, %v597_v4  ;;  %v1129_v1 = vld [vmem:[%s2738_s26 + $0xcb0] sm:$0xff] }
 0x1aa   : > { %2111 = vst [vmem:[%s2753_s20 + $0xb60] sm:$0xff] %v1599_v10  ;;  %v599_v10 = vld [vmem:[%s2731_s14 + $0xc20] sm:$0xff]  ;;  %v1622_v15 = vadd.f32 %v1110_v8, %v598_v7  ;;  %v1130_v4 = vld [vmem:[%s2738_s26 + $0xcb8] sm:$0xff] }
 0x1ab   : > { %2112 = vst [vmem:[%s2753_s20 + $0xb68] sm:$0xff] %v1600_v13  ;;  %v600_v13 = vld [vmem:[%s2731_s14 + $0xc28] sm:$0xff]  ;;  %v1623_v18 = vadd.f32 %v1111_v11, %v599_v10  ;;  %v1131_v7 = vld [vmem:[%s2738_s26 + $0xcc0] sm:$0xff] }
 0x1ac   : > { %2113 = vst [vmem:[%s2753_s20 + $0xb70] sm:$0xff] %v1601_v16  ;;  %v601_v16 = vld [vmem:[%s2731_s14 + $0xc30] sm:$0xff]  ;;  %v1624_v21 = vadd.f32 %v1112_v14, %v600_v13  ;;  %v1132_v10 = vld [vmem:[%s2738_s26 + $0xcc8] sm:$0xff] }
 0x1ad   : > { %2114 = vst [vmem:[%s2753_s20 + $0xb78] sm:$0xff] %v1602_v19  ;;  %v602_v19 = vld [vmem:[%s2731_s14 + $0xc38] sm:$0xff]  ;;  %v1625_v24 = vadd.f32 %v1113_v17, %v601_v16  ;;  %v1133_v13 = vld [vmem:[%s2738_s26 + $0xcd0] sm:$0xff] }
 0x1ae   : > { %2115 = vst [vmem:[%s2753_s20 + $0xb80] sm:$0xff] %v1603_v22  ;;  %v603_v22 = vld [vmem:[%s2731_s14 + $0xc40] sm:$0xff]  ;;  %v1626_v27 = vadd.f32 %v1114_v20, %v602_v19  ;;  %v1134_v16 = vld [vmem:[%s2738_s26 + $0xcd8] sm:$0xff] }
 0x1af   : > { %2116 = vst [vmem:[%s2753_s20 + $0xb88] sm:$0xff] %v1604_v25  ;;  %v604_v25 = vld [vmem:[%s2731_s14 + $0xc48] sm:$0xff]  ;;  %v1627_v30 = vadd.f32 %v1115_v23, %v603_v22  ;;  %v1135_v19 = vld [vmem:[%s2738_s26 + $0xce0] sm:$0xff] }
 0x1b0   : > { %2117 = vst [vmem:[%s2753_s20 + $0xb90] sm:$0xff] %v1605_v28  ;;  %v605_v28 = vld [vmem:[%s2731_s14 + $0xc50] sm:$0xff]  ;;  %v1628_v33 = vadd.f32 %v1116_v26, %v604_v25  ;;  %v1136_v22 = vld [vmem:[%s2738_s26 + $0xce8] sm:$0xff] }
 0x1b1   : > { %2118 = vst [vmem:[%s2753_s20 + $0xb98] sm:$0xff] %v1606_v31  ;;  %v606_v31 = vld [vmem:[%s2731_s14 + $0xc58] sm:$0xff]  ;;  %v1629_v36 = vadd.f32 %v1117_v29, %v605_v28  ;;  %v1137_v25 = vld [vmem:[%s2738_s26 + $0xcf0] sm:$0xff] }
 0x1b2   : > { %2119 = vst [vmem:[%s2753_s20 + $0xba0] sm:$0xff] %v1607_v34  ;;  %v607_v34 = vld [vmem:[%s2731_s14 + $0xc60] sm:$0xff]  ;;  %v1630_v39 = vadd.f32 %v1118_v32, %v606_v31  ;;  %v1138_v28 = vld [vmem:[%s2738_s26 + $0xcf8] sm:$0xff] }
 0x1b3   : > { %2120 = vst [vmem:[%s2753_s20 + $0xba8] sm:$0xff] %v1608_v37  ;;  %v608_v37 = vld [vmem:[%s2731_s14 + $0xc68] sm:$0xff]  ;;  %v1631_v42 = vadd.f32 %v1119_v35, %v607_v34  ;;  %v1139_v31 = vld [vmem:[%s2738_s26 + $0xd00] sm:$0xff] }
 0x1b4   : > { %2121 = vst [vmem:[%s2753_s20 + $0xbb0] sm:$0xff] %v1609_v40  ;;  %v609_v40 = vld [vmem:[%s2731_s14 + $0xc70] sm:$0xff]  ;;  %v1632_v45 = vadd.f32 %v1120_v38, %v608_v37  ;;  %v1140_v34 = vld [vmem:[%s2738_s26 + $0xd08] sm:$0xff] }
 0x1b5   : > { %2122 = vst [vmem:[%s2753_s20 + $0xbb8] sm:$0xff] %v1610_v43  ;;  %v610_v43 = vld [vmem:[%s2731_s14 + $0xc78] sm:$0xff]  ;;  %v1633_v48 = vadd.f32 %v1121_v41, %v609_v40  ;;  %v1141_v37 = vld [vmem:[%s2738_s26 + $0xd10] sm:$0xff] }
 0x1b6   : > { %2123 = vst [vmem:[%s2753_s20 + $0xbc0] sm:$0xff] %v1611_v46  ;;  %v611_v46 = vld [vmem:[%s2731_s14 + $0xc80] sm:$0xff]  ;;  %v1634_v51 = vadd.f32 %v1122_v44, %v610_v43  ;;  %v1142_v40 = vld [vmem:[%s2738_s26 + $0xd18] sm:$0xff] }
 0x1b7   : > { %2124 = vst [vmem:[%s2753_s20 + $0xbc8] sm:$0xff] %v1612_v49  ;;  %v612_v49 = vld [vmem:[%s2731_s14 + $0xc88] sm:$0xff]  ;;  %v1635_v54 = vadd.f32 %v1123_v47, %v611_v46  ;;  %v1143_v43 = vld [vmem:[%s2738_s26 + $0xd20] sm:$0xff] }
 0x1b8   : > { %2125 = vst [vmem:[%s2753_s20 + $0xbd0] sm:$0xff] %v1613_v52  ;;  %v613_v52 = vld [vmem:[%s2731_s14 + $0xc90] sm:$0xff]  ;;  %v1636_v57 = vadd.f32 %v1124_v50, %v612_v49  ;;  %v1144_v46 = vld [vmem:[%s2738_s26 + $0xd28] sm:$0xff] }
 0x1b9   : > { %2126 = vst [vmem:[%s2753_s20 + $0xbd8] sm:$0xff] %v1614_v55  ;;  %v614_v55 = vld [vmem:[%s2731_s14 + $0xc98] sm:$0xff]  ;;  %v1637_v60 = vadd.f32 %v1125_v53, %v613_v52  ;;  %v1145_v49 = vld [vmem:[%s2738_s26 + $0xd30] sm:$0xff] }
 0x1ba   : > { %2127 = vst [vmem:[%s2753_s20 + $0xbe0] sm:$0xff] %v1615_v58  ;;  %v615_v58 = vld [vmem:[%s2731_s14 + $0xca0] sm:$0xff]  ;;  %v1638_v63 = vadd.f32 %v1126_v56, %v614_v55  ;;  %v1146_v52 = vld [vmem:[%s2738_s26 + $0xd38] sm:$0xff] }
 0x1bb   : > { %2128 = vst [vmem:[%s2753_s20 + $0xbe8] sm:$0xff] %v1616_v61  ;;  %v616_v61 = vld [vmem:[%s2731_s14 + $0xca8] sm:$0xff]  ;;  %v1639_v2 = vadd.f32 %v1127_v59, %v615_v58  ;;  %v1147_v55 = vld [vmem:[%s2738_s26 + $0xd40] sm:$0xff] }
 0x1bc   : > { %2129 = vst [vmem:[%s2753_s20 + $0xbf0] sm:$0xff] %v1617_v0  ;;  %v617_v0 = vld [vmem:[%s2731_s14 + $0xcb0] sm:$0xff]  ;;  %v1640_v5 = vadd.f32 %v1128_v62, %v616_v61  ;;  %v1148_v58 = vld [vmem:[%s2738_s26 + $0xd48] sm:$0xff] }
 0x1bd   : > { %2130 = vst [vmem:[%s2753_s20 + $0xbf8] sm:$0xff] %v1618_v3  ;;  %v618_v3 = vld [vmem:[%s2731_s14 + $0xcb8] sm:$0xff]  ;;  %v1641_v8 = vadd.f32 %v1129_v1, %v617_v0  ;;  %v1149_v61 = vld [vmem:[%s2738_s26 + $0xd50] sm:$0xff] }
 0x1be   : > { %2131 = vst [vmem:[%s2753_s20 + $0xc00] sm:$0xff] %v1619_v6  ;;  %v619_v6 = vld [vmem:[%s2731_s14 + $0xcc0] sm:$0xff]  ;;  %v1642_v11 = vadd.f32 %v1130_v4, %v618_v3  ;;  %v1150_v0 = vld [vmem:[%s2738_s26 + $0xd58] sm:$0xff] }
 0x1bf   : > { %2132 = vst [vmem:[%s2753_s20 + $0xc08] sm:$0xff] %v1620_v9  ;;  %v620_v9 = vld [vmem:[%s2731_s14 + $0xcc8] sm:$0xff]  ;;  %v1643_v14 = vadd.f32 %v1131_v7, %v619_v6  ;;  %v1151_v3 = vld [vmem:[%s2738_s26 + $0xd60] sm:$0xff] }
 0x1c0   : > { %2133 = vst [vmem:[%s2753_s20 + $0xc10] sm:$0xff] %v1621_v12  ;;  %v621_v12 = vld [vmem:[%s2731_s14 + $0xcd0] sm:$0xff]  ;;  %v1644_v17 = vadd.f32 %v1132_v10, %v620_v9  ;;  %v1152_v6 = vld [vmem:[%s2738_s26 + $0xd68] sm:$0xff] }
 0x1c1   : > { %2134 = vst [vmem:[%s2753_s20 + $0xc18] sm:$0xff] %v1622_v15  ;;  %v622_v15 = vld [vmem:[%s2731_s14 + $0xcd8] sm:$0xff]  ;;  %v1645_v20 = vadd.f32 %v1133_v13, %v621_v12  ;;  %v1153_v9 = vld [vmem:[%s2738_s26 + $0xd70] sm:$0xff] }
 0x1c2   : > { %2135 = vst [vmem:[%s2753_s20 + $0xc20] sm:$0xff] %v1623_v18  ;;  %v623_v18 = vld [vmem:[%s2731_s14 + $0xce0] sm:$0xff]  ;;  %v1646_v23 = vadd.f32 %v1134_v16, %v622_v15  ;;  %v1154_v12 = vld [vmem:[%s2738_s26 + $0xd78] sm:$0xff] }
 0x1c3   : > { %2136 = vst [vmem:[%s2753_s20 + $0xc28] sm:$0xff] %v1624_v21  ;;  %v624_v21 = vld [vmem:[%s2731_s14 + $0xce8] sm:$0xff]  ;;  %v1647_v26 = vadd.f32 %v1135_v19, %v623_v18  ;;  %v1155_v15 = vld [vmem:[%s2738_s26 + $0xd80] sm:$0xff] }
 0x1c4   : > { %2137 = vst [vmem:[%s2753_s20 + $0xc30] sm:$0xff] %v1625_v24  ;;  %v625_v24 = vld [vmem:[%s2731_s14 + $0xcf0] sm:$0xff]  ;;  %v1648_v29 = vadd.f32 %v1136_v22, %v624_v21  ;;  %v1156_v18 = vld [vmem:[%s2738_s26 + $0xd88] sm:$0xff] }
 0x1c5   : > { %2138 = vst [vmem:[%s2753_s20 + $0xc38] sm:$0xff] %v1626_v27  ;;  %v626_v27 = vld [vmem:[%s2731_s14 + $0xcf8] sm:$0xff]  ;;  %v1649_v32 = vadd.f32 %v1137_v25, %v625_v24  ;;  %v1157_v21 = vld [vmem:[%s2738_s26 + $0xd90] sm:$0xff] }
 0x1c6   : > { %2139 = vst [vmem:[%s2753_s20 + $0xc40] sm:$0xff] %v1627_v30  ;;  %v627_v30 = vld [vmem:[%s2731_s14 + $0xd00] sm:$0xff]  ;;  %v1650_v35 = vadd.f32 %v1138_v28, %v626_v27  ;;  %v1158_v24 = vld [vmem:[%s2738_s26 + $0xd98] sm:$0xff] }
 0x1c7   : > { %2140 = vst [vmem:[%s2753_s20 + $0xc48] sm:$0xff] %v1628_v33  ;;  %v628_v33 = vld [vmem:[%s2731_s14 + $0xd08] sm:$0xff]  ;;  %v1651_v38 = vadd.f32 %v1139_v31, %v627_v30  ;;  %v1159_v27 = vld [vmem:[%s2738_s26 + $0xda0] sm:$0xff] }
 0x1c8   : > { %2141 = vst [vmem:[%s2753_s20 + $0xc50] sm:$0xff] %v1629_v36  ;;  %v629_v36 = vld [vmem:[%s2731_s14 + $0xd10] sm:$0xff]  ;;  %v1652_v41 = vadd.f32 %v1140_v34, %v628_v33  ;;  %v1160_v30 = vld [vmem:[%s2738_s26 + $0xda8] sm:$0xff] }
 0x1c9   : > { %2142 = vst [vmem:[%s2753_s20 + $0xc58] sm:$0xff] %v1630_v39  ;;  %v630_v39 = vld [vmem:[%s2731_s14 + $0xd18] sm:$0xff]  ;;  %v1653_v44 = vadd.f32 %v1141_v37, %v629_v36  ;;  %v1161_v33 = vld [vmem:[%s2738_s26 + $0xdb0] sm:$0xff] }
 0x1ca   : > { %2143 = vst [vmem:[%s2753_s20 + $0xc60] sm:$0xff] %v1631_v42  ;;  %v631_v42 = vld [vmem:[%s2731_s14 + $0xd20] sm:$0xff]  ;;  %v1654_v47 = vadd.f32 %v1142_v40, %v630_v39  ;;  %v1162_v36 = vld [vmem:[%s2738_s26 + $0xdb8] sm:$0xff] }
 0x1cb   : > { %2144 = vst [vmem:[%s2753_s20 + $0xc68] sm:$0xff] %v1632_v45  ;;  %v632_v45 = vld [vmem:[%s2731_s14 + $0xd28] sm:$0xff]  ;;  %v1655_v50 = vadd.f32 %v1143_v43, %v631_v42  ;;  %v1163_v39 = vld [vmem:[%s2738_s26 + $0xdc0] sm:$0xff] }
 0x1cc   : > { %2145 = vst [vmem:[%s2753_s20 + $0xc70] sm:$0xff] %v1633_v48  ;;  %v633_v48 = vld [vmem:[%s2731_s14 + $0xd30] sm:$0xff]  ;;  %v1656_v53 = vadd.f32 %v1144_v46, %v632_v45  ;;  %v1164_v42 = vld [vmem:[%s2738_s26 + $0xdc8] sm:$0xff] }
 0x1cd   : > { %2146 = vst [vmem:[%s2753_s20 + $0xc78] sm:$0xff] %v1634_v51  ;;  %v634_v51 = vld [vmem:[%s2731_s14 + $0xd38] sm:$0xff]  ;;  %v1657_v56 = vadd.f32 %v1145_v49, %v633_v48  ;;  %v1165_v45 = vld [vmem:[%s2738_s26 + $0xdd0] sm:$0xff] }
 0x1ce   : > { %2147 = vst [vmem:[%s2753_s20 + $0xc80] sm:$0xff] %v1635_v54  ;;  %v635_v54 = vld [vmem:[%s2731_s14 + $0xd40] sm:$0xff]  ;;  %v1658_v59 = vadd.f32 %v1146_v52, %v634_v51  ;;  %v1166_v48 = vld [vmem:[%s2738_s26 + $0xdd8] sm:$0xff] }
 0x1cf   : > { %2148 = vst [vmem:[%s2753_s20 + $0xc88] sm:$0xff] %v1636_v57  ;;  %v636_v57 = vld [vmem:[%s2731_s14 + $0xd48] sm:$0xff]  ;;  %v1659_v62 = vadd.f32 %v1147_v55, %v635_v54  ;;  %v1167_v51 = vld [vmem:[%s2738_s26 + $0xde0] sm:$0xff] }
 0x1d0   : > { %2149 = vst [vmem:[%s2753_s20 + $0xc90] sm:$0xff] %v1637_v60  ;;  %v637_v60 = vld [vmem:[%s2731_s14 + $0xd50] sm:$0xff]  ;;  %v1660_v1 = vadd.f32 %v1148_v58, %v636_v57  ;;  %v1168_v54 = vld [vmem:[%s2738_s26 + $0xde8] sm:$0xff] }
 0x1d1   : > { %2150 = vst [vmem:[%s2753_s20 + $0xc98] sm:$0xff] %v1638_v63  ;;  %v638_v63 = vld [vmem:[%s2731_s14 + $0xd58] sm:$0xff]  ;;  %v1661_v4 = vadd.f32 %v1149_v61, %v637_v60  ;;  %v1169_v57 = vld [vmem:[%s2738_s26 + $0xdf0] sm:$0xff] }
 0x1d2   : > { %2151 = vst [vmem:[%s2753_s20 + $0xca0] sm:$0xff] %v1639_v2  ;;  %v639_v2 = vld [vmem:[%s2731_s14 + $0xd60] sm:$0xff]  ;;  %v1662_v7 = vadd.f32 %v1150_v0, %v638_v63  ;;  %v1170_v60 = vld [vmem:[%s2738_s26 + $0xdf8] sm:$0xff] }
 0x1d3   : > { %2152 = vst [vmem:[%s2753_s20 + $0xca8] sm:$0xff] %v1640_v5  ;;  %v640_v5 = vld [vmem:[%s2731_s14 + $0xd68] sm:$0xff]  ;;  %v1663_v10 = vadd.f32 %v1151_v3, %v639_v2  ;;  %v1171_v63 = vld [vmem:[%s2738_s26 + $0xe00] sm:$0xff] }
 0x1d4   : > { %2153 = vst [vmem:[%s2753_s20 + $0xcb0] sm:$0xff] %v1641_v8  ;;  %v641_v8 = vld [vmem:[%s2731_s14 + $0xd70] sm:$0xff]  ;;  %v1664_v13 = vadd.f32 %v1152_v6, %v640_v5  ;;  %v1172_v2 = vld [vmem:[%s2738_s26 + $0xe08] sm:$0xff] }
 0x1d5   : > { %2154 = vst [vmem:[%s2753_s20 + $0xcb8] sm:$0xff] %v1642_v11  ;;  %v642_v11 = vld [vmem:[%s2731_s14 + $0xd78] sm:$0xff]  ;;  %v1665_v16 = vadd.f32 %v1153_v9, %v641_v8  ;;  %v1173_v5 = vld [vmem:[%s2738_s26 + $0xe10] sm:$0xff] }
 0x1d6   : > { %2155 = vst [vmem:[%s2753_s20 + $0xcc0] sm:$0xff] %v1643_v14  ;;  %v643_v14 = vld [vmem:[%s2731_s14 + $0xd80] sm:$0xff]  ;;  %v1666_v19 = vadd.f32 %v1154_v12, %v642_v11  ;;  %v1174_v8 = vld [vmem:[%s2738_s26 + $0xe18] sm:$0xff] }
 0x1d7   : > { %2156 = vst [vmem:[%s2753_s20 + $0xcc8] sm:$0xff] %v1644_v17  ;;  %v644_v17 = vld [vmem:[%s2731_s14 + $0xd88] sm:$0xff]  ;;  %v1667_v22 = vadd.f32 %v1155_v15, %v643_v14  ;;  %v1175_v11 = vld [vmem:[%s2738_s26 + $0xe20] sm:$0xff] }
 0x1d8   : > { %2157 = vst [vmem:[%s2753_s20 + $0xcd0] sm:$0xff] %v1645_v20  ;;  %v645_v20 = vld [vmem:[%s2731_s14 + $0xd90] sm:$0xff]  ;;  %v1668_v25 = vadd.f32 %v1156_v18, %v644_v17  ;;  %v1176_v14 = vld [vmem:[%s2738_s26 + $0xe28] sm:$0xff] }
 0x1d9   : > { %2158 = vst [vmem:[%s2753_s20 + $0xcd8] sm:$0xff] %v1646_v23  ;;  %v646_v23 = vld [vmem:[%s2731_s14 + $0xd98] sm:$0xff]  ;;  %v1669_v28 = vadd.f32 %v1157_v21, %v645_v20  ;;  %v1177_v17 = vld [vmem:[%s2738_s26 + $0xe30] sm:$0xff] }
 0x1da   : > { %2159 = vst [vmem:[%s2753_s20 + $0xce0] sm:$0xff] %v1647_v26  ;;  %v647_v26 = vld [vmem:[%s2731_s14 + $0xda0] sm:$0xff]  ;;  %v1670_v31 = vadd.f32 %v1158_v24, %v646_v23  ;;  %v1178_v20 = vld [vmem:[%s2738_s26 + $0xe38] sm:$0xff] }
 0x1db   : > { %2160 = vst [vmem:[%s2753_s20 + $0xce8] sm:$0xff] %v1648_v29  ;;  %v648_v29 = vld [vmem:[%s2731_s14 + $0xda8] sm:$0xff]  ;;  %v1671_v34 = vadd.f32 %v1159_v27, %v647_v26  ;;  %v1179_v23 = vld [vmem:[%s2738_s26 + $0xe40] sm:$0xff] }
 0x1dc   : > { %2161 = vst [vmem:[%s2753_s20 + $0xcf0] sm:$0xff] %v1649_v32  ;;  %v649_v32 = vld [vmem:[%s2731_s14 + $0xdb0] sm:$0xff]  ;;  %v1672_v37 = vadd.f32 %v1160_v30, %v648_v29  ;;  %v1180_v26 = vld [vmem:[%s2738_s26 + $0xe48] sm:$0xff] }
 0x1dd   : > { %2162 = vst [vmem:[%s2753_s20 + $0xcf8] sm:$0xff] %v1650_v35  ;;  %v650_v35 = vld [vmem:[%s2731_s14 + $0xdb8] sm:$0xff]  ;;  %v1673_v40 = vadd.f32 %v1161_v33, %v649_v32  ;;  %v1181_v29 = vld [vmem:[%s2738_s26 + $0xe50] sm:$0xff] }
 0x1de   : > { %2163 = vst [vmem:[%s2753_s20 + $0xd00] sm:$0xff] %v1651_v38  ;;  %v651_v38 = vld [vmem:[%s2731_s14 + $0xdc0] sm:$0xff]  ;;  %v1674_v43 = vadd.f32 %v1162_v36, %v650_v35  ;;  %v1182_v32 = vld [vmem:[%s2738_s26 + $0xe58] sm:$0xff] }
 0x1df   : > { %2164 = vst [vmem:[%s2753_s20 + $0xd08] sm:$0xff] %v1652_v41  ;;  %v652_v41 = vld [vmem:[%s2731_s14 + $0xdc8] sm:$0xff]  ;;  %v1675_v46 = vadd.f32 %v1163_v39, %v651_v38  ;;  %v1183_v35 = vld [vmem:[%s2738_s26 + $0xe60] sm:$0xff] }
 0x1e0   : > { %2165 = vst [vmem:[%s2753_s20 + $0xd10] sm:$0xff] %v1653_v44  ;;  %v653_v44 = vld [vmem:[%s2731_s14 + $0xdd0] sm:$0xff]  ;;  %v1676_v49 = vadd.f32 %v1164_v42, %v652_v41  ;;  %v1184_v38 = vld [vmem:[%s2738_s26 + $0xe68] sm:$0xff] }
 0x1e1   : > { %2166 = vst [vmem:[%s2753_s20 + $0xd18] sm:$0xff] %v1654_v47  ;;  %v654_v47 = vld [vmem:[%s2731_s14 + $0xdd8] sm:$0xff]  ;;  %v1677_v52 = vadd.f32 %v1165_v45, %v653_v44  ;;  %v1185_v41 = vld [vmem:[%s2738_s26 + $0xe70] sm:$0xff] }
 0x1e2   : > { %2167 = vst [vmem:[%s2753_s20 + $0xd20] sm:$0xff] %v1655_v50  ;;  %v655_v50 = vld [vmem:[%s2731_s14 + $0xde0] sm:$0xff]  ;;  %v1678_v55 = vadd.f32 %v1166_v48, %v654_v47  ;;  %v1186_v44 = vld [vmem:[%s2738_s26 + $0xe78] sm:$0xff] }
 0x1e3   : > { %2168 = vst [vmem:[%s2753_s20 + $0xd28] sm:$0xff] %v1656_v53  ;;  %v656_v53 = vld [vmem:[%s2731_s14 + $0xde8] sm:$0xff]  ;;  %v1679_v58 = vadd.f32 %v1167_v51, %v655_v50  ;;  %v1187_v47 = vld [vmem:[%s2738_s26 + $0xe80] sm:$0xff] }
 0x1e4   : > { %2169 = vst [vmem:[%s2753_s20 + $0xd30] sm:$0xff] %v1657_v56  ;;  %v657_v56 = vld [vmem:[%s2731_s14 + $0xdf0] sm:$0xff]  ;;  %v1680_v61 = vadd.f32 %v1168_v54, %v656_v53  ;;  %v1188_v50 = vld [vmem:[%s2738_s26 + $0xe88] sm:$0xff] }
 0x1e5   : > { %2170 = vst [vmem:[%s2753_s20 + $0xd38] sm:$0xff] %v1658_v59  ;;  %v658_v59 = vld [vmem:[%s2731_s14 + $0xdf8] sm:$0xff]  ;;  %v1681_v0 = vadd.f32 %v1169_v57, %v657_v56  ;;  %v1189_v53 = vld [vmem:[%s2738_s26 + $0xe90] sm:$0xff] }
 0x1e6   : > { %2171 = vst [vmem:[%s2753_s20 + $0xd40] sm:$0xff] %v1659_v62  ;;  %v659_v62 = vld [vmem:[%s2731_s14 + $0xe00] sm:$0xff]  ;;  %v1682_v3 = vadd.f32 %v1170_v60, %v658_v59  ;;  %v1190_v56 = vld [vmem:[%s2738_s26 + $0xe98] sm:$0xff] }
 0x1e7   : > { %2172 = vst [vmem:[%s2753_s20 + $0xd48] sm:$0xff] %v1660_v1  ;;  %v660_v1 = vld [vmem:[%s2731_s14 + $0xe08] sm:$0xff]  ;;  %v1683_v6 = vadd.f32 %v1171_v63, %v659_v62  ;;  %v1191_v59 = vld [vmem:[%s2738_s26 + $0xea0] sm:$0xff] }
 0x1e8   : > { %2173 = vst [vmem:[%s2753_s20 + $0xd50] sm:$0xff] %v1661_v4  ;;  %v661_v4 = vld [vmem:[%s2731_s14 + $0xe10] sm:$0xff]  ;;  %v1684_v9 = vadd.f32 %v1172_v2, %v660_v1  ;;  %v1192_v62 = vld [vmem:[%s2738_s26 + $0xea8] sm:$0xff] }
 0x1e9   : > { %2174 = vst [vmem:[%s2753_s20 + $0xd58] sm:$0xff] %v1662_v7  ;;  %v662_v7 = vld [vmem:[%s2731_s14 + $0xe18] sm:$0xff]  ;;  %v1685_v12 = vadd.f32 %v1173_v5, %v661_v4  ;;  %v1193_v1 = vld [vmem:[%s2738_s26 + $0xeb0] sm:$0xff] }
 0x1ea   : > { %2175 = vst [vmem:[%s2753_s20 + $0xd60] sm:$0xff] %v1663_v10  ;;  %v663_v10 = vld [vmem:[%s2731_s14 + $0xe20] sm:$0xff]  ;;  %v1686_v15 = vadd.f32 %v1174_v8, %v662_v7  ;;  %v1194_v4 = vld [vmem:[%s2738_s26 + $0xeb8] sm:$0xff] }
 0x1eb   : > { %2176 = vst [vmem:[%s2753_s20 + $0xd68] sm:$0xff] %v1664_v13  ;;  %v664_v13 = vld [vmem:[%s2731_s14 + $0xe28] sm:$0xff]  ;;  %v1687_v18 = vadd.f32 %v1175_v11, %v663_v10  ;;  %v1195_v7 = vld [vmem:[%s2738_s26 + $0xec0] sm:$0xff] }
 0x1ec   : > { %2177 = vst [vmem:[%s2753_s20 + $0xd70] sm:$0xff] %v1665_v16  ;;  %v665_v16 = vld [vmem:[%s2731_s14 + $0xe30] sm:$0xff]  ;;  %v1688_v21 = vadd.f32 %v1176_v14, %v664_v13  ;;  %v1196_v10 = vld [vmem:[%s2738_s26 + $0xec8] sm:$0xff] }
 0x1ed   : > { %2178 = vst [vmem:[%s2753_s20 + $0xd78] sm:$0xff] %v1666_v19  ;;  %v666_v19 = vld [vmem:[%s2731_s14 + $0xe38] sm:$0xff]  ;;  %v1689_v24 = vadd.f32 %v1177_v17, %v665_v16  ;;  %v1197_v13 = vld [vmem:[%s2738_s26 + $0xed0] sm:$0xff] }
 0x1ee   : > { %2179 = vst [vmem:[%s2753_s20 + $0xd80] sm:$0xff] %v1667_v22  ;;  %v667_v22 = vld [vmem:[%s2731_s14 + $0xe40] sm:$0xff]  ;;  %v1690_v27 = vadd.f32 %v1178_v20, %v666_v19  ;;  %v1198_v16 = vld [vmem:[%s2738_s26 + $0xed8] sm:$0xff] }
 0x1ef   : > { %2180 = vst [vmem:[%s2753_s20 + $0xd88] sm:$0xff] %v1668_v25  ;;  %v668_v25 = vld [vmem:[%s2731_s14 + $0xe48] sm:$0xff]  ;;  %v1691_v30 = vadd.f32 %v1179_v23, %v667_v22  ;;  %v1199_v19 = vld [vmem:[%s2738_s26 + $0xee0] sm:$0xff] }
 0x1f0   : > { %2181 = vst [vmem:[%s2753_s20 + $0xd90] sm:$0xff] %v1669_v28  ;;  %v669_v28 = vld [vmem:[%s2731_s14 + $0xe50] sm:$0xff]  ;;  %v1692_v33 = vadd.f32 %v1180_v26, %v668_v25  ;;  %v1200_v22 = vld [vmem:[%s2738_s26 + $0xee8] sm:$0xff] }
 0x1f1   : > { %2182 = vst [vmem:[%s2753_s20 + $0xd98] sm:$0xff] %v1670_v31  ;;  %v670_v31 = vld [vmem:[%s2731_s14 + $0xe58] sm:$0xff]  ;;  %v1693_v36 = vadd.f32 %v1181_v29, %v669_v28  ;;  %v1201_v25 = vld [vmem:[%s2738_s26 + $0xef0] sm:$0xff] }
 0x1f2   : > { %2183 = vst [vmem:[%s2753_s20 + $0xda0] sm:$0xff] %v1671_v34  ;;  %v671_v34 = vld [vmem:[%s2731_s14 + $0xe60] sm:$0xff]  ;;  %v1694_v39 = vadd.f32 %v1182_v32, %v670_v31  ;;  %v1202_v28 = vld [vmem:[%s2738_s26 + $0xef8] sm:$0xff] }
 0x1f3   : > { %2184 = vst [vmem:[%s2753_s20 + $0xda8] sm:$0xff] %v1672_v37  ;;  %v672_v37 = vld [vmem:[%s2731_s14 + $0xe68] sm:$0xff]  ;;  %v1695_v42 = vadd.f32 %v1183_v35, %v671_v34  ;;  %v1203_v31 = vld [vmem:[%s2738_s26 + $0xf00] sm:$0xff] }
 0x1f4   : > { %2185 = vst [vmem:[%s2753_s20 + $0xdb0] sm:$0xff] %v1673_v40  ;;  %v673_v40 = vld [vmem:[%s2731_s14 + $0xe70] sm:$0xff]  ;;  %v1696_v45 = vadd.f32 %v1184_v38, %v672_v37  ;;  %v1204_v34 = vld [vmem:[%s2738_s26 + $0xf08] sm:$0xff] }
 0x1f5   : > { %2186 = vst [vmem:[%s2753_s20 + $0xdb8] sm:$0xff] %v1674_v43  ;;  %v674_v43 = vld [vmem:[%s2731_s14 + $0xe78] sm:$0xff]  ;;  %v1697_v48 = vadd.f32 %v1185_v41, %v673_v40  ;;  %v1205_v37 = vld [vmem:[%s2738_s26 + $0xf10] sm:$0xff] }
 0x1f6   : > { %2187 = vst [vmem:[%s2753_s20 + $0xdc0] sm:$0xff] %v1675_v46  ;;  %v675_v46 = vld [vmem:[%s2731_s14 + $0xe80] sm:$0xff]  ;;  %v1698_v51 = vadd.f32 %v1186_v44, %v674_v43  ;;  %v1206_v40 = vld [vmem:[%s2738_s26 + $0xf18] sm:$0xff] }
 0x1f7   : > { %2188 = vst [vmem:[%s2753_s20 + $0xdc8] sm:$0xff] %v1676_v49  ;;  %v676_v49 = vld [vmem:[%s2731_s14 + $0xe88] sm:$0xff]  ;;  %v1699_v54 = vadd.f32 %v1187_v47, %v675_v46  ;;  %v1207_v43 = vld [vmem:[%s2738_s26 + $0xf20] sm:$0xff] }
 0x1f8   : > { %2189 = vst [vmem:[%s2753_s20 + $0xdd0] sm:$0xff] %v1677_v52  ;;  %v677_v52 = vld [vmem:[%s2731_s14 + $0xe90] sm:$0xff]  ;;  %v1700_v57 = vadd.f32 %v1188_v50, %v676_v49  ;;  %v1208_v46 = vld [vmem:[%s2738_s26 + $0xf28] sm:$0xff] }
 0x1f9   : > { %2190 = vst [vmem:[%s2753_s20 + $0xdd8] sm:$0xff] %v1678_v55  ;;  %v678_v55 = vld [vmem:[%s2731_s14 + $0xe98] sm:$0xff]  ;;  %v1701_v60 = vadd.f32 %v1189_v53, %v677_v52  ;;  %v1209_v49 = vld [vmem:[%s2738_s26 + $0xf30] sm:$0xff] }
 0x1fa   : > { %2191 = vst [vmem:[%s2753_s20 + $0xde0] sm:$0xff] %v1679_v58  ;;  %v679_v58 = vld [vmem:[%s2731_s14 + $0xea0] sm:$0xff]  ;;  %v1702_v63 = vadd.f32 %v1190_v56, %v678_v55  ;;  %v1210_v52 = vld [vmem:[%s2738_s26 + $0xf38] sm:$0xff] }
 0x1fb   : > { %2192 = vst [vmem:[%s2753_s20 + $0xde8] sm:$0xff] %v1680_v61  ;;  %v680_v61 = vld [vmem:[%s2731_s14 + $0xea8] sm:$0xff]  ;;  %v1703_v2 = vadd.f32 %v1191_v59, %v679_v58  ;;  %v1211_v55 = vld [vmem:[%s2738_s26 + $0xf40] sm:$0xff] }
 0x1fc   : > { %2193 = vst [vmem:[%s2753_s20 + $0xdf0] sm:$0xff] %v1681_v0  ;;  %v681_v0 = vld [vmem:[%s2731_s14 + $0xeb0] sm:$0xff]  ;;  %v1704_v5 = vadd.f32 %v1192_v62, %v680_v61  ;;  %v1212_v58 = vld [vmem:[%s2738_s26 + $0xf48] sm:$0xff] }
 0x1fd   : > { %2194 = vst [vmem:[%s2753_s20 + $0xdf8] sm:$0xff] %v1682_v3  ;;  %v682_v3 = vld [vmem:[%s2731_s14 + $0xeb8] sm:$0xff]  ;;  %v1705_v8 = vadd.f32 %v1193_v1, %v681_v0  ;;  %v1213_v61 = vld [vmem:[%s2738_s26 + $0xf50] sm:$0xff] }
 0x1fe   : > { %2195 = vst [vmem:[%s2753_s20 + $0xe00] sm:$0xff] %v1683_v6  ;;  %v683_v6 = vld [vmem:[%s2731_s14 + $0xec0] sm:$0xff]  ;;  %v1706_v11 = vadd.f32 %v1194_v4, %v682_v3  ;;  %v1214_v0 = vld [vmem:[%s2738_s26 + $0xf58] sm:$0xff] }
 0x1ff   : > { %2196 = vst [vmem:[%s2753_s20 + $0xe08] sm:$0xff] %v1684_v9  ;;  %v684_v9 = vld [vmem:[%s2731_s14 + $0xec8] sm:$0xff]  ;;  %v1707_v14 = vadd.f32 %v1195_v7, %v683_v6  ;;  %v1215_v3 = vld [vmem:[%s2738_s26 + $0xf60] sm:$0xff] }
 0x200   : > { %2197 = vst [vmem:[%s2753_s20 + $0xe10] sm:$0xff] %v1685_v12  ;;  %v685_v12 = vld [vmem:[%s2731_s14 + $0xed0] sm:$0xff]  ;;  %v1708_v17 = vadd.f32 %v1196_v10, %v684_v9  ;;  %v1216_v6 = vld [vmem:[%s2738_s26 + $0xf68] sm:$0xff] }
 0x201   : > { %2198 = vst [vmem:[%s2753_s20 + $0xe18] sm:$0xff] %v1686_v15  ;;  %v686_v15 = vld [vmem:[%s2731_s14 + $0xed8] sm:$0xff]  ;;  %v1709_v20 = vadd.f32 %v1197_v13, %v685_v12  ;;  %v1217_v9 = vld [vmem:[%s2738_s26 + $0xf70] sm:$0xff] }
 0x202   : > { %2199 = vst [vmem:[%s2753_s20 + $0xe20] sm:$0xff] %v1687_v18  ;;  %v687_v18 = vld [vmem:[%s2731_s14 + $0xee0] sm:$0xff]  ;;  %v1710_v23 = vadd.f32 %v1198_v16, %v686_v15  ;;  %v1218_v12 = vld [vmem:[%s2738_s26 + $0xf78] sm:$0xff] }
 0x203   : > { %2200 = vst [vmem:[%s2753_s20 + $0xe28] sm:$0xff] %v1688_v21  ;;  %v688_v21 = vld [vmem:[%s2731_s14 + $0xee8] sm:$0xff]  ;;  %v1711_v26 = vadd.f32 %v1199_v19, %v687_v18  ;;  %v1219_v15 = vld [vmem:[%s2738_s26 + $0xf80] sm:$0xff] }
 0x204   : > { %2201 = vst [vmem:[%s2753_s20 + $0xe30] sm:$0xff] %v1689_v24  ;;  %v689_v24 = vld [vmem:[%s2731_s14 + $0xef0] sm:$0xff]  ;;  %v1712_v29 = vadd.f32 %v1200_v22, %v688_v21  ;;  %v1220_v18 = vld [vmem:[%s2738_s26 + $0xf88] sm:$0xff] }
 0x205   : > { %2202 = vst [vmem:[%s2753_s20 + $0xe38] sm:$0xff] %v1690_v27  ;;  %v690_v27 = vld [vmem:[%s2731_s14 + $0xef8] sm:$0xff]  ;;  %v1713_v32 = vadd.f32 %v1201_v25, %v689_v24  ;;  %v1221_v21 = vld [vmem:[%s2738_s26 + $0xf90] sm:$0xff] }
 0x206   : > { %2203 = vst [vmem:[%s2753_s20 + $0xe40] sm:$0xff] %v1691_v30  ;;  %v691_v30 = vld [vmem:[%s2731_s14 + $0xf00] sm:$0xff]  ;;  %v1714_v35 = vadd.f32 %v1202_v28, %v690_v27  ;;  %v1222_v24 = vld [vmem:[%s2738_s26 + $0xf98] sm:$0xff] }
 0x207   : > { %2204 = vst [vmem:[%s2753_s20 + $0xe48] sm:$0xff] %v1692_v33  ;;  %v692_v33 = vld [vmem:[%s2731_s14 + $0xf08] sm:$0xff]  ;;  %v1715_v38 = vadd.f32 %v1203_v31, %v691_v30  ;;  %v1223_v27 = vld [vmem:[%s2738_s26 + $0xfa0] sm:$0xff] }
 0x208   : > { %2205 = vst [vmem:[%s2753_s20 + $0xe50] sm:$0xff] %v1693_v36  ;;  %v693_v36 = vld [vmem:[%s2731_s14 + $0xf10] sm:$0xff]  ;;  %v1716_v41 = vadd.f32 %v1204_v34, %v692_v33  ;;  %v1224_v30 = vld [vmem:[%s2738_s26 + $0xfa8] sm:$0xff] }
 0x209   : > { %2206 = vst [vmem:[%s2753_s20 + $0xe58] sm:$0xff] %v1694_v39  ;;  %v694_v39 = vld [vmem:[%s2731_s14 + $0xf18] sm:$0xff]  ;;  %v1717_v44 = vadd.f32 %v1205_v37, %v693_v36  ;;  %v1225_v33 = vld [vmem:[%s2738_s26 + $0xfb0] sm:$0xff] }
 0x20a   : > { %2207 = vst [vmem:[%s2753_s20 + $0xe60] sm:$0xff] %v1695_v42  ;;  %v695_v42 = vld [vmem:[%s2731_s14 + $0xf20] sm:$0xff]  ;;  %v1718_v47 = vadd.f32 %v1206_v40, %v694_v39  ;;  %v1226_v36 = vld [vmem:[%s2738_s26 + $0xfb8] sm:$0xff] }
 0x20b   : > { %2208 = vst [vmem:[%s2753_s20 + $0xe68] sm:$0xff] %v1696_v45  ;;  %v696_v45 = vld [vmem:[%s2731_s14 + $0xf28] sm:$0xff]  ;;  %v1719_v50 = vadd.f32 %v1207_v43, %v695_v42  ;;  %v1227_v39 = vld [vmem:[%s2738_s26 + $0xfc0] sm:$0xff] }
 0x20c   : > { %2209 = vst [vmem:[%s2753_s20 + $0xe70] sm:$0xff] %v1697_v48  ;;  %v697_v48 = vld [vmem:[%s2731_s14 + $0xf30] sm:$0xff]  ;;  %v1720_v53 = vadd.f32 %v1208_v46, %v696_v45  ;;  %v1228_v42 = vld [vmem:[%s2738_s26 + $0xfc8] sm:$0xff] }
 0x20d   : > { %2210 = vst [vmem:[%s2753_s20 + $0xe78] sm:$0xff] %v1698_v51  ;;  %v698_v51 = vld [vmem:[%s2731_s14 + $0xf38] sm:$0xff]  ;;  %v1721_v56 = vadd.f32 %v1209_v49, %v697_v48  ;;  %v1229_v45 = vld [vmem:[%s2738_s26 + $0xfd0] sm:$0xff] }
 0x20e   : > { %2211 = vst [vmem:[%s2753_s20 + $0xe80] sm:$0xff] %v1699_v54  ;;  %v699_v54 = vld [vmem:[%s2731_s14 + $0xf40] sm:$0xff]  ;;  %v1722_v59 = vadd.f32 %v1210_v52, %v698_v51  ;;  %v1230_v48 = vld [vmem:[%s2738_s26 + $0xfd8] sm:$0xff] }
 0x20f   : > { %2212 = vst [vmem:[%s2753_s20 + $0xe88] sm:$0xff] %v1700_v57  ;;  %v700_v57 = vld [vmem:[%s2731_s14 + $0xf48] sm:$0xff]  ;;  %v1723_v62 = vadd.f32 %v1211_v55, %v699_v54  ;;  %v1231_v51 = vld [vmem:[%s2738_s26 + $0xfe0] sm:$0xff] }
 0x210   : > { %2213 = vst [vmem:[%s2753_s20 + $0xe90] sm:$0xff] %v1701_v60  ;;  %v701_v60 = vld [vmem:[%s2731_s14 + $0xf50] sm:$0xff]  ;;  %v1724_v1 = vadd.f32 %v1212_v58, %v700_v57  ;;  %v1232_v54 = vld [vmem:[%s2738_s26 + $0xfe8] sm:$0xff] }
 0x211   : > { %2214 = vst [vmem:[%s2753_s20 + $0xe98] sm:$0xff] %v1702_v63  ;;  %v702_v63 = vld [vmem:[%s2731_s14 + $0xf58] sm:$0xff]  ;;  %v1725_v4 = vadd.f32 %v1213_v61, %v701_v60  ;;  %v1233_v57 = vld [vmem:[%s2738_s26 + $0xff0] sm:$0xff] }
 0x212   : > { %2215 = vst [vmem:[%s2753_s20 + $0xea0] sm:$0xff] %v1703_v2  ;;  %v703_v2 = vld [vmem:[%s2731_s14 + $0xf60] sm:$0xff]  ;;  %v1726_v7 = vadd.f32 %v1214_v0, %v702_v63  ;;  %v1234_v60 = vld [vmem:[%s2738_s26 + $0xff8] sm:$0xff] }
 0x213   : > { %2216 = vst [vmem:[%s2753_s20 + $0xea8] sm:$0xff] %v1704_v5  ;;  %v704_v5 = vld [vmem:[%s2731_s14 + $0xf68] sm:$0xff]  ;;  %v1727_v10 = vadd.f32 %v1215_v3, %v703_v2 }
 0x214   : > { %2217 = vst [vmem:[%s2753_s20 + $0xeb0] sm:$0xff] %v1705_v8  ;;  %v705_v8 = vld [vmem:[%s2731_s14 + $0xf70] sm:$0xff]  ;;  %v1728_v13 = vadd.f32 %v1216_v6, %v704_v5 }
 0x215   : > { %2218 = vst [vmem:[%s2753_s20 + $0xeb8] sm:$0xff] %v1706_v11  ;;  %v706_v11 = vld [vmem:[%s2731_s14 + $0xf78] sm:$0xff]  ;;  %v1729_v16 = vadd.f32 %v1217_v9, %v705_v8 }
 0x216   : > { %2219 = vst [vmem:[%s2753_s20 + $0xec0] sm:$0xff] %v1707_v14  ;;  %v707_v14 = vld [vmem:[%s2731_s14 + $0xf80] sm:$0xff]  ;;  %v1730_v19 = vadd.f32 %v1218_v12, %v706_v11 }
 0x217   : > { %2220 = vst [vmem:[%s2753_s20 + $0xec8] sm:$0xff] %v1708_v17  ;;  %v708_v17 = vld [vmem:[%s2731_s14 + $0xf88] sm:$0xff]  ;;  %v1731_v22 = vadd.f32 %v1219_v15, %v707_v14 }
 0x218   : > { %2221 = vst [vmem:[%s2753_s20 + $0xed0] sm:$0xff] %v1709_v20  ;;  %v709_v20 = vld [vmem:[%s2731_s14 + $0xf90] sm:$0xff]  ;;  %v1732_v25 = vadd.f32 %v1220_v18, %v708_v17 }
 0x219   : > { %2222 = vst [vmem:[%s2753_s20 + $0xed8] sm:$0xff] %v1710_v23  ;;  %v710_v23 = vld [vmem:[%s2731_s14 + $0xf98] sm:$0xff]  ;;  %v1733_v28 = vadd.f32 %v1221_v21, %v709_v20 }
 0x21a   : > { %2223 = vst [vmem:[%s2753_s20 + $0xee0] sm:$0xff] %v1711_v26  ;;  %v711_v26 = vld [vmem:[%s2731_s14 + $0xfa0] sm:$0xff]  ;;  %v1734_v31 = vadd.f32 %v1222_v24, %v710_v23 }
 0x21b   : > { %2224 = vst [vmem:[%s2753_s20 + $0xee8] sm:$0xff] %v1712_v29  ;;  %v712_v29 = vld [vmem:[%s2731_s14 + $0xfa8] sm:$0xff]  ;;  %v1735_v34 = vadd.f32 %v1223_v27, %v711_v26 }
 0x21c   : > { %2225 = vst [vmem:[%s2753_s20 + $0xef0] sm:$0xff] %v1713_v32  ;;  %v713_v32 = vld [vmem:[%s2731_s14 + $0xfb0] sm:$0xff]  ;;  %v1736_v37 = vadd.f32 %v1224_v30, %v712_v29 }
 0x21d   : > { %2226 = vst [vmem:[%s2753_s20 + $0xef8] sm:$0xff] %v1714_v35  ;;  %v714_v35 = vld [vmem:[%s2731_s14 + $0xfb8] sm:$0xff]  ;;  %v1737_v40 = vadd.f32 %v1225_v33, %v713_v32 }
 0x21e   : > { %2227 = vst [vmem:[%s2753_s20 + $0xf00] sm:$0xff] %v1715_v38  ;;  %v715_v38 = vld [vmem:[%s2731_s14 + $0xfc0] sm:$0xff]  ;;  %v1738_v43 = vadd.f32 %v1226_v36, %v714_v35 }
 0x21f   : > { %2228 = vst [vmem:[%s2753_s20 + $0xf08] sm:$0xff] %v1716_v41  ;;  %v716_v41 = vld [vmem:[%s2731_s14 + $0xfc8] sm:$0xff]  ;;  %v1739_v46 = vadd.f32 %v1227_v39, %v715_v38 }
 0x220   : > { %2229 = vst [vmem:[%s2753_s20 + $0xf10] sm:$0xff] %v1717_v44  ;;  %v717_v44 = vld [vmem:[%s2731_s14 + $0xfd0] sm:$0xff]  ;;  %v1740_v49 = vadd.f32 %v1228_v42, %v716_v41 }
 0x221   : > { %2230 = vst [vmem:[%s2753_s20 + $0xf18] sm:$0xff] %v1718_v47  ;;  %v718_v47 = vld [vmem:[%s2731_s14 + $0xfd8] sm:$0xff]  ;;  %v1741_v52 = vadd.f32 %v1229_v45, %v717_v44 }
 0x222   : > { %2231 = vst [vmem:[%s2753_s20 + $0xf20] sm:$0xff] %v1719_v50  ;;  %v719_v50 = vld [vmem:[%s2731_s14 + $0xfe0] sm:$0xff]  ;;  %v1742_v55 = vadd.f32 %v1230_v48, %v718_v47 }
 0x223   : > { %2232 = vst [vmem:[%s2753_s20 + $0xf28] sm:$0xff] %v1720_v53  ;;  %v720_v53 = vld [vmem:[%s2731_s14 + $0xfe8] sm:$0xff]  ;;  %v1743_v58 = vadd.f32 %v1231_v51, %v719_v50 }
 0x224   : > { %2233 = vst [vmem:[%s2753_s20 + $0xf30] sm:$0xff] %v1721_v56  ;;  %v721_v56 = vld [vmem:[%s2731_s14 + $0xff0] sm:$0xff]  ;;  %v1744_v61 = vadd.f32 %v1232_v54, %v720_v53 }
 0x225   : > { %2234 = vst [vmem:[%s2753_s20 + $0xf38] sm:$0xff] %v1722_v59  ;;  %v722_v59 = vld [vmem:[%s2731_s14 + $0xff8] sm:$0xff] }
 0x226   : > { %2235 = vst [vmem:[%s2753_s20 + $0xf40] sm:$0xff] %v1723_v62  ;;  %v1745_v62 = vadd.f32 %v1233_v57, %v721_v56  ;;  %v1746_v63 = vadd.f32 %v1234_v60, %v722_v59 }
 0x227   : > { %2236 = vst [vmem:[%s2753_s20 + $0xf48] sm:$0xff] %v1724_v1 }
 0x228   : > { %2237 = vst [vmem:[%s2753_s20 + $0xf50] sm:$0xff] %v1725_v4 }
 0x229   : > { %2238 = vst [vmem:[%s2753_s20 + $0xf58] sm:$0xff] %v1726_v7 }
 0x22a   : > { %2239 = vst [vmem:[%s2753_s20 + $0xf60] sm:$0xff] %v1727_v10 }
 0x22b   : > { %2240 = vst [vmem:[%s2753_s20 + $0xf68] sm:$0xff] %v1728_v13 }
 0x22c   : > { %2241 = vst [vmem:[%s2753_s20 + $0xf70] sm:$0xff] %v1729_v16 }
 0x22d   : > { %2242 = vst [vmem:[%s2753_s20 + $0xf78] sm:$0xff] %v1730_v19 }
 0x22e   : > { %2243 = vst [vmem:[%s2753_s20 + $0xf80] sm:$0xff] %v1731_v22 }
 0x22f   : > { %2244 = vst [vmem:[%s2753_s20 + $0xf88] sm:$0xff] %v1732_v25 }
 0x230   : > { %2245 = vst [vmem:[%s2753_s20 + $0xf90] sm:$0xff] %v1733_v28 }
 0x231   : > { %2246 = vst [vmem:[%s2753_s20 + $0xf98] sm:$0xff] %v1734_v31 }
 0x232   : > { %2247 = vst [vmem:[%s2753_s20 + $0xfa0] sm:$0xff] %v1735_v34 }
 0x233   : > { %2248 = vst [vmem:[%s2753_s20 + $0xfa8] sm:$0xff] %v1736_v37 }
 0x234   : > { %2249 = vst [vmem:[%s2753_s20 + $0xfb0] sm:$0xff] %v1737_v40 }
 0x235   : > { %2250 = vst [vmem:[%s2753_s20 + $0xfb8] sm:$0xff] %v1738_v43 }
 0x236   : > { %2251 = vst [vmem:[%s2753_s20 + $0xfc0] sm:$0xff] %v1739_v46 }
 0x237   : > { %2252 = vst [vmem:[%s2753_s20 + $0xfc8] sm:$0xff] %v1740_v49 }
 0x238   : > { %2253 = vst [vmem:[%s2753_s20 + $0xfd0] sm:$0xff] %v1741_v52 }
 0x239   : > { %2254 = vst [vmem:[%s2753_s20 + $0xfd8] sm:$0xff] %v1742_v55 }
 0x23a   : > { %2255 = vst [vmem:[%s2753_s20 + $0xfe0] sm:$0xff] %v1743_v58 }
 0x23b   : > { %2256 = vst [vmem:[%s2753_s20 + $0xfe8] sm:$0xff] %v1744_v61 }
 0x23c   : > { %2257 = vst [vmem:[%s2753_s20 + $0xff0] sm:$0xff] %v1745_v62 }
 0x23d   : > { %2258 = vst [vmem:[%s2753_s20 + $0xff8] sm:$0xff] %v1746_v63 }
 0x23e   : > { %2541 = shalt.err (!%p2538_p0)
}
 0x23f   : > { %s2588_s23 = smov 1024   ;;  %s2589_s7 = smov 64  }
 0x240   : > { %2403 = dma.vmem_to_hbm [thread:$0]  (%p2655_p11), %s2274_s16, 65536, %s2276_s17, %s2260_s19, %s2588_s23, %s2588_s23, %s2589_s7  }
 0x241 PF: > { %s2290_s14 = sand.u32 1, %s2572_s9   ;;  %p4325_p1 = scmp.ge.s32.totalorder %s2584_s12, 2 }
 0x242   : > { %s2291_s4 = scalar_lea.sflag [#allocation4], %s2290_s14 }
 0x243   : > { %p2413_p4 = pnand %p4325_p1, %p2659_p12 }
 0x245   : > { %p2414_p7 = pneg %p2413_p4 }
 0x247   : > { %2567 = dma.done.wait (%p2414_p7), %s2291_s4, 65536  }
 0x248   : > { %2569 = vsyncadd (%p2414_p7), %s2291_s4, 4294901760  ;;  %p18_p5 = scmp.ge.s32.totalorder %s2630_s15, 4   ;;  %s4326_s9 = smov %s2576_s10 }
 0x249   : > { %s4327_s10 = smov %s2580_s11  ;;  %s4328_s11 = smov %s2642_s18 }
 0x24a   : > { %s4329_s12 = smov %s2630_s15  ;;  %20 = sbr.rel (!%p18_p5) target bundleno = 7 (0x7), region = 86 }
 0x24f   :  { %2297 = vsyncpa [#allocation3], 1 }
 0x250   :  { %2299 = vsyncpa [#allocation3 + $0x1], 1 }
 0x251   :  { %2300 = vsyncpa [#allocation6], 1 }
 0x252   :  { %2302 = vsyncpa [#allocation6 + $0x1], 1 }
 0x253   :  { %2303 = vsyncpa [#allocation4], 1 }
 0x254   :  { %2305 = vsyncpa [#allocation4 + $0x1], 1 }

</bundles_post_ra>
